<compile_context>
chip_gen: v7x
topology: tpu7x:2x2x1
jax: 0.10.0
libtpu: 0.0.40
codegen_flags: <defaults>
</compile_context>

<pallas_src>
import functools

import jax
import jax.numpy as jnp
from jax.experimental import pallas as pl
from jax.experimental.pallas import tpu as pltpu

INPUT_DIM = 784
HIDDEN_DIM = 400
LATENT_DIM = 20

_LANE = 128


def _round_up(n, m):
    return ((n + m - 1) // m) * m


def _pad2(a, rows, cols):
    """Zero-pad a 2-D array up to (rows, cols)."""
    return jnp.zeros((rows, cols), a.dtype).at[: a.shape[0], : a.shape[1]].set(a)


def _vae_kernel(x_ref, eps_ref,
                w1_ref, b1_ref,
                w2_ref, b2_ref,
                w3_ref, b3_ref,
                w4_ref, b4_ref,
                dec_ref, enc_ref):
    bf16 = jnp.bfloat16
    lat_pad = eps_ref.shape[1]                       # padded latent width (128)

    x = x_ref[...]                                   # already bf16 (cast in wrapper)

    # ---- encoder: Linear -> ReLU -> fused (mu | log_var) Linear ----
    h = jnp.dot(x, w1_ref[...], preferred_element_type=jnp.float32) + b1_ref[...]
    h = jnp.maximum(h, 0.0)

    enc = jnp.dot(h.astype(bf16), w2_ref[...],
                  preferred_element_type=jnp.float32) + b2_ref[...]   # (TB, 2*lat_pad)

    mu = enc[:, :lat_pad]
    lv = enc[:, lat_pad:]

    # ---- reparameterize: z = mu + eps * exp(0.5 * log_var)  (f32 VPU/EUP) ----
    std = jnp.exp(0.5 * lv)
    z = mu + eps_ref[...] * std

    # ---- decoder: Linear -> ReLU -> Linear -> Sigmoid ----
    h2 = jnp.dot(z.astype(bf16), w3_ref[...],
                 preferred_element_type=jnp.float32) + b3_ref[...]
    h2 = jnp.maximum(h2, 0.0)
    logits = jnp.dot(h2.astype(bf16), w4_ref[...],
                     preferred_element_type=jnp.float32) + b4_ref[...]

    dec_ref[...] = jax.nn.sigmoid(logits).astype(dec_ref.dtype)      # bf16 store
    enc_ref[...] = enc                                               # f32 [mu|lv]


def prepare_padded_params(params):
    """Pad + cast parameters ONCE (at init / after an optimizer step), outside the
    per-batch forward.  Weights -> bf16, biases -> f32 (1, N) rows; feature dims
    rounded up to multiples of 128 lanes.  Zero padding keeps the math exact.
    The encoder head is laid out as [mu cols | 0 | log_var cols | 0] so a single
    matmul yields the fused (mu | log_var) block (== torch.chunk(encoded, 2, 1))."""
    f32, bf16 = jnp.float32, jnp.bfloat16
    in_dim, hidden = params["w1"].shape
    latent = params["w3"].shape[0]

    in_pad = _round_up(in_dim, _LANE)       # 784 -> 896
    hid_pad = _round_up(hidden, _LANE)      # 400 -> 512
    lat_pad = _round_up(latent, _LANE)      # 20  -> 128

    w2 = params["w2"].astype(bf16)
    b2 = params["b2"].astype(f32)
    w2p = jnp.zeros((hid_pad, 2 * lat_pad), bf16)
    w2p = w2p.at[:hidden, :latent].set(w2[:, :latent])
    w2p = w2p.at[:hidden, lat_pad:lat_pad + latent].set(w2[:, latent:])
    b2p = jnp.zeros((1, 2 * lat_pad), f32)
    b2p = b2p.at[0, :latent].set(b2[:latent])
    b2p = b2p.at[0, lat_pad:lat_pad + latent].set(b2[latent:])

    return {
        "w1": _pad2(params["w1"].astype(bf16), in_pad, hid_pad),
        "b1": _pad2(params["b1"].reshape(1, -1).astype(f32), 1, hid_pad),
        "w2": w2p,
        "b2": b2p,
        "w3": _pad2(params["w3"].astype(bf16), lat_pad, hid_pad),
        "b3": _pad2(params["b3"].reshape(1, -1).astype(f32), 1, hid_pad),
        "w4": _pad2(params["w4"].astype(bf16), hid_pad, in_pad),
        "b4": _pad2(params["b4"].reshape(1, -1).astype(f32), 1, in_pad),
    }


def _pick_batch_tile(batch):
    # 256-row tiles only when there are >= 4 tiles (>= 2 grid steps per v7x
    # TensorCore, and full 256x256 MXU rows on v6e/v7x); otherwise 128 rows,
    # which already fills v5e's 128x128 MXU and keeps >= 2 steps at B >= 256.
    return 256 if batch >= 1024 else 128


@functools.partial(jax.jit, static_argnames=("batch_tile",))
def vae_forward(x, eps, padded_params, *, batch_tile=None):
    """x: (B, input_dim) f32/bf16, eps: (B, latent_dim) f32,
    padded_params: output of prepare_padded_params().
    Returns (decoded bf16 (B, input_dim), mu f32 (B, latent), log_var f32 (B, latent)).
    NOTE: for best end-to-end perf call this inside the larger training jit so the
    final unpad slices fuse into the downstream loss instead of materializing."""
    B, in_dim = x.shape
    latent = eps.shape[1]

    pp = padded_params
    in_pad, hid_pad = pp["w1"].shape
    lat_pad = pp["w3"].shape[0]

    if batch_tile is None:
        batch_tile = _pick_batch_tile(B)
    b_pad = _round_up(B, batch_tile)        # pad the batch, never shrink the tile

    f32, bf16 = jnp.float32, jnp.bfloat16

    # Activations: x DMA'd as bf16 (matmul input dtype), eps stays f32.
    xp = _pad2(x.astype(bf16), b_pad, in_pad)
    epsp = _pad2(eps.astype(f32), b_pad, lat_pad)

    grid = (b_pad // batch_tile,)

    def batch_spec(cols):
        return pl.BlockSpec((batch_tile, cols), lambda i: (i, 0))

    def resident_spec(shape):               # constant index -> stays in VMEM
        return pl.BlockSpec(shape, lambda i: (0,) * len(shape))

    in_specs = [
        batch_spec(in_pad),                   # x (bf16)
        batch_spec(lat_pad),                  # eps (f32)
        resident_spec((in_pad, hid_pad)),     # w1
        resident_spec((1, hid_pad)),          # b1
        resident_spec((hid_pad, 2 * lat_pad)),  # w2 (fused mu|logvar)
        resident_spec((1, 2 * lat_pad)),      # b2
        resident_spec((lat_pad, hid_pad)),    # w3
        resident_spec((1, hid_pad)),          # b3
        resident_spec((hid_pad, in_pad)),     # w4
        resident_spec((1, in_pad)),           # b4
    ]
    out_specs = [
        batch_spec(in_pad),                   # decoded (padded, bf16)
        batch_spec(2 * lat_pad),              # encoded = [mu | logvar] (padded, f32)
    ]
    out_shapes = (
        jax.ShapeDtypeStruct((b_pad, in_pad), bf16),
        jax.ShapeDtypeStruct((b_pad, 2 * lat_pad), f32),
    )

    dec_p, enc_p = pl.pallas_call(
        _vae_kernel,
        out_shape=out_shapes,
        grid_spec=pltpu.PrefetchScalarGridSpec(
            num_scalar_prefetch=0,
            grid=grid,
            in_specs=in_specs,
            out_specs=out_specs,
        ),
        compiler_params=pltpu.CompilerParams(
            dimension_semantics=("parallel",),
            vmem_limit_bytes=32 * 1024 * 1024,
        ),
    )(xp, epsp,
      pp["w1"], pp["b1"], pp["w2"], pp["b2"],
      pp["w3"], pp["b3"], pp["w4"], pp["b4"])

    decoded = dec_p[:B, :in_dim]                       # bf16
    mu = enc_p[:B, :latent]                            # f32
    log_var = enc_p[:B, lat_pad:lat_pad + latent]      # f32
    return decoded, mu, log_var


def init_params(key, input_dim=INPUT_DIM, hidden_dim=HIDDEN_DIM, latent_dim=LATENT_DIM):
    """Deterministic init mimicking nn.Linear's U(-1/sqrt(fan_in), 1/sqrt(fan_in))."""
    ks = jax.random.split(key, 8)

    def lin(kw, kb, fan_in, fan_out):
        bound = 1.0 / jnp.sqrt(fan_in)
        w = jax.random.uniform(kw, (fan_in, fan_out), jnp.float32, -bound, bound)
        b = jax.random.uniform(kb, (fan_out,), jnp.float32, -bound, bound)
        return w, b

    w1, b1 = lin(ks[0], ks[1], input_dim, hidden_dim)
    w2, b2 = lin(ks[2], ks[3], hidden_dim, 2 * latent_dim)   # [mu | log_var]
    w3, b3 = lin(ks[4], ks[5], latent_dim, hidden_dim)
    w4, b4 = lin(ks[6], ks[7], hidden_dim, input_dim)
    return {"w1": w1, "b1": b1, "w2": w2, "b2": b2,
            "w3": w3, "b3": b3, "w4": w4, "b4": b4}


def vae_forward_ref(x, eps, params, latent_dim=LATENT_DIM):
    """Pure-JAX reference mirroring the kernel's bf16-matmul / f32-accumulate math."""
    bf16 = jnp.bfloat16

    def mm(a, w):
        return jnp.dot(a.astype(bf16), w.astype(bf16),
                       preferred_element_type=jnp.float32)

    h = jax.nn.relu(mm(x, params["w1"]) + params["b1"])
    enc = mm(h, params["w2"]) + params["b2"]
    mu, lv = enc[:, :latent_dim], enc[:, latent_dim:]
    z = mu + eps * jnp.exp(0.5 * lv)
    h2 = jax.nn.relu(mm(z, params["w3"]) + params["b3"])
    dec = jax.nn.sigmoid(mm(h2, params["w4"]) + params["b4"])
    return dec, mu, lv


if __name__ == "__main__":
    key = jax.random.PRNGKey(0)
    k_params, k_x, k_eps = jax.random.split(key, 3)

    batch = 256                                   # 2 grid steps at batch_tile=128
    params = init_params(k_params)
    padded_params = prepare_padded_params(params)  # ONCE, outside the per-step forward

    x = jax.random.uniform(k_x, (batch, INPUT_DIM), jnp.float32)      # "image" batch
    eps = jax.random.normal(k_eps, (batch, LATENT_DIM), jnp.float32)  # randn_like(std)

    dec, mu, lv = vae_forward(x, eps, padded_params)
    jax.block_until_ready((dec, mu, lv))

    dec_r, mu_r, lv_r = vae_forward_ref(x, eps, params)
    assert dec.shape == (batch, INPUT_DIM) and dec.dtype == jnp.bfloat16
    assert mu.shape == (batch, LATENT_DIM) and lv.shape == (batch, LATENT_DIM)
    # bf16 MXU math + bf16 decoded store -> compare against bf16 reference, loose tol.
    assert jnp.allclose(dec.astype(jnp.float32), dec_r, atol=2e-2, rtol=2e-2)
    assert jnp.allclose(mu, mu_r, atol=2e-2, rtol=2e-2)
    assert jnp.allclose(lv, lv_r, atol=2e-2, rtol=2e-2)

    print("KERNEL_OK")
</pallas_src>

<mosaic_0001>
module attributes {stable_mosaic.version = 11 : i64} {
  func.func @_vae_kernel(%arg0: i32, %arg1: memref<128x896xbf16, #tpu.memory_space<vmem>>, %arg2: memref<128x128xf32, #tpu.memory_space<vmem>>, %arg3: memref<896x512xbf16, #tpu.memory_space<vmem>>, %arg4: memref<1x512xf32, #tpu.memory_space<vmem>>, %arg5: memref<512x256xbf16, #tpu.memory_space<vmem>>, %arg6: memref<1x256xf32, #tpu.memory_space<vmem>>, %arg7: memref<128x512xbf16, #tpu.memory_space<vmem>>, %arg8: memref<1x512xf32, #tpu.memory_space<vmem>>, %arg9: memref<512x896xbf16, #tpu.memory_space<vmem>>, %arg10: memref<1x896xf32, #tpu.memory_space<vmem>>, %arg11: memref<128x896xbf16, #tpu.memory_space<vmem>>, %arg12: memref<128x256xf32, #tpu.memory_space<vmem>>) attributes {dimension_semantics = [#tpu.dimension_semantics<parallel>], iteration_bounds = array<i64: 2>, scalar_prefetch = 0 : i64, scratch_operands = 0 : i64, tpu.core_type = #tpu.core_type<tc>, window_params = [{transform_indices = @transform_0, window_bounds = array<i64: 128, 896>}, {transform_indices = @transform_1, window_bounds = array<i64: 128, 128>}, {pipeline_mode = #tpu.pipeline_mode<synchronous>, transform_indices = @transform_2, window_bounds = array<i64: 896, 512>}, {pipeline_mode = #tpu.pipeline_mode<synchronous>, transform_indices = @transform_3, window_bounds = array<i64: 1, 512>}, {pipeline_mode = #tpu.pipeline_mode<synchronous>, transform_indices = @transform_4, window_bounds = array<i64: 512, 256>}, {pipeline_mode = #tpu.pipeline_mode<synchronous>, transform_indices = @transform_5, window_bounds = array<i64: 1, 256>}, {pipeline_mode = #tpu.pipeline_mode<synchronous>, transform_indices = @transform_6, window_bounds = array<i64: 128, 512>}, {pipeline_mode = #tpu.pipeline_mode<synchronous>, transform_indices = @transform_7, window_bounds = array<i64: 1, 512>}, {pipeline_mode = #tpu.pipeline_mode<synchronous>, transform_indices = @transform_8, window_bounds = array<i64: 512, 896>}, {pipeline_mode = #tpu.pipeline_mode<synchronous>, transform_indices = @transform_9, window_bounds = array<i64: 1, 896>}, {transform_indices = @transform_10, window_bounds = array<i64: 128, 896>}, {transform_indices = @transform_11, window_bounds = array<i64: 128, 256>}]} {
    %c0 = arith.constant 0 : index
    %c0_0 = arith.constant 0 : index
    %0 = vector.load %arg1[%c0, %c0_0] : memref<128x896xbf16, #tpu.memory_space<vmem>>, vector<128x896xbf16>
    %c0_1 = arith.constant 0 : index
    %c0_2 = arith.constant 0 : index
    %1 = vector.load %arg3[%c0_1, %c0_2] : memref<896x512xbf16, #tpu.memory_space<vmem>>, vector<896x512xbf16>
    %cst = arith.constant dense<0.000000e+00> : vector<128x512xf32>
    %2 = tpu.matmul %0, %1, %cst {dimension_numbers = #tpu.dot_dimension_numbers<[1], [0], [0], [1], [0, 0, 1, 1], [], []>} : vector<128x896xbf16>, vector<896x512xbf16>, vector<128x512xf32> -> vector<128x512xf32>
    %c0_3 = arith.constant 0 : index
    %c0_4 = arith.constant 0 : index
    %3 = vector.load %arg4[%c0_3, %c0_4] : memref<1x512xf32, #tpu.memory_space<vmem>>, vector<1x512xf32>
    %4 = vector.broadcast %3 : vector<1x512xf32> to vector<128x512xf32>
    %5 = arith.addf %2, %4 : vector<128x512xf32>
    %cst_5 = arith.constant 0.000000e+00 : f32
    %6 = vector.broadcast %cst_5 : f32 to vector<128x512xf32>
    %7 = arith.maximumf %5, %6 : vector<128x512xf32>
    %8 = arith.truncf %7 : vector<128x512xf32> to vector<128x512xbf16>
    %c0_6 = arith.constant 0 : index
    %c0_7 = arith.constant 0 : index
    %9 = vector.load %arg5[%c0_6, %c0_7] : memref<512x256xbf16, #tpu.memory_space<vmem>>, vector<512x256xbf16>
    %cst_8 = arith.constant dense<0.000000e+00> : vector<128x256xf32>
    %10 = tpu.matmul %8, %9, %cst_8 {dimension_numbers = #tpu.dot_dimension_numbers<[1], [0], [0], [1], [0, 0, 1, 1], [], []>} : vector<128x512xbf16>, vector<512x256xbf16>, vector<128x256xf32> -> vector<128x256xf32>
    %c0_9 = arith.constant 0 : index
    %c0_10 = arith.constant 0 : index
    %11 = vector.load %arg6[%c0_9, %c0_10] : memref<1x256xf32, #tpu.memory_space<vmem>>, vector<1x256xf32>
    %12 = vector.broadcast %11 : vector<1x256xf32> to vector<128x256xf32>
    %13 = arith.addf %10, %12 : vector<128x256xf32>
    %14 = vector.extract_strided_slice %13 {offsets = [0, 0], sizes = [128, 128], strides = [1, 1]} : vector<128x256xf32> to vector<128x128xf32>
    %15 = vector.extract_strided_slice %13 {offsets = [0, 128], sizes = [128, 128], strides = [1, 1]} : vector<128x256xf32> to vector<128x128xf32>
    %cst_11 = arith.constant 5.000000e-01 : f32
    %16 = vector.broadcast %cst_11 : f32 to vector<128x128xf32>
    %17 = arith.mulf %16, %15 : vector<128x128xf32>
    %18 = math.exp %17 : vector<128x128xf32>
    %c0_12 = arith.constant 0 : index
    %c0_13 = arith.constant 0 : index
    %19 = vector.load %arg2[%c0_12, %c0_13] : memref<128x128xf32, #tpu.memory_space<vmem>>, vector<128x128xf32>
    %20 = arith.mulf %19, %18 : vector<128x128xf32>
    %21 = arith.addf %14, %20 : vector<128x128xf32>
    %22 = arith.truncf %21 : vector<128x128xf32> to vector<128x128xbf16>
    %c0_14 = arith.constant 0 : index
    %c0_15 = arith.constant 0 : index
    %23 = vector.load %arg7[%c0_14, %c0_15] : memref<128x512xbf16, #tpu.memory_space<vmem>>, vector<128x512xbf16>
    %cst_16 = arith.constant dense<0.000000e+00> : vector<128x512xf32>
    %24 = tpu.matmul %22, %23, %cst_16 {dimension_numbers = #tpu.dot_dimension_numbers<[1], [0], [0], [1], [0, 0, 1, 1], [], []>} : vector<128x128xbf16>, vector<128x512xbf16>, vector<128x512xf32> -> vector<128x512xf32>
    %c0_17 = arith.constant 0 : index
    %c0_18 = arith.constant 0 : index
    %25 = vector.load %arg8[%c0_17, %c0_18] : memref<1x512xf32, #tpu.memory_space<vmem>>, vector<1x512xf32>
    %26 = vector.broadcast %25 : vector<1x512xf32> to vector<128x512xf32>
    %27 = arith.addf %24, %26 : vector<128x512xf32>
    %cst_19 = arith.constant 0.000000e+00 : f32
    %28 = vector.broadcast %cst_19 : f32 to vector<128x512xf32>
    %29 = arith.maximumf %27, %28 : vector<128x512xf32>
    %30 = arith.truncf %29 : vector<128x512xf32> to vector<128x512xbf16>
    %c0_20 = arith.constant 0 : index
    %c0_21 = arith.constant 0 : index
    %31 = vector.load %arg9[%c0_20, %c0_21] : memref<512x896xbf16, #tpu.memory_space<vmem>>, vector<512x896xbf16>
    %cst_22 = arith.constant dense<0.000000e+00> : vector<128x896xf32>
    %32 = tpu.matmul %30, %31, %cst_22 {dimension_numbers = #tpu.dot_dimension_numbers<[1], [0], [0], [1], [0, 0, 1, 1], [], []>} : vector<128x512xbf16>, vector<512x896xbf16>, vector<128x896xf32> -> vector<128x896xf32>
    %c0_23 = arith.constant 0 : index
    %c0_24 = arith.constant 0 : index
    %33 = vector.load %arg10[%c0_23, %c0_24] : memref<1x896xf32, #tpu.memory_space<vmem>>, vector<1x896xf32>
    %34 = vector.broadcast %33 : vector<1x896xf32> to vector<128x896xf32>
    %35 = arith.addf %32, %34 : vector<128x896xf32>
    %36 = arith.negf %35 : vector<128x896xf32>
    %37 = math.exp %36 : vector<128x896xf32>
    %cst_25 = arith.constant 1.000000e+00 : f32
    %38 = vector.broadcast %cst_25 : f32 to vector<128x896xf32>
    %39 = arith.addf %38, %37 : vector<128x896xf32>
    %40 = arith.divf %38, %39 : vector<128x896xf32>
    %41 = arith.truncf %40 : vector<128x896xf32> to vector<128x896xbf16>
    %c0_26 = arith.constant 0 : index
    %c0_27 = arith.constant 0 : index
    %42 = vector.load %arg11[%c0_26, %c0_27] : memref<128x896xbf16, #tpu.memory_space<vmem>>, vector<128x896xbf16>
    tpu.vector_store %arg11[%c0_26, %c0_27], %41 {strides = array<i32>} : memref<128x896xbf16, #tpu.memory_space<vmem>>, vector<128x896xbf16>,
    %c0_28 = arith.constant 0 : index
    %c0_29 = arith.constant 0 : index
    %43 = vector.load %arg12[%c0_28, %c0_29] : memref<128x256xf32, #tpu.memory_space<vmem>>, vector<128x256xf32>
    tpu.vector_store %arg12[%c0_28, %c0_29], %13 {strides = array<i32>} : memref<128x256xf32, #tpu.memory_space<vmem>>, vector<128x256xf32>,
    return
  }
  func.func @transform_0(%arg0: i32) -> (i32, i32) {
    %c0_i32 = arith.constant 0 : i32
    %c0_i32_0 = arith.constant 0 : i32
    return %arg0, %c0_i32 : i32, i32
  }
  func.func @transform_1(%arg0: i32) -> (i32, i32) {
    %c0_i32 = arith.constant 0 : i32
    %c0_i32_0 = arith.constant 0 : i32
    return %arg0, %c0_i32 : i32, i32
  }
  func.func @transform_2(%arg0: i32) -> (i32, i32) {
    %c0_i32 = arith.constant 0 : i32
    %c0_i32_0 = arith.constant 0 : i32
    %c0_i32_1 = arith.constant 0 : i32
    return %c0_i32, %c0_i32_0 : i32, i32
  }
  func.func @transform_3(%arg0: i32) -> (i32, i32) {
    %c0_i32 = arith.constant 0 : i32
    %c0_i32_0 = arith.constant 0 : i32
    %c0_i32_1 = arith.constant 0 : i32
    return %c0_i32, %c0_i32_0 : i32, i32
  }
  func.func @transform_4(%arg0: i32) -> (i32, i32) {
    %c0_i32 = arith.constant 0 : i32
    %c0_i32_0 = arith.constant 0 : i32
    %c0_i32_1 = arith.constant 0 : i32
    return %c0_i32, %c0_i32_0 : i32, i32
  }
  func.func @transform_5(%arg0: i32) -> (i32, i32) {
    %c0_i32 = arith.constant 0 : i32
    %c0_i32_0 = arith.constant 0 : i32
    %c0_i32_1 = arith.constant 0 : i32
    return %c0_i32, %c0_i32_0 : i32, i32
  }
  func.func @transform_6(%arg0: i32) -> (i32, i32) {
    %c0_i32 = arith.constant 0 : i32
    %c0_i32_0 = arith.constant 0 : i32
    %c0_i32_1 = arith.constant 0 : i32
    return %c0_i32, %c0_i32_0 : i32, i32
  }
  func.func @transform_7(%arg0: i32) -> (i32, i32) {
    %c0_i32 = arith.constant 0 : i32
    %c0_i32_0 = arith.constant 0 : i32
    %c0_i32_1 = arith.constant 0 : i32
    return %c0_i32, %c0_i32_0 : i32, i32
  }
  func.func @transform_8(%arg0: i32) -> (i32, i32) {
    %c0_i32 = arith.constant 0 : i32
    %c0_i32_0 = arith.constant 0 : i32
    %c0_i32_1 = arith.constant 0 : i32
    return %c0_i32, %c0_i32_0 : i32, i32
  }
  func.func @transform_9(%arg0: i32) -> (i32, i32) {
    %c0_i32 = arith.constant 0 : i32
    %c0_i32_0 = arith.constant 0 : i32
    %c0_i32_1 = arith.constant 0 : i32
    return %c0_i32, %c0_i32_0 : i32, i32
  }
  func.func @transform_10(%arg0: i32) -> (i32, i32) {
    %c0_i32 = arith.constant 0 : i32
    %c0_i32_0 = arith.constant 0 : i32
    return %arg0, %c0_i32 : i32, i32
  }
  func.func @transform_11(%arg0: i32) -> (i32, i32) {
    %c0_i32 = arith.constant 0 : i32
    %c0_i32_0 = arith.constant 0 : i32
    return %arg0, %c0_i32 : i32, i32
  }
}

</mosaic_0001>

<bundles_post_ra>
// kernel: vae_forward.1
= control target key start
LH: loop header
LB: loop body
LE: loop exit
PB: predicated region body
PF: predicated region fallthrough
CT: control target
= control target key end

     0   :  { %s10894_s17 = smov 0   ;;  %s13704_s0 = inlined_call_operand.vmem [shape: bf16[256,896], index: 0, kind: input, shape index: {}]   ;;  %s13705_s1 = inlined_call_operand.vmem [shape: f32[256,128], index: 1, kind: input, shape index: {}]   ;;  %s13706_s2 = inlined_call_operand.vmem [shape: bf16[896,512], index: 2, kind: input, shape index: {}]   ;;  %s13707_s3 = inlined_call_operand.vmem [shape: f32[1,512], index: 3, kind: input, shape index: {}]   ;;  %s13708_s4 = inlined_call_operand.vmem [shape: bf16[512,256], index: 4, kind: input, shape index: {}]   ;;  %s13709_s5 = inlined_call_operand.vmem [shape: f32[1,256], index: 5, kind: input, shape index: {}]   ;;  %s13710_s6 = inlined_call_operand.vmem [shape: bf16[128,512], index: 6, kind: input, shape index: {}]   ;;  %s13711_s7 = inlined_call_operand.vmem [shape: f32[1,512], index: 7, kind: input, shape index: {}]   ;;  %s13712_s8 = inlined_call_operand.vmem [shape: bf16[512,896], index: 8, kind: input, shape index: {}]   ;;  %s13713_s9 = inlined_call_operand.vmem [shape: f32[1,896], index: 9, kind: input, shape index: {}]   ;;  %s13714_s10 = inlined_call_operand.vmem [shape: bf16[256,896], index: 10, kind: output, shape index: {0}]   ;;  %s13715_s11 = inlined_call_operand.vmem [shape: f32[256,256], index: 11, kind: output, shape index: {1}]  }
   0x1 LB: > { %s7957_s18 = sadd.s32 4294967295, %s10831_s17   ;;  %p7961_p0 = scmp.ge.s32.totalorder %s10831_s17, 1  ;;  %s10831_s17 = sphi %s10894_s17, %s22_s17  }
   0x2   : > { %p353_p1 = scmp.lt.s32.totalorder %s10831_s17, 3 }
   0x4   : > { %p354_p2 = pnand %p7961_p0, %p353_p1 }
   0x5   : > { %v9464_v0 = vld [vmem:[%s13706_s2 + $0x4] ss:$16 sps:$4 sm:$0xff] (!%p354_p2)   ;;  %v9466_v1 = vld [vmem:[%s13706_s2 + $0xc] ss:$16 sps:$4 sm:$0xff] (!%p354_p2)   ;;  %v9468_v2 = vld [vmem:[%s13706_s2] ss:$16 sps:$4 sm:$0xff] (!%p354_p2)  }
   0x6   : > { %357 = sbr.rel (%p354_p2) target bundleno = 1534 (0x5fe), region = 60  ;;  %2152 = vmatprep.subr.bf16.mxu0 (!%p354_p2), %v9464_v0  ;;  %v9469_v3 = vld [vmem:[%s13706_s2 + $0x8] ss:$16 sps:$4 sm:$0xff] (!%p354_p2)   ;;  %2604 = vmatprep.subr.bf16.mxu1 (!%p354_p2), %v9466_v1  ;;  %v9470_v4 = vld [vmem:[%s13706_s2 + $0x24] ss:$16 sps:$4 sm:$0xff] (!%p354_p2)   ;;  %s7962_s28 = sshll.u32 (!%p354_p2), %s7957_s18, 4 }
   0x7   : > { %2153 = vmatpush1.bf16.msra.mxu0 (!%p354_p2), %v9468_v2  ;;  %2605 = vmatpush1.bf16.msra.mxu1 (!%p354_p2), %v9469_v3  ;;  %v9472_v5 = vld [vmem:[%s13706_s2 + $0x2c] ss:$16 sps:$4 sm:$0xff] (!%p354_p2)   ;;  %v9474_v6 = vld [vmem:[%s13706_s2 + $0x20] ss:$16 sps:$4 sm:$0xff] (!%p354_p2)   ;;  %v9475_v7 = vld [vmem:[%s13706_s2 + $0x28] ss:$16 sps:$4 sm:$0xff] (!%p354_p2)  }
   0x8   : > { %2154 = vmatprep.subr.bf16.mxu0 (!%p354_p2), %v9470_v4  ;;  %2606 = vmatprep.subr.bf16.mxu1 (!%p354_p2), %v9472_v5  ;;  %v9476_v8 = vld [vmem:[%s13706_s2 + $0x44] ss:$16 sps:$4 sm:$0xff] (!%p354_p2)   ;;  %v9478_v9 = vld [vmem:[%s13706_s2 + $0x4c] ss:$16 sps:$4 sm:$0xff] (!%p354_p2)   ;;  %v9480_v10 = vld [vmem:[%s13706_s2 + $0x40] ss:$16 sps:$4 sm:$0xff] (!%p354_p2)  }
   0x9   : > { %v9481_v11 = vld [vmem:[%s13706_s2 + $0x48] ss:$16 sps:$4 sm:$0xff] (!%p354_p2)   ;;  %v9482_v12 = vld [vmem:[%s13706_s2 + $0x64] ss:$16 sps:$4 sm:$0xff] (!%p354_p2)   ;;  %v9484_v13 = vld [vmem:[%s13706_s2 + $0x6c] ss:$16 sps:$4 sm:$0xff] (!%p354_p2)  }
   0xa   : > { %v9486_v14 = vld [vmem:[%s13706_s2 + $0x60] ss:$16 sps:$4 sm:$0xff] (!%p354_p2)   ;;  %v9487_v15 = vld [vmem:[%s13706_s2 + $0x68] ss:$16 sps:$4 sm:$0xff] (!%p354_p2)   ;;  %v9488_v16 = vld [vmem:[%s13706_s2 + $0x84] ss:$16 sps:$4 sm:$0xff] (!%p354_p2)  }
   0xb   : > { %2155 = vmatpush1.bf16.msra.mxu0 (!%p354_p2), %v9474_v6  ;;  %2607 = vmatpush1.bf16.msra.mxu1 (!%p354_p2), %v9475_v7  ;;  %v9490_v17 = vld [vmem:[%s13706_s2 + $0x8c] ss:$16 sps:$4 sm:$0xff] (!%p354_p2)   ;;  %v9492_v18 = vld [vmem:[%s13706_s2 + $0x80] ss:$16 sps:$4 sm:$0xff] (!%p354_p2)   ;;  %v9493_v19 = vld [vmem:[%s13706_s2 + $0x88] ss:$16 sps:$4 sm:$0xff] (!%p354_p2)  }
   0xc   : > { %2156 = vmatprep.subr.bf16.mxu0 (!%p354_p2), %v9476_v8  ;;  %2608 = vmatprep.subr.bf16.mxu1 (!%p354_p2), %v9478_v9  ;;  %v9494_v20 = vld [vmem:[%s13706_s2 + $0xa4] ss:$16 sps:$4 sm:$0xff] (!%p354_p2)   ;;  %v9496_v21 = vld [vmem:[%s13706_s2 + $0xac] ss:$16 sps:$4 sm:$0xff] (!%p354_p2)   ;;  %v9498_v22 = vld [vmem:[%s13706_s2 + $0xa0] ss:$16 sps:$4 sm:$0xff] (!%p354_p2)  }
   0xd   : > { %v9499_v23 = vld [vmem:[%s13706_s2 + $0xa8] ss:$16 sps:$4 sm:$0xff]   ;;  %v9500_v24 = vld [vmem:[%s13706_s2 + $0xc4] ss:$16 sps:$4 sm:$0xff]   ;;  %v9502_v25 = vld [vmem:[%s13706_s2 + $0xcc] ss:$16 sps:$4 sm:$0xff]  }
   0xe   : > { %v9504_v26 = vld [vmem:[%s13706_s2 + $0xc0] ss:$16 sps:$4 sm:$0xff]   ;;  %v9505_v27 = vld [vmem:[%s13706_s2 + $0xc8] ss:$16 sps:$4 sm:$0xff]   ;;  %v9506_v28 = vld [vmem:[%s13706_s2 + $0xe4] ss:$16 sps:$4 sm:$0xff]  }
   0xf   : > { %2157 = vmatpush1.bf16.msra.mxu0 %v9480_v10  ;;  %2609 = vmatpush1.bf16.msra.mxu1 %v9481_v11  ;;  %v9508_v29 = vld [vmem:[%s13706_s2 + $0xec] ss:$16 sps:$4 sm:$0xff]   ;;  %v9510_v30 = vld [vmem:[%s13706_s2 + $0xe0] ss:$16 sps:$4 sm:$0xff]   ;;  %v9511_v31 = vld [vmem:[%s13706_s2 + $0xe8] ss:$16 sps:$4 sm:$0xff]  }
  0x10   : > { %2158 = vmatprep.subr.bf16.mxu0 %v9482_v12  ;;  %2610 = vmatprep.subr.bf16.mxu1 %v9484_v13  ;;  %v9512_v32 = vld [vmem:[%s13706_s2 + $0x104] ss:$16 sps:$4 sm:$0xff]   ;;  %p407_p3 = scmp.lt.s32.totalorder %s7962_s28, 31  ;;  %v9514_v33 = vld [vmem:[%s13706_s2 + $0x10c] ss:$16 sps:$4 sm:$0xff]  }
  0x11   : > { %v9516_v34 = vld [vmem:[%s13706_s2 + $0x100] ss:$16 sps:$4 sm:$0xff]   ;;  %v9517_v35 = vld [vmem:[%s13706_s2 + $0x108] ss:$16 sps:$4 sm:$0xff]   ;;  %v9518_v36 = vld [vmem:[%s13706_s2 + $0x124] ss:$16 sps:$4 sm:$0xff]  }
  0x12   : > { %s13717_s28 = smov (!%p407_p3, %s7962_s28), 31  ;;  %v9520_v37 = vld [vmem:[%s13706_s2 + $0x12c] ss:$16 sps:$4 sm:$0xff]   ;;  %v9522_v38 = vld [vmem:[%s13706_s2 + $0x120] ss:$16 sps:$4 sm:$0xff]  }
  0x13   : > { %2159 = vmatpush1.bf16.msra.mxu0 %v9486_v14  ;;  %2611 = vmatpush1.bf16.msra.mxu1 %v9487_v15  ;;  %v9523_v39 = vld [vmem:[%s13706_s2 + $0x128] ss:$16 sps:$4 sm:$0xff]   ;;  %v9524_v40 = vld [vmem:[%s13706_s2 + $0x144] ss:$16 sps:$4 sm:$0xff]   ;;  %s9454_s15 = smul.u32 28, %s13717_s28  ;;  %s8749_s18 = sshll.u32 %s13717_s28, 4 }
  0x14   : > { %2160 = vmatprep.subr.bf16.mxu0 %v9488_v16  ;;  %2612 = vmatprep.subr.bf16.mxu1 %v9490_v17  ;;  %v9526_v41 = vld [vmem:[%s13706_s2 + $0x14c] ss:$16 sps:$4 sm:$0xff]   ;;  %v9528_v42 = vld [vmem:[%s13706_s2 + $0x140] ss:$16 sps:$4 sm:$0xff]   ;;  %v9529_v43 = vld [vmem:[%s13706_s2 + $0x148] ss:$16 sps:$4 sm:$0xff]   ;;  %s12047_s22 = scalar_lea.vmem %s13715_s11, %s8749_s18 }
  0x15   : > { %v9530_v44 = vld [vmem:[%s13706_s2 + $0x164] ss:$16 sps:$4 sm:$0xff]   ;;  %s11047_s27 = scalar_lea.vmem %s13704_s0, %s9454_s15  ;;  %v9532_v45 = vld [vmem:[%s13706_s2 + $0x16c] ss:$16 sps:$4 sm:$0xff]   ;;  %v9534_v46 = vld [vmem:[%s13706_s2 + $0x160] ss:$16 sps:$4 sm:$0xff]   ;;  %s13284_s25 = scalar_lea.vmem %s13714_s10, %s9454_s15 }
  0x16   : > { %v9535_v47 = vld [vmem:[%s13706_s2 + $0x168] ss:$16 sps:$4 sm:$0xff]   ;;  %v9562_v48 = vld [vmem:[%s11047_s27 + $0x4] ss:$28 sps:$4 sm:$0xff]   ;;  %v9538_v50 = vld [vmem:[%s13706_s2 + $0x18c] ss:$16 sps:$4 sm:$0xff]  }
  0x17   : > { %2161 = vmatpush1.bf16.msra.mxu0 %v9492_v18  ;;  %2613 = vmatpush1.bf16.msra.mxu1 %v9493_v19  ;;  %v9536_v49 = vld [vmem:[%s13706_s2 + $0x184] ss:$16 sps:$4 sm:$0xff]   ;;  %v9540_v51 = vld [vmem:[%s13706_s2 + $0x180] ss:$16 sps:$4 sm:$0xff]   ;;  %v9541_v52 = vld [vmem:[%s13706_s2 + $0x188] ss:$16 sps:$4 sm:$0xff]  }
  0x18   : > { %2162 = vmatprep.subr.bf16.mxu0 %v9494_v20  ;;  %2614 = vmatprep.subr.bf16.mxu1 %v9496_v21  ;;  %v9542_v53 = vld [vmem:[%s13706_s2 + $0x1a4] ss:$16 sps:$4 sm:$0xff]   ;;  %v9544_v54 = vld [vmem:[%s13706_s2 + $0x1ac] ss:$16 sps:$4 sm:$0xff]   ;;  %v9546_v55 = vld [vmem:[%s13706_s2 + $0x1a0] ss:$16 sps:$4 sm:$0xff]  }
  0x19   : > { %2184 = vmatprep.mubr.bf16.mxu0 %v9562_v48  ;;  %2636 = vmatprep.mubr.bf16.mxu1 %v9562_v48  ;;  %v9547_v56 = vld [vmem:[%s13706_s2 + $0x1a8] ss:$16 sps:$4 sm:$0xff]   ;;  %v9548_v57 = vld [vmem:[%s13706_s2 + $0x1c4] ss:$16 sps:$4 sm:$0xff]   ;;  %v9550_v58 = vld [vmem:[%s13706_s2 + $0x1cc] ss:$16 sps:$4 sm:$0xff]  }
  0x1a   : > { %v9552_v59 = vld [vmem:[%s13706_s2 + $0x1c0] ss:$16 sps:$4 sm:$0xff]   ;;  %v9553_v60 = vld [vmem:[%s13706_s2 + $0x1c8] ss:$16 sps:$4 sm:$0xff]   ;;  %v9554_v61 = vld [vmem:[%s13706_s2 + $0x1e4] ss:$16 sps:$4 sm:$0xff]  }
  0x1b   : > { %2163 = vmatpush1.bf16.msra.mxu0 %v9498_v22  ;;  %2615 = vmatpush1.bf16.msra.mxu1 %v9499_v23  ;;  %v9556_v62 = vld [vmem:[%s13706_s2 + $0x1ec] ss:$16 sps:$4 sm:$0xff]   ;;  %v9558_v63 = vld [vmem:[%s13706_s2 + $0x1e0] ss:$16 sps:$4 sm:$0xff]   ;;  %v9559_v0 = vld [vmem:[%s13706_s2 + $0x1e8] ss:$16 sps:$4 sm:$0xff]  }
  0x1c   : > { %2164 = vmatprep.subr.bf16.mxu0 %v9500_v24  ;;  %2616 = vmatprep.subr.bf16.mxu1 %v9502_v25  ;;  %v9565_v1 = vld [vmem:[%s13706_s2 + $0x204] ss:$16 sps:$4 sm:$0xff]   ;;  %v9568_v2 = vld [vmem:[%s13706_s2 + $0x20c] ss:$16 sps:$4 sm:$0xff]   ;;  %v9563_v4 = vld [vmem:[%s13706_s2 + $0x200] ss:$16 sps:$4 sm:$0xff]  }
  0x1d   : > { %v9560_v3 = vld [vmem:[%s11047_s27] ss:$28 sps:$4 sm:$0xff]   ;;  %v9566_v5 = vld [vmem:[%s13706_s2 + $0x208] ss:$16 sps:$4 sm:$0xff]   ;;  %v9571_v6 = vld [vmem:[%s13706_s2 + $0x224] ss:$16 sps:$4 sm:$0xff]  }
  0x1e   : > { %v9574_v7 = vld [vmem:[%s13706_s2 + $0x22c] ss:$16 sps:$4 sm:$0xff]   ;;  %v9569_v9 = vld [vmem:[%s13706_s2 + $0x220] ss:$16 sps:$4 sm:$0xff]   ;;  %v9572_v10 = vld [vmem:[%s13706_s2 + $0x228] ss:$16 sps:$4 sm:$0xff]  }
  0x1f   : > { %2165 = vmatpush1.bf16.msra.mxu0 %v9504_v26  ;;  %2617 = vmatpush1.bf16.msra.mxu1 %v9505_v27  ;;  %v9575_v8 = vld [vmem:[%s11047_s27 + $0x3c] ss:$28 sps:$4 sm:$0xff]   ;;  %v9580_v11 = vld [vmem:[%s13706_s2 + $0x244] ss:$16 sps:$4 sm:$0xff]   ;;  %v9578_v14 = vld [vmem:[%s13706_s2 + $0x240] ss:$16 sps:$4 sm:$0xff]  }
  0x20   : > { %2166 = vmatprep.subr.bf16.mxu0 %v9506_v28  ;;  %2618 = vmatprep.subr.bf16.mxu1 %v9508_v29  ;;  %v9583_v12 = vld [vmem:[%s13706_s2 + $0x24c] ss:$16 sps:$4 sm:$0xff]   ;;  %v9577_v13 = vld [vmem:[%s11047_s27 + $0x38] ss:$28 sps:$4 sm:$0xff]   ;;  %v9584_v19 = vld [vmem:[%s13706_s2 + $0x260] ss:$16 sps:$4 sm:$0xff]  }
  0x21   : > { %v9581_v15 = vld [vmem:[%s13706_s2 + $0x248] ss:$16 sps:$4 sm:$0xff]   ;;  %v9586_v16 = vld [vmem:[%s13706_s2 + $0x264] ss:$16 sps:$4 sm:$0xff]   ;;  %v9589_v17 = vld [vmem:[%s13706_s2 + $0x26c] ss:$16 sps:$4 sm:$0xff]  }
  0x22   : > { %v9590_v18 = vld [vmem:[%s11047_s27 + $0x74] ss:$28 sps:$4 sm:$0xff]   ;;  %v9587_v20 = vld [vmem:[%s13706_s2 + $0x268] ss:$16 sps:$4 sm:$0xff]   ;;  %v9598_v22 = vld [vmem:[%s13706_s2 + $0x28c] ss:$16 sps:$4 sm:$0xff]  }
  0x23   : > { %2167 = vmatpush1.bf16.msra.mxu0 %v9510_v30  ;;  %2619 = vmatpush1.bf16.msra.mxu1 %v9511_v31  ;;  %v9595_v21 = vld [vmem:[%s13706_s2 + $0x284] ss:$16 sps:$4 sm:$0xff]   ;;  %v9592_v23 = vld [vmem:[%s11047_s27 + $0x70] ss:$28 sps:$4 sm:$0xff]   ;;  %v9596_v25 = vld [vmem:[%s13706_s2 + $0x288] ss:$16 sps:$4 sm:$0xff]  }
  0x24   : > { %2168 = vmatprep.subr.bf16.mxu0 %v9512_v32  ;;  %2620 = vmatprep.subr.bf16.mxu1 %v9514_v33  ;;  %v9593_v24 = vld [vmem:[%s13706_s2 + $0x280] ss:$16 sps:$4 sm:$0xff]   ;;  %v9601_v26 = vld [vmem:[%s13706_s2 + $0x2a4] ss:$16 sps:$4 sm:$0xff]   ;;  %v9604_v27 = vld [vmem:[%s13706_s2 + $0x2ac] ss:$16 sps:$4 sm:$0xff]  }
  0x25   : > { %v9605_v28 = vld [vmem:[%s11047_s27 + $0xac] ss:$28 sps:$4 sm:$0xff]   ;;  %v9599_v29 = vld [vmem:[%s13706_s2 + $0x2a0] ss:$16 sps:$4 sm:$0xff]   ;;  %v9610_v31 = vld [vmem:[%s13706_s2 + $0x2c4] ss:$16 sps:$4 sm:$0xff]  }
  0x26   : > { %v9602_v30 = vld [vmem:[%s13706_s2 + $0x2a8] ss:$16 sps:$4 sm:$0xff]   ;;  %v9613_v32 = vld [vmem:[%s13706_s2 + $0x2cc] ss:$16 sps:$4 sm:$0xff]   ;;  %s7965_s23 = sshll.u32 %s13717_s28, 3 }
  0x27   : > { %2169 = vmatpush1.bf16.msra.mxu0 %v9516_v34  ;;  %2621 = vmatpush1.bf16.msra.mxu1 %v9517_v35  ;;  %v9607_v33 = vld [vmem:[%s11047_s27 + $0xa8] ss:$28 sps:$4 sm:$0xff]   ;;  %v9608_v34 = vld [vmem:[%s13706_s2 + $0x2c0] ss:$16 sps:$4 sm:$0xff]   ;;  %v9635_v48 = vld [vmem:[%s11047_s27 + $0x11c] ss:$28 sps:$4 sm:$0xff]   ;;  %s12072_s26 = scalar_lea.vmem %s13705_s1, %s7965_s23 }
  0x28   : > { %2170 = vmatprep.subr.bf16.mxu0 %v9518_v36  ;;  %2622 = vmatprep.subr.bf16.mxu1 %v9520_v37  ;;  %v9611_v35 = vld [vmem:[%s13706_s2 + $0x2c8] ss:$16 sps:$4 sm:$0xff]   ;;  %v9616_v36 = vld [vmem:[%s13706_s2 + $0x2e4] ss:$16 sps:$4 sm:$0xff]   ;;  %v9619_v37 = vld [vmem:[%s13706_s2 + $0x2ec] ss:$16 sps:$4 sm:$0xff]  }
  0x2b   : > { %2171 = vmatpush1.bf16.msra.mxu0 %v9522_v38  ;;  %2623 = vmatpush1.bf16.msra.mxu1 %v9523_v39  ;;  %v9620_v38 = vld [vmem:[%s11047_s27 + $0xe4] ss:$28 sps:$4 sm:$0xff]  }
  0x2c   : > { %2172 = vmatprep.subr.bf16.mxu0 %v9524_v40  ;;  %2624 = vmatprep.subr.bf16.mxu1 %v9526_v41  ;;  %v9614_v39 = vld [vmem:[%s13706_s2 + $0x2e0] ss:$16 sps:$4 sm:$0xff]   ;;  %v9617_v40 = vld [vmem:[%s13706_s2 + $0x2e8] ss:$16 sps:$4 sm:$0xff]   ;;  %v9625_v41 = vld [vmem:[%s13706_s2 + $0x304] ss:$16 sps:$4 sm:$0xff]  }
  0x2f   : > { %2173 = vmatpush1.bf16.msra.mxu0 %v9528_v42  ;;  %2625 = vmatpush1.bf16.msra.mxu1 %v9529_v43  ;;  %v9628_v42 = vld [vmem:[%s13706_s2 + $0x30c] ss:$16 sps:$4 sm:$0xff]  }
  0x30   : > { %2174 = vmatprep.subr.bf16.mxu0 %v9530_v44  ;;  %2626 = vmatprep.subr.bf16.mxu1 %v9532_v45  ;;  %v9622_v43 = vld [vmem:[%s11047_s27 + $0xe0] ss:$28 sps:$4 sm:$0xff]   ;;  %v9626_v45 = vld [vmem:[%s13706_s2 + $0x308] ss:$16 sps:$4 sm:$0xff]  }
  0x31   : > { %v9623_v44 = vld [vmem:[%s13706_s2 + $0x300] ss:$16 sps:$4 sm:$0xff]  }
  0x33   : > { %2175 = vmatpush1.bf16.msra.mxu0 %v9534_v46  ;;  %2627 = vmatpush1.bf16.msra.mxu1 %v9535_v47  ;;  %v9631_v46 = vld [vmem:[%s13706_s2 + $0x324] ss:$16 sps:$4 sm:$0xff]   ;;  %v9634_v47 = vld [vmem:[%s13706_s2 + $0x32c] ss:$16 sps:$4 sm:$0xff]  }
  0x34   : > { %2176 = vmatprep.subr.bf16.mxu0 %v9536_v49  ;;  %2628 = vmatprep.subr.bf16.mxu1 %v9538_v50  ;;  %v9629_v49 = vld [vmem:[%s13706_s2 + $0x320] ss:$16 sps:$4 sm:$0xff]   ;;  %v9632_v50 = vld [vmem:[%s13706_s2 + $0x328] ss:$16 sps:$4 sm:$0xff]  }
  0x37   : > { %2177 = vmatpush1.bf16.msra.mxu0 %v9540_v51  ;;  %2629 = vmatpush1.bf16.msra.mxu1 %v9541_v52  ;;  %v9640_v51 = vld [vmem:[%s13706_s2 + $0x344] ss:$16 sps:$4 sm:$0xff]   ;;  %v9643_v52 = vld [vmem:[%s13706_s2 + $0x34c] ss:$16 sps:$4 sm:$0xff]  }
  0x38   : > { %2178 = vmatprep.subr.bf16.mxu0 %v9542_v53  ;;  %2630 = vmatprep.subr.bf16.mxu1 %v9544_v54  ;;  %v9637_v53 = vld [vmem:[%s11047_s27 + $0x118] ss:$28 sps:$4 sm:$0xff]   ;;  %v9638_v54 = vld [vmem:[%s13706_s2 + $0x340] ss:$16 sps:$4 sm:$0xff]  }
  0x3b   : > { %2179 = vmatpush1.bf16.msra.mxu0 %v9546_v55  ;;  %2631 = vmatpush1.bf16.msra.mxu1 %v9547_v56  ;;  %v9641_v55 = vld [vmem:[%s13706_s2 + $0x348] ss:$16 sps:$4 sm:$0xff]   ;;  %v9646_v56 = vld [vmem:[%s13706_s2 + $0x364] ss:$16 sps:$4 sm:$0xff]  }
  0x3c   : > { %2180 = vmatprep.subr.bf16.mxu0 %v9548_v57  ;;  %2632 = vmatprep.subr.bf16.mxu1 %v9550_v58  ;;  %v9649_v57 = vld [vmem:[%s13706_s2 + $0x36c] ss:$16 sps:$4 sm:$0xff]   ;;  %v9650_v58 = vld [vmem:[%s11047_s27 + $0x154] ss:$28 sps:$4 sm:$0xff]  }
  0x3f   : > { %2181 = vmatpush1.bf16.msra.mxu0 %v9552_v59  ;;  %2633 = vmatpush1.bf16.msra.mxu1 %v9553_v60  ;;  %v9644_v59 = vld [vmem:[%s13706_s2 + $0x360] ss:$16 sps:$4 sm:$0xff]   ;;  %v9647_v60 = vld [vmem:[%s13706_s2 + $0x368] ss:$16 sps:$4 sm:$0xff]  }
  0x40   : > { %2182 = vmatprep.subr.bf16.mxu0 %v9554_v61  ;;  %2634 = vmatprep.subr.bf16.mxu1 %v9556_v62  ;;  %v9655_v61 = vld [vmem:[%s13706_s2 + $0x384] ss:$16 sps:$4 sm:$0xff]   ;;  %v9658_v62 = vld [vmem:[%s13706_s2 + $0x38c] ss:$16 sps:$4 sm:$0xff]  }
  0x43   : > { %2183 = vmatpush1.bf16.msra.mxu0 %v9558_v63  ;;  %2635 = vmatpush1.bf16.msra.mxu1 %v9559_v0  ;;  %v9652_v63 = vld [vmem:[%s11047_s27 + $0x150] ss:$28 sps:$4 sm:$0xff]  }
  0x44   : > { %2265 = vmatprep.subr.bf16.mxu0 %v9565_v1  ;;  %2717 = vmatprep.subr.bf16.mxu1 %v9568_v2  ;;  %v9653_v0 = vld [vmem:[%s13706_s2 + $0x380] ss:$16 sps:$4 sm:$0xff]   ;;  %v9656_v1 = vld [vmem:[%s13706_s2 + $0x388] ss:$16 sps:$4 sm:$0xff]   ;;  %v9661_v2 = vld [vmem:[%s13706_s2 + $0x3a4] ss:$16 sps:$4 sm:$0xff]  }
  0x46   : > { %2185 = vmatmul.mubr.bf16.vlgmr.msra.gmra.mrb[0].mxu0 %v9560_v3  ;;  %2637 = vmatmul.mubr.bf16.vlgmr.msra.gmra.mrb[0].mxu1 %v9560_v3  ;;  %v9664_v3 = vld [vmem:[%s13706_s2 + $0x3ac] ss:$16 sps:$4 sm:$0xff]  }
  0x47   : > { %2266 = vmatpush1.bf16.msra.mxu0 %v9563_v4  ;;  %2718 = vmatpush1.bf16.msra.mxu1 %v9566_v5  ;;  %v9665_v4 = vld [vmem:[%s11047_s27 + $0x18c] ss:$28 sps:$4 sm:$0xff]   ;;  %v9659_v5 = vld [vmem:[%s13706_s2 + $0x3a0] ss:$16 sps:$4 sm:$0xff]  }
  0x48   : > { %2267 = vmatprep.subr.bf16.mxu0 %v9571_v6  ;;  %2719 = vmatprep.subr.bf16.mxu1 %v9574_v7  ;;  %v9662_v6 = vld [vmem:[%s13706_s2 + $0x3a8] ss:$16 sps:$4 sm:$0xff]   ;;  %v9670_v7 = vld [vmem:[%s13706_s2 + $0x3c4] ss:$16 sps:$4 sm:$0xff]  }
  0x49   : > { %2194 = vmatprep.mubr.bf16.mxu0 %v9575_v8  ;;  %2646 = vmatprep.mubr.bf16.mxu1 %v9575_v8  ;;  %v9673_v8 = vld [vmem:[%s13706_s2 + $0x3cc] ss:$16 sps:$4 sm:$0xff]  }
  0x4b   : > { %2268 = vmatpush1.bf16.msra.mxu0 %v9569_v9  ;;  %2720 = vmatpush1.bf16.msra.mxu1 %v9572_v10  ;;  %v9667_v9 = vld [vmem:[%s11047_s27 + $0x188] ss:$28 sps:$4 sm:$0xff]   ;;  %v9668_v10 = vld [vmem:[%s13706_s2 + $0x3c0] ss:$16 sps:$4 sm:$0xff]  }
  0x4c   : > { %2269 = vmatprep.subr.bf16.mxu0 %v9580_v11  ;;  %2721 = vmatprep.subr.bf16.mxu1 %v9583_v12  ;;  %v9671_v11 = vld [vmem:[%s13706_s2 + $0x3c8] ss:$16 sps:$4 sm:$0xff]   ;;  %v9676_v12 = vld [vmem:[%s13706_s2 + $0x3e4] ss:$16 sps:$4 sm:$0xff]  }
  0x4e   : > { %2195 = vmatmul.mubr.bf16.gmra.mrb[4].mxu0 %v9577_v13  ;;  %2647 = vmatmul.mubr.bf16.gmra.mrb[4].mxu1 %v9577_v13  ;;  %v9679_v13 = vld [vmem:[%s13706_s2 + $0x3ec] ss:$16 sps:$4 sm:$0xff]  }
  0x4f   : > { %2270 = vmatpush1.bf16.msra.mxu0 %v9578_v14  ;;  %2722 = vmatpush1.bf16.msra.mxu1 %v9581_v15  ;;  %v9682_v14 = vld [vmem:[%s11047_s27 + $0xc] ss:$28 sps:$4 sm:$0xff]   ;;  %v9674_v15 = vld [vmem:[%s13706_s2 + $0x3e0] ss:$16 sps:$4 sm:$0xff]  }
  0x50   : > { %2271 = vmatprep.subr.bf16.mxu0 %v9586_v16  ;;  %2723 = vmatprep.subr.bf16.mxu1 %v9589_v17  ;;  %v9677_v16 = vld [vmem:[%s13706_s2 + $0x3e8] ss:$16 sps:$4 sm:$0xff]   ;;  %v9685_v17 = vld [vmem:[%s13706_s2 + $0x404] ss:$16 sps:$4 sm:$0xff]  }
  0x51   : > { %2204 = vmatprep.mubr.bf16.mxu0 %v9590_v18  ;;  %2656 = vmatprep.mubr.bf16.mxu1 %v9590_v18  ;;  %v9688_v18 = vld [vmem:[%s13706_s2 + $0x40c] ss:$16 sps:$4 sm:$0xff]  }
  0x53   : > { %2272 = vmatpush1.bf16.msra.mxu0 %v9584_v19  ;;  %2724 = vmatpush1.bf16.msra.mxu1 %v9587_v20  ;;  %v9680_v19 = vld [vmem:[%s11047_s27 + $0x8] ss:$28 sps:$4 sm:$0xff]   ;;  %v9683_v20 = vld [vmem:[%s13706_s2 + $0x400] ss:$16 sps:$4 sm:$0xff]  }
  0x54   : > { %2273 = vmatprep.subr.bf16.mxu0 %v9595_v21  ;;  %2725 = vmatprep.subr.bf16.mxu1 %v9598_v22  ;;  %v9686_v21 = vld [vmem:[%s13706_s2 + $0x408] ss:$16 sps:$4 sm:$0xff]   ;;  %v9691_v22 = vld [vmem:[%s13706_s2 + $0x424] ss:$16 sps:$4 sm:$0xff]  }
  0x56   : > { %2205 = vmatmul.mubr.bf16.gmra.mrb[8].mxu0 %v9592_v23  ;;  %2657 = vmatmul.mubr.bf16.gmra.mrb[8].mxu1 %v9592_v23  ;;  %v9694_v23 = vld [vmem:[%s13706_s2 + $0x42c] ss:$16 sps:$4 sm:$0xff]  }
  0x57   : > { %2274 = vmatpush1.bf16.msra.mxu0 %v9593_v24  ;;  %2726 = vmatpush1.bf16.msra.mxu1 %v9596_v25  ;;  %v9695_v24 = vld [vmem:[%s11047_s27 + $0x44] ss:$28 sps:$4 sm:$0xff]  }
  0x58   : > { %2275 = vmatprep.subr.bf16.mxu0 %v9601_v26  ;;  %2727 = vmatprep.subr.bf16.mxu1 %v9604_v27  ;;  %v9689_v25 = vld [vmem:[%s13706_s2 + $0x420] ss:$16 sps:$4 sm:$0xff]   ;;  %v9692_v26 = vld [vmem:[%s13706_s2 + $0x428] ss:$16 sps:$4 sm:$0xff]   ;;  %v9700_v27 = vld [vmem:[%s13706_s2 + $0x444] ss:$16 sps:$4 sm:$0xff]  }
  0x59   : > { %2214 = vmatprep.mubr.bf16.mxu0 %v9605_v28  ;;  %2666 = vmatprep.mubr.bf16.mxu1 %v9605_v28  ;;  %v9703_v28 = vld [vmem:[%s13706_s2 + $0x44c] ss:$16 sps:$4 sm:$0xff]  }
  0x5b   : > { %2276 = vmatpush1.bf16.msra.mxu0 %v9599_v29  ;;  %2728 = vmatpush1.bf16.msra.mxu1 %v9602_v30  ;;  %v9697_v29 = vld [vmem:[%s11047_s27 + $0x40] ss:$28 sps:$4 sm:$0xff]  }
  0x5c   : > { %2277 = vmatprep.subr.bf16.mxu0 %v9610_v31  ;;  %2729 = vmatprep.subr.bf16.mxu1 %v9613_v32  ;;  %v9698_v30 = vld [vmem:[%s13706_s2 + $0x440] ss:$16 sps:$4 sm:$0xff]   ;;  %v9701_v31 = vld [vmem:[%s13706_s2 + $0x448] ss:$16 sps:$4 sm:$0xff]   ;;  %v9706_v32 = vld [vmem:[%s13706_s2 + $0x464] ss:$16 sps:$4 sm:$0xff]  }
  0x5e   : > { %2215 = vmatmul.mubr.bf16.gmra.mrb[12].mxu0 %v9607_v33  ;;  %2667 = vmatmul.mubr.bf16.gmra.mrb[12].mxu1 %v9607_v33  ;;  %v9709_v33 = vld [vmem:[%s13706_s2 + $0x46c] ss:$16 sps:$4 sm:$0xff]  }
  0x5f   : > { %2278 = vmatpush1.bf16.msra.mxu0 %v9608_v34  ;;  %2730 = vmatpush1.bf16.msra.mxu1 %v9611_v35  ;;  %v9710_v34 = vld [vmem:[%s11047_s27 + $0x7c] ss:$28 sps:$4 sm:$0xff]   ;;  %v9704_v35 = vld [vmem:[%s13706_s2 + $0x460] ss:$16 sps:$4 sm:$0xff]  }
  0x60   : > { %2279 = vmatprep.subr.bf16.mxu0 %v9616_v36  ;;  %2731 = vmatprep.subr.bf16.mxu1 %v9619_v37  ;;  %v9707_v36 = vld [vmem:[%s13706_s2 + $0x468] ss:$16 sps:$4 sm:$0xff]   ;;  %v9715_v37 = vld [vmem:[%s13706_s2 + $0x484] ss:$16 sps:$4 sm:$0xff]  }
  0x61   : > { %2224 = vmatprep.mubr.bf16.mxu0 %v9620_v38  ;;  %2676 = vmatprep.mubr.bf16.mxu1 %v9620_v38  ;;  %v9718_v38 = vld [vmem:[%s13706_s2 + $0x48c] ss:$16 sps:$4 sm:$0xff]  }
  0x63   : > { %2280 = vmatpush1.bf16.msra.mxu0 %v9614_v39  ;;  %2732 = vmatpush1.bf16.msra.mxu1 %v9617_v40  ;;  %v9712_v39 = vld [vmem:[%s11047_s27 + $0x78] ss:$28 sps:$4 sm:$0xff]   ;;  %v9713_v40 = vld [vmem:[%s13706_s2 + $0x480] ss:$16 sps:$4 sm:$0xff]  }
  0x64   : > { %2281 = vmatprep.subr.bf16.mxu0 %v9625_v41  ;;  %2733 = vmatprep.subr.bf16.mxu1 %v9628_v42  ;;  %v9716_v41 = vld [vmem:[%s13706_s2 + $0x488] ss:$16 sps:$4 sm:$0xff]   ;;  %v9721_v42 = vld [vmem:[%s13706_s2 + $0x4a4] ss:$16 sps:$4 sm:$0xff]  }
  0x66   : > { %2225 = vmatmul.mubr.bf16.gmra.mrb[16].mxu0 %v9622_v43  ;;  %2677 = vmatmul.mubr.bf16.gmra.mrb[16].mxu1 %v9622_v43  ;;  %v9724_v43 = vld [vmem:[%s13706_s2 + $0x4ac] ss:$16 sps:$4 sm:$0xff]  }
  0x67   : > { %2282 = vmatpush1.bf16.msra.mxu0 %v9623_v44  ;;  %2734 = vmatpush1.bf16.msra.mxu1 %v9626_v45  ;;  %v9725_v44 = vld [vmem:[%s11047_s27 + $0xb4] ss:$28 sps:$4 sm:$0xff]  }
  0x68   : > { %2283 = vmatprep.subr.bf16.mxu0 %v9631_v46  ;;  %2735 = vmatprep.subr.bf16.mxu1 %v9634_v47  ;;  %v9719_v45 = vld [vmem:[%s13706_s2 + $0x4a0] ss:$16 sps:$4 sm:$0xff]   ;;  %v9722_v46 = vld [vmem:[%s13706_s2 + $0x4a8] ss:$16 sps:$4 sm:$0xff]   ;;  %v9730_v47 = vld [vmem:[%s13706_s2 + $0x4c4] ss:$16 sps:$4 sm:$0xff]  }
  0x69   : > { %2234 = vmatprep.mubr.bf16.mxu0 %v9635_v48  ;;  %2686 = vmatprep.mubr.bf16.mxu1 %v9635_v48  ;;  %v9733_v48 = vld [vmem:[%s13706_s2 + $0x4cc] ss:$16 sps:$4 sm:$0xff]  }
  0x6b   : > { %2284 = vmatpush1.bf16.msra.mxu0 %v9629_v49  ;;  %2736 = vmatpush1.bf16.msra.mxu1 %v9632_v50  ;;  %v9727_v49 = vld [vmem:[%s11047_s27 + $0xb0] ss:$28 sps:$4 sm:$0xff]  }
  0x6c   : > { %2285 = vmatprep.subr.bf16.mxu0 %v9640_v51  ;;  %2737 = vmatprep.subr.bf16.mxu1 %v9643_v52  ;;  %v9728_v50 = vld [vmem:[%s13706_s2 + $0x4c0] ss:$16 sps:$4 sm:$0xff]   ;;  %v9731_v51 = vld [vmem:[%s13706_s2 + $0x4c8] ss:$16 sps:$4 sm:$0xff]   ;;  %v9736_v52 = vld [vmem:[%s13706_s2 + $0x4e4] ss:$16 sps:$4 sm:$0xff]  }
  0x6e   : > { %2235 = vmatmul.mubr.bf16.gmra.mrb[20].mxu0 %v9637_v53  ;;  %2687 = vmatmul.mubr.bf16.gmra.mrb[20].mxu1 %v9637_v53  ;;  %v9739_v53 = vld [vmem:[%s13706_s2 + $0x4ec] ss:$16 sps:$4 sm:$0xff]  }
  0x6f   : > { %2286 = vmatpush1.bf16.msra.mxu0 %v9638_v54  ;;  %2738 = vmatpush1.bf16.msra.mxu1 %v9641_v55  ;;  %v9740_v54 = vld [vmem:[%s11047_s27 + $0xec] ss:$28 sps:$4 sm:$0xff]   ;;  %v9734_v55 = vld [vmem:[%s13706_s2 + $0x4e0] ss:$16 sps:$4 sm:$0xff]  }
  0x70   : > { %2287 = vmatprep.subr.bf16.mxu0 %v9646_v56  ;;  %2739 = vmatprep.subr.bf16.mxu1 %v9649_v57  ;;  %v9737_v56 = vld [vmem:[%s13706_s2 + $0x4e8] ss:$16 sps:$4 sm:$0xff]   ;;  %v9745_v57 = vld [vmem:[%s13706_s2 + $0x504] ss:$16 sps:$4 sm:$0xff]  }
  0x71   : > { %2244 = vmatprep.mubr.bf16.mxu0 %v9650_v58  ;;  %2696 = vmatprep.mubr.bf16.mxu1 %v9650_v58  ;;  %v9748_v58 = vld [vmem:[%s13706_s2 + $0x50c] ss:$16 sps:$4 sm:$0xff]  }
  0x73   : > { %2288 = vmatpush1.bf16.msra.mxu0 %v9644_v59  ;;  %2740 = vmatpush1.bf16.msra.mxu1 %v9647_v60  ;;  %v9742_v59 = vld [vmem:[%s11047_s27 + $0xe8] ss:$28 sps:$4 sm:$0xff]   ;;  %v9743_v60 = vld [vmem:[%s13706_s2 + $0x500] ss:$16 sps:$4 sm:$0xff]  }
  0x74   : > { %2289 = vmatprep.subr.bf16.mxu0 %v9655_v61  ;;  %2741 = vmatprep.subr.bf16.mxu1 %v9658_v62  ;;  %v9746_v61 = vld [vmem:[%s13706_s2 + $0x508] ss:$16 sps:$4 sm:$0xff]   ;;  %v9751_v62 = vld [vmem:[%s13706_s2 + $0x524] ss:$16 sps:$4 sm:$0xff]  }
  0x76   : > { %2245 = vmatmul.mubr.bf16.gmra.mrb[24].mxu0 %v9652_v63  ;;  %2697 = vmatmul.mubr.bf16.gmra.mrb[24].mxu1 %v9652_v63  ;;  %v9754_v63 = vld [vmem:[%s13706_s2 + $0x52c] ss:$16 sps:$4 sm:$0xff]  }
  0x77   : > { %2290 = vmatpush1.bf16.msra.mxu0 %v9653_v0  ;;  %2742 = vmatpush1.bf16.msra.mxu1 %v9656_v1  ;;  %v9755_v0 = vld [vmem:[%s11047_s27 + $0x124] ss:$28 sps:$4 sm:$0xff]  }
  0x78   : > { %2291 = vmatprep.subr.bf16.mxu0 %v9661_v2  ;;  %2743 = vmatprep.subr.bf16.mxu1 %v9664_v3  ;;  %v9749_v1 = vld [vmem:[%s13706_s2 + $0x520] ss:$16 sps:$4 sm:$0xff]   ;;  %v9752_v2 = vld [vmem:[%s13706_s2 + $0x528] ss:$16 sps:$4 sm:$0xff]   ;;  %v9760_v3 = vld [vmem:[%s13706_s2 + $0x544] ss:$16 sps:$4 sm:$0xff]  }
  0x79   : > { %2254 = vmatprep.mubr.bf16.mxu0 %v9665_v4  ;;  %2706 = vmatprep.mubr.bf16.mxu1 %v9665_v4  ;;  %v9763_v4 = vld [vmem:[%s13706_s2 + $0x54c] ss:$16 sps:$4 sm:$0xff]  }
  0x7b   : > { %2292 = vmatpush1.bf16.msra.mxu0 %v9659_v5  ;;  %2744 = vmatpush1.bf16.msra.mxu1 %v9662_v6  ;;  %v9757_v5 = vld [vmem:[%s11047_s27 + $0x120] ss:$28 sps:$4 sm:$0xff]  }
  0x7c   : > { %2293 = vmatprep.subr.bf16.mxu0 %v9670_v7  ;;  %2745 = vmatprep.subr.bf16.mxu1 %v9673_v8  ;;  %v9758_v6 = vld [vmem:[%s13706_s2 + $0x540] ss:$16 sps:$4 sm:$0xff]   ;;  %v9761_v7 = vld [vmem:[%s13706_s2 + $0x548] ss:$16 sps:$4 sm:$0xff]   ;;  %v9766_v8 = vld [vmem:[%s13706_s2 + $0x564] ss:$16 sps:$4 sm:$0xff]  }
  0x7e   : > { %2255 = vmatmul.mubr.bf16.gmra.mrb[28].mxu0 %v9667_v9  ;;  %2707 = vmatmul.mubr.bf16.gmra.mrb[28].mxu1 %v9667_v9  ;;  %v9769_v9 = vld [vmem:[%s13706_s2 + $0x56c] ss:$16 sps:$4 sm:$0xff]  }
  0x7f   : > { %2294 = vmatpush1.bf16.msra.mxu0 %v9668_v10  ;;  %2746 = vmatpush1.bf16.msra.mxu1 %v9671_v11  ;;  %v9770_v10 = vld [vmem:[%s11047_s27 + $0x15c] ss:$28 sps:$4 sm:$0xff]   ;;  %v9764_v11 = vld [vmem:[%s13706_s2 + $0x560] ss:$16 sps:$4 sm:$0xff]  }
  0x80   : > { %2295 = vmatprep.subr.bf16.mxu0 %v9676_v12  ;;  %2747 = vmatprep.subr.bf16.mxu1 %v9679_v13  ;;  %v9767_v12 = vld [vmem:[%s13706_s2 + $0x568] ss:$16 sps:$4 sm:$0xff]   ;;  %v9775_v13 = vld [vmem:[%s13706_s2 + $0x584] ss:$16 sps:$4 sm:$0xff]  }
  0x81   : > { %2297 = vmatprep.mubr.bf16.mxu0 %v9682_v14  ;;  %2749 = vmatprep.mubr.bf16.mxu1 %v9682_v14  ;;  %v9778_v14 = vld [vmem:[%s13706_s2 + $0x58c] ss:$16 sps:$4 sm:$0xff]  }
  0x83   : > { %2296 = vmatpush1.bf16.msra.mxu0 %v9674_v15  ;;  %2748 = vmatpush1.bf16.msra.mxu1 %v9677_v16  ;;  %v9772_v15 = vld [vmem:[%s11047_s27 + $0x158] ss:$28 sps:$4 sm:$0xff]   ;;  %v9773_v16 = vld [vmem:[%s13706_s2 + $0x580] ss:$16 sps:$4 sm:$0xff]  }
  0x84   : > { %2378 = vmatprep.subr.bf16.mxu0 %v9685_v17  ;;  %2830 = vmatprep.subr.bf16.mxu1 %v9688_v18  ;;  %v9776_v17 = vld [vmem:[%s13706_s2 + $0x588] ss:$16 sps:$4 sm:$0xff]   ;;  %v9781_v18 = vld [vmem:[%s13706_s2 + $0x5a4] ss:$16 sps:$4 sm:$0xff]  }
  0x86   : > { %2298 = vmatmul.mubr.bf16.vlgmr.msra.gmra.mrb[0].mxu0 %v9680_v19  ;;  %2750 = vmatmul.mubr.bf16.vlgmr.msra.gmra.mrb[0].mxu1 %v9680_v19  ;;  %v9784_v19 = vld [vmem:[%s13706_s2 + $0x5ac] ss:$16 sps:$4 sm:$0xff]  }
  0x87   : > { %2379 = vmatpush1.bf16.msra.mxu0 %v9683_v20  ;;  %2831 = vmatpush1.bf16.msra.mxu1 %v9686_v21  ;;  %v9785_v20 = vld [vmem:[%s11047_s27 + $0x194] ss:$28 sps:$4 sm:$0xff]  }
  0x88   : > { %2380 = vmatprep.subr.bf16.mxu0 %v9691_v22  ;;  %2832 = vmatprep.subr.bf16.mxu1 %v9694_v23  ;;  %v9779_v21 = vld [vmem:[%s13706_s2 + $0x5a0] ss:$16 sps:$4 sm:$0xff]   ;;  %v9782_v22 = vld [vmem:[%s13706_s2 + $0x5a8] ss:$16 sps:$4 sm:$0xff]   ;;  %v9790_v23 = vld [vmem:[%s13706_s2 + $0x5c4] ss:$16 sps:$4 sm:$0xff]  }
  0x89   : > { %2307 = vmatprep.mubr.bf16.mxu0 %v9695_v24  ;;  %2759 = vmatprep.mubr.bf16.mxu1 %v9695_v24  ;;  %v9787_v24 = vld [vmem:[%s11047_s27 + $0x190] ss:$28 sps:$4 sm:$0xff]  }
  0x8b   : > { %2381 = vmatpush1.bf16.msra.mxu0 %v9689_v25  ;;  %2833 = vmatpush1.bf16.msra.mxu1 %v9692_v26  ;;  %v9793_v25 = vld [vmem:[%s13706_s2 + $0x5cc] ss:$16 sps:$4 sm:$0xff]   ;;  %v9788_v26 = vld [vmem:[%s13706_s2 + $0x5c0] ss:$16 sps:$4 sm:$0xff]  }
  0x8c   : > { %2382 = vmatprep.subr.bf16.mxu0 %v9700_v27  ;;  %2834 = vmatprep.subr.bf16.mxu1 %v9703_v28  ;;  %v9791_v27 = vld [vmem:[%s13706_s2 + $0x5c8] ss:$16 sps:$4 sm:$0xff]   ;;  %v9796_v28 = vld [vmem:[%s13706_s2 + $0x5e4] ss:$16 sps:$4 sm:$0xff]  }
  0x8e   : > { %2308 = vmatmul.mubr.bf16.gmra.mrb[4].mxu0 %v9697_v29  ;;  %2760 = vmatmul.mubr.bf16.gmra.mrb[4].mxu1 %v9697_v29  ;;  %v9799_v29 = vld [vmem:[%s13706_s2 + $0x5ec] ss:$16 sps:$4 sm:$0xff]  }
  0x8f   : > { %2383 = vmatpush1.bf16.msra.mxu0 %v9698_v30  ;;  %2835 = vmatpush1.bf16.msra.mxu1 %v9701_v31  ;;  %v9794_v30 = vld [vmem:[%s13706_s2 + $0x5e0] ss:$16 sps:$4 sm:$0xff]  }
  0x90   : > { %2384 = vmatprep.subr.bf16.mxu0 %v9706_v32  ;;  %2836 = vmatprep.subr.bf16.mxu1 %v9709_v33  ;;  %v9802_v31 = vld [vmem:[%s11047_s27 + $0x14] ss:$28 sps:$4 sm:$0xff]   ;;  %v9797_v32 = vld [vmem:[%s13706_s2 + $0x5e8] ss:$16 sps:$4 sm:$0xff]  }
  0x91   : > { %2317 = vmatprep.mubr.bf16.mxu0 %v9710_v34  ;;  %2769 = vmatprep.mubr.bf16.mxu1 %v9710_v34  ;;  %v9805_v33 = vld [vmem:[%s13706_s2 + $0x604] ss:$16 sps:$4 sm:$0xff]   ;;  %v9832_v34 = vld [vmem:[%s13706_s2 + $0x60c] ss:$16 sps:$4 sm:$0xff]  }
  0x93   : > { %2385 = vmatpush1.bf16.msra.mxu0 %v9704_v35  ;;  %2837 = vmatpush1.bf16.msra.mxu1 %v9707_v36  ;;  %v9800_v35 = vld [vmem:[%s11047_s27 + $0x10] ss:$28 sps:$4 sm:$0xff]  }
  0x94   : > { %2386 = vmatprep.subr.bf16.mxu0 %v9715_v37  ;;  %2838 = vmatprep.subr.bf16.mxu1 %v9718_v38  ;;  %v9803_v36 = vld [vmem:[%s13706_s2 + $0x600] ss:$16 sps:$4 sm:$0xff]   ;;  %v9806_v37 = vld [vmem:[%s11047_s27 + $0x4c] ss:$28 sps:$4 sm:$0xff]   ;;  %v9811_v38 = vld [vmem:[%s13706_s2 + $0x624] ss:$16 sps:$4 sm:$0xff]  }
  0x96   : > { %2318 = vmatmul.mubr.bf16.gmra.mrb[8].mxu0 %v9712_v39  ;;  %2770 = vmatmul.mubr.bf16.gmra.mrb[8].mxu1 %v9712_v39  ;;  %v9830_v39 = vld [vmem:[%s13706_s2 + $0x608] ss:$16 sps:$4 sm:$0xff]  }
  0x97   : > { %2387 = vmatpush1.bf16.msra.mxu0 %v9713_v40  ;;  %2839 = vmatpush1.bf16.msra.mxu1 %v9716_v41  ;;  %v9835_v40 = vld [vmem:[%s13706_s2 + $0x62c] ss:$16 sps:$4 sm:$0xff]   ;;  %v9809_v41 = vld [vmem:[%s13706_s2 + $0x620] ss:$16 sps:$4 sm:$0xff]  }
  0x98   : > { %2388 = vmatprep.subr.bf16.mxu0 %v9721_v42  ;;  %2840 = vmatprep.subr.bf16.mxu1 %v9724_v43  ;;  %v9817_v42 = vld [vmem:[%s13706_s2 + $0x644] ss:$16 sps:$4 sm:$0xff]   ;;  %v9833_v43 = vld [vmem:[%s13706_s2 + $0x628] ss:$16 sps:$4 sm:$0xff]  }
  0x99   : > { %2327 = vmatprep.mubr.bf16.mxu0 %v9725_v44  ;;  %2779 = vmatprep.mubr.bf16.mxu1 %v9725_v44  ;;  %v9808_v44 = vld [vmem:[%s11047_s27 + $0x48] ss:$28 sps:$4 sm:$0xff]  }
  0x9b   : > { %2389 = vmatpush1.bf16.msra.mxu0 %v9719_v45  ;;  %2841 = vmatpush1.bf16.msra.mxu1 %v9722_v46  ;;  %v9812_v45 = vld [vmem:[%s11047_s27 + $0x84] ss:$28 sps:$4 sm:$0xff]  }
  0x9c   : > { %2390 = vmatprep.subr.bf16.mxu0 %v9730_v47  ;;  %2842 = vmatprep.subr.bf16.mxu1 %v9733_v48  ;;  %v9815_v46 = vld [vmem:[%s13706_s2 + $0x640] ss:$16 sps:$4 sm:$0xff]   ;;  %v9844_v47 = vld [vmem:[%s13706_s2 + $0x64c] ss:$16 sps:$4 sm:$0xff]   ;;  %v9823_v48 = vld [vmem:[%s13706_s2 + $0x664] ss:$16 sps:$4 sm:$0xff]  }
  0x9e   : > { %2328 = vmatmul.mubr.bf16.gmra.mrb[12].mxu0 %v9727_v49  ;;  %2780 = vmatmul.mubr.bf16.gmra.mrb[12].mxu1 %v9727_v49  ;;  %v9842_v49 = vld [vmem:[%s13706_s2 + $0x648] ss:$16 sps:$4 sm:$0xff]  }
  0x9f   : > { %2391 = vmatpush1.bf16.msra.mxu0 %v9728_v50  ;;  %2843 = vmatpush1.bf16.msra.mxu1 %v9731_v51  ;;  %v9847_v50 = vld [vmem:[%s13706_s2 + $0x66c] ss:$16 sps:$4 sm:$0xff]  }
  0xa0   : > { %2392 = vmatprep.subr.bf16.mxu0 %v9736_v52  ;;  %2844 = vmatprep.subr.bf16.mxu1 %v9739_v53  ;;  %v9814_v51 = vld [vmem:[%s11047_s27 + $0x80] ss:$28 sps:$4 sm:$0xff]   ;;  %v9829_v53 = vld [vmem:[%s13706_s2 + $0x684] ss:$16 sps:$4 sm:$0xff]  }
  0xa1   : > { %2337 = vmatprep.mubr.bf16.mxu0 %v9740_v54  ;;  %2789 = vmatprep.mubr.bf16.mxu1 %v9740_v54  ;;  %v9821_v52 = vld [vmem:[%s13706_s2 + $0x660] ss:$16 sps:$4 sm:$0xff]   ;;  %v9845_v54 = vld [vmem:[%s13706_s2 + $0x668] ss:$16 sps:$4 sm:$0xff]  }
  0xa3   : > { %2393 = vmatpush1.bf16.msra.mxu0 %v9734_v55  ;;  %2845 = vmatpush1.bf16.msra.mxu1 %v9737_v56  ;;  %v9818_v55 = vld [vmem:[%s11047_s27 + $0xbc] ss:$28 sps:$4 sm:$0xff]   ;;  %v9827_v56 = vld [vmem:[%s13706_s2 + $0x680] ss:$16 sps:$4 sm:$0xff]  }
  0xa4   : > { %2394 = vmatprep.subr.bf16.mxu0 %v9745_v57  ;;  %2846 = vmatprep.subr.bf16.mxu1 %v9748_v58  ;;  %v9841_v57 = vld [vmem:[%s13706_s2 + $0x6a4] ss:$16 sps:$4 sm:$0xff]   ;;  %v9854_v58 = vld [vmem:[%s13706_s2 + $0x688] ss:$16 sps:$4 sm:$0xff]  }
  0xa6   : > { %2338 = vmatmul.mubr.bf16.gmra.mrb[16].mxu0 %v9742_v59  ;;  %2790 = vmatmul.mubr.bf16.gmra.mrb[16].mxu1 %v9742_v59  ;;  %v9856_v59 = vld [vmem:[%s13706_s2 + $0x68c] ss:$16 sps:$4 sm:$0xff]  }
  0xa7   : > { %2395 = vmatpush1.bf16.msra.mxu0 %v9743_v60  ;;  %2847 = vmatpush1.bf16.msra.mxu1 %v9746_v61  ;;  %v9859_v60 = vld [vmem:[%s13706_s2 + $0x6ac] ss:$16 sps:$4 sm:$0xff]   ;;  %v9839_v61 = vld [vmem:[%s13706_s2 + $0x6a0] ss:$16 sps:$4 sm:$0xff]  }
  0xa8   : > { %2396 = vmatprep.subr.bf16.mxu0 %v9751_v62  ;;  %2848 = vmatprep.subr.bf16.mxu1 %v9754_v63  ;;  %v9853_v62 = vld [vmem:[%s13706_s2 + $0x6c4] ss:$16 sps:$4 sm:$0xff]   ;;  %v9857_v63 = vld [vmem:[%s13706_s2 + $0x6a8] ss:$16 sps:$4 sm:$0xff]  }
  0xa9   : > { %2347 = vmatprep.mubr.bf16.mxu0 %v9755_v0  ;;  %2799 = vmatprep.mubr.bf16.mxu1 %v9755_v0  ;;  %v9820_v0 = vld [vmem:[%s11047_s27 + $0xb8] ss:$28 sps:$4 sm:$0xff]  }
  0xab   : > { %2397 = vmatpush1.bf16.msra.mxu0 %v9749_v1  ;;  %2849 = vmatpush1.bf16.msra.mxu1 %v9752_v2  ;;  %v9824_v1 = vld [vmem:[%s11047_s27 + $0xf4] ss:$28 sps:$4 sm:$0xff]  }
  0xac   : > { %2398 = vmatprep.subr.bf16.mxu0 %v9760_v3  ;;  %2850 = vmatprep.subr.bf16.mxu1 %v9763_v4  ;;  %v9851_v2 = vld [vmem:[%s13706_s2 + $0x6c0] ss:$16 sps:$4 sm:$0xff]   ;;  %v9868_v3 = vld [vmem:[%s13706_s2 + $0x6cc] ss:$16 sps:$4 sm:$0xff]   ;;  %v9865_v4 = vld [vmem:[%s13706_s2 + $0x6e4] ss:$16 sps:$4 sm:$0xff]  }
  0xae   : > { %2348 = vmatmul.mubr.bf16.gmra.mrb[20].mxu0 %v9757_v5  ;;  %2800 = vmatmul.mubr.bf16.gmra.mrb[20].mxu1 %v9757_v5  ;;  %v9866_v5 = vld [vmem:[%s13706_s2 + $0x6c8] ss:$16 sps:$4 sm:$0xff]  }
  0xaf   : > { %2399 = vmatpush1.bf16.msra.mxu0 %v9758_v6  ;;  %2851 = vmatpush1.bf16.msra.mxu1 %v9761_v7  ;;  %v9871_v6 = vld [vmem:[%s13706_s2 + $0x6ec] ss:$16 sps:$4 sm:$0xff]   ;;  %v9863_v7 = vld [vmem:[%s13706_s2 + $0x6e0] ss:$16 sps:$4 sm:$0xff]  }
  0xb0   : > { %2400 = vmatprep.subr.bf16.mxu0 %v9766_v8  ;;  %2852 = vmatprep.subr.bf16.mxu1 %v9769_v9  ;;  %v9869_v8 = vld [vmem:[%s13706_s2 + $0x6e8] ss:$16 sps:$4 sm:$0xff]   ;;  %v9882_v9 = vld [vmem:[%s13708_s4 + $0x4] ss:$8 sps:$4 sm:$0xff]  }
  0xb1   : > { %2357 = vmatprep.mubr.bf16.mxu0 %v9770_v10  ;;  %2809 = vmatprep.mubr.bf16.mxu1 %v9770_v10  ;;  %v9826_v10 = vld [vmem:[%s11047_s27 + $0xf0] ss:$28 sps:$4 sm:$0xff]  }
  0xb3   : > { %2401 = vmatpush1.bf16.msra.mxu0 %v9764_v11  ;;  %2853 = vmatpush1.bf16.msra.mxu1 %v9767_v12  ;;  %v9836_v11 = vld [vmem:[%s11047_s27 + $0x12c] ss:$28 sps:$4 sm:$0xff]  }
  0xb4   : > { %2402 = vmatprep.subr.bf16.mxu0 %v9775_v13  ;;  %2854 = vmatprep.subr.bf16.mxu1 %v9778_v14  ;;  %v9838_v12 = vld [vmem:[%s11047_s27 + $0x128] ss:$28 sps:$4 sm:$0xff]   ;;  %v9850_v14 = vld [vmem:[%s11047_s27 + $0x160] ss:$28 sps:$4 sm:$0xff]  }
  0xb5   : > { %v9848_v13 = vld [vmem:[%s11047_s27 + $0x164] ss:$28 sps:$4 sm:$0xff]  }
  0xb6   : > { %2358 = vmatmul.mubr.bf16.gmra.mrb[24].mxu0 %v9772_v15  ;;  %2810 = vmatmul.mubr.bf16.gmra.mrb[24].mxu1 %v9772_v15  ;;  %v9860_v15 = vld [vmem:[%s11047_s27 + $0x19c] ss:$28 sps:$4 sm:$0xff]  }
  0xb7   : > { %2403 = vmatpush1.bf16.msra.mxu0 %v9773_v16  ;;  %2855 = vmatpush1.bf16.msra.mxu1 %v9776_v17  ;;  %v9862_v16 = vld [vmem:[%s11047_s27 + $0x198] ss:$28 sps:$4 sm:$0xff]   ;;  %v10833_v17 = vmov 0  }
  0xb8   : > { %2404 = vmatprep.subr.bf16.mxu0 %v9781_v18  ;;  %2856 = vmatprep.subr.bf16.mxu1 %v9784_v19  ;;  %v9872_v18 = vld [vmem:[%s11047_s27 + $0x18] ss:$28 sps:$4 sm:$0xff]   ;;  %v9880_v19 = vld [vmem:[%s13708_s4] ss:$8 sps:$4 sm:$0xff]  }
  0xb9   : > { %2367 = vmatprep.mubr.bf16.mxu0 %v9785_v20  ;;  %2819 = vmatprep.mubr.bf16.mxu1 %v9785_v20  ;;  %v9885_v20 = vld [vmem:[%s13708_s4 + $0x14] ss:$8 sps:$4 sm:$0xff]  }
  0xbb   : > { %2405 = vmatpush1.bf16.msra.mxu0 %v9779_v21  ;;  %2857 = vmatpush1.bf16.msra.mxu1 %v9782_v22  ;;  %v9883_v21 = vld [vmem:[%s13708_s4 + $0x10] ss:$8 sps:$4 sm:$0xff]   ;;  %v9888_v22 = vld [vmem:[%s13708_s4 + $0x24] ss:$8 sps:$4 sm:$0xff]  }
  0xbc   : > { %2406 = vmatprep.subr.bf16.mxu0 %v9790_v23  ;;  %2858 = vmatprep.subr.bf16.mxu1 %v9793_v25  ;;  %v9873_v23 = vld [vmem:[%s11047_s27 + $0x50] ss:$28 sps:$4 sm:$0xff]   ;;  %v9891_v25 = vld [vmem:[%s13708_s4 + $0x34] ss:$8 sps:$4 sm:$0xff]  }
  0xbe   : > { %2368 = vmatmul.mubr.bf16.gmra.mrb[28].mxu0 %v9787_v24  ;;  %2820 = vmatmul.mubr.bf16.gmra.mrb[28].mxu1 %v9787_v24  ;;  %v9886_v24 = vld [vmem:[%s13708_s4 + $0x20] ss:$8 sps:$4 sm:$0xff]  }
  0xbf   : > { %2407 = vmatpush1.bf16.msra.mxu0 %v9788_v26  ;;  %2859 = vmatpush1.bf16.msra.mxu1 %v9791_v27  ;;  %v9889_v26 = vld [vmem:[%s13708_s4 + $0x30] ss:$8 sps:$4 sm:$0xff]   ;;  %v9894_v27 = vld [vmem:[%s13708_s4 + $0x44] ss:$8 sps:$4 sm:$0xff]  }
  0xc0   : > { %2408 = vmatprep.subr.bf16.mxu0 %v9796_v28  ;;  %2860 = vmatprep.subr.bf16.mxu1 %v9799_v29  ;;  %v9874_v28 = vld [vmem:[%s11047_s27 + $0x88] ss:$28 sps:$4 sm:$0xff]  }
  0xc1   : > { %2410 = vmatprep.mubr.bf16.mxu0 %v9802_v31  ;;  %2862 = vmatprep.mubr.bf16.mxu1 %v9802_v31  ;;  %v9892_v29 = vld [vmem:[%s13708_s4 + $0x40] ss:$8 sps:$4 sm:$0xff]   ;;  %v9895_v31 = vld [vmem:[%s13708_s4 + $0x50] ss:$8 sps:$4 sm:$0xff]  }
  0xc3   : > { %2409 = vmatpush1.bf16.msra.mxu0 %v9794_v30  ;;  %2861 = vmatpush1.bf16.msra.mxu1 %v9797_v32  ;;  %v9897_v30 = vld [vmem:[%s13708_s4 + $0x54] ss:$8 sps:$4 sm:$0xff]   ;;  %v9900_v32 = vld [vmem:[%s13708_s4 + $0x64] ss:$8 sps:$4 sm:$0xff]  }
  0xc4   : > { %2491 = vmatprep.subr.bf16.mxu0 %v9805_v33  ;;  %2943 = vmatprep.subr.bf16.mxu1 %v9832_v34  ;;  %v9875_v33 = vld [vmem:[%s11047_s27 + $0xc0] ss:$28 sps:$4 sm:$0xff]  }
  0xc5   : > { %v9898_v34 = vld [vmem:[%s13708_s4 + $0x60] ss:$8 sps:$4 sm:$0xff]  }
  0xc6   : > { %2411 = vmatmul.mubr.bf16.vlgmr.msra.gmra.mrb[0].mxu0 %v9800_v35  ;;  %2863 = vmatmul.mubr.bf16.vlgmr.msra.gmra.mrb[0].mxu1 %v9800_v35  ;;  %v9903_v35 = vld [vmem:[%s13708_s4 + $0x74] ss:$8 sps:$4 sm:$0xff]  }
  0xc7   : > { %2492 = vmatpush1.bf16.msra.mxu0 %v9803_v36  ;;  %2420 = vmatprep.mubr.bf16.mxu0 %v9806_v37  ;;  %v9901_v36 = vld [vmem:[%s13708_s4 + $0x70] ss:$8 sps:$4 sm:$0xff]  }
  0xc8   : > { %2872 = vmatprep.mubr.bf16.mxu1 %v9806_v37  ;;  %2493 = vmatprep.subr.bf16.mxu0 %v9811_v38  ;;  %v9906_v37 = vld [vmem:[%s13708_s4 + $0x84] ss:$8 sps:$4 sm:$0xff]   ;;  %v9876_v38 = vld [vmem:[%s11047_s27 + $0xf8] ss:$28 sps:$4 sm:$0xff]  }
  0xc9   : > { %2944 = vmatpush1.bf16.msra.mxu1 %v9830_v39  ;;  %v9904_v39 = vld [vmem:[%s13708_s4 + $0x80] ss:$8 sps:$4 sm:$0xff]  }
  0xca   : > { %2945 = vmatprep.subr.bf16.mxu1 %v9835_v40  ;;  %v9909_v40 = vld [vmem:[%s13708_s4 + $0x94] ss:$8 sps:$4 sm:$0xff]  }
  0xcb   : > { %2494 = vmatpush1.bf16.msra.mxu0 %v9809_v41  ;;  %v9907_v41 = vld [vmem:[%s13708_s4 + $0x90] ss:$8 sps:$4 sm:$0xff]  }
  0xcc   : > { %2495 = vmatprep.subr.bf16.mxu0 %v9817_v42  ;;  %v9912_v42 = vld [vmem:[%s13708_s4 + $0xa4] ss:$8 sps:$4 sm:$0xff]  }
  0xcd   : > { %2946 = vmatpush1.bf16.msra.mxu1 %v9833_v43  ;;  %v9877_v43 = vld [vmem:[%s11047_s27 + $0x130] ss:$28 sps:$4 sm:$0xff]  }
  0xce   : > { %2421 = vmatmul.mubr.bf16.gmra.mrb[4].mxu0 %v9808_v44  ;;  %2873 = vmatmul.mubr.bf16.gmra.mrb[4].mxu1 %v9808_v44  ;;  %v9910_v44 = vld [vmem:[%s13708_s4 + $0xa0] ss:$8 sps:$4 sm:$0xff]  }
  0xcf   : > { %2430 = vmatprep.mubr.bf16.mxu0 %v9812_v45  ;;  %2882 = vmatprep.mubr.bf16.mxu1 %v9812_v45  ;;  %v9915_v45 = vld [vmem:[%s13708_s4 + $0xb4] ss:$8 sps:$4 sm:$0xff]  }
  0xd0   : > { %2496 = vmatpush1.bf16.msra.mxu0 %v9815_v46  ;;  %2947 = vmatprep.subr.bf16.mxu1 %v9844_v47  ;;  %v9913_v46 = vld [vmem:[%s13708_s4 + $0xb0] ss:$8 sps:$4 sm:$0xff]   ;;  %v9918_v47 = vld [vmem:[%s13708_s4 + $0xc4] ss:$8 sps:$4 sm:$0xff]  }
  0xd1   : > { %2497 = vmatprep.subr.bf16.mxu0 %v9823_v48  ;;  %2948 = vmatpush1.bf16.msra.mxu1 %v9842_v49  ;;  %v9878_v48 = vld [vmem:[%s11047_s27 + $0x168] ss:$28 sps:$4 sm:$0xff]  }
  0xd2   : > { %2949 = vmatprep.subr.bf16.mxu1 %v9847_v50  ;;  %v9916_v49 = vld [vmem:[%s13708_s4 + $0xc0] ss:$8 sps:$4 sm:$0xff]   ;;  %v9921_v50 = vld [vmem:[%s13708_s4 + $0xd4] ss:$8 sps:$4 sm:$0xff]  }
  0xd4   : > { %2498 = vmatpush1.bf16.msra.mxu0 %v9821_v52  ;;  %v9879_v52 = vld [vmem:[%s11047_s27 + $0x1a0] ss:$28 sps:$4 sm:$0xff]  }
  0xd5   : > { %2499 = vmatprep.subr.bf16.mxu0 %v9829_v53  ;;  %2950 = vmatpush1.bf16.msra.mxu1 %v9845_v54  ;;  %v9924_v53 = vld [vmem:[%s13708_s4 + $0xe4] ss:$8 sps:$4 sm:$0xff]   ;;  %v9922_v54 = vld [vmem:[%s13708_s4 + $0xe0] ss:$8 sps:$4 sm:$0xff]  }
  0xd6   : > { %2431 = vmatmul.mubr.bf16.gmra.mrb[8].mxu0 %v9814_v51  ;;  %2883 = vmatmul.mubr.bf16.gmra.mrb[8].mxu1 %v9814_v51  ;;  %v9919_v51 = vld [vmem:[%s13708_s4 + $0xd0] ss:$8 sps:$4 sm:$0xff]  }
  0xd7   : > { %2440 = vmatprep.mubr.bf16.mxu0 %v9818_v55  ;;  %2892 = vmatprep.mubr.bf16.mxu1 %v9818_v55  ;;  %v9927_v55 = vld [vmem:[%s13708_s4 + $0xf4] ss:$8 sps:$4 sm:$0xff]  }
  0xd8   : > { %2500 = vmatpush1.bf16.msra.mxu0 %v9827_v56  ;;  %2951 = vmatprep.subr.bf16.mxu1 %v9856_v59  ;;  %v9925_v56 = vld [vmem:[%s13708_s4 + $0xf0] ss:$8 sps:$4 sm:$0xff]  }
  0xd9   : > { %2501 = vmatprep.subr.bf16.mxu0 %v9841_v57  ;;  %2952 = vmatpush1.bf16.msra.mxu1 %v9854_v58  ;;  %v9930_v57 = vld [vmem:[%s13708_s4 + $0x104] ss:$8 sps:$4 sm:$0xff]   ;;  %v724_v58 = vlaneseq }
  0xda   : > { %2953 = vmatprep.subr.bf16.mxu1 %v9859_v60 }
  0xdb   : > { %v11758_v59 = vshrl.u32 %v724_v58, 7  ;;  %v9931_v58 = vld [vmem:[%s13708_s4 + $0x110] ss:$8 sps:$4 sm:$0xff]  }
  0xdc   : > { %2502 = vmatpush1.bf16.msra.mxu0 %v9839_v61 }
  0xdd   : > { %2503 = vmatprep.subr.bf16.mxu0 %v9853_v62  ;;  %2954 = vmatpush1.bf16.msra.mxu1 %v9857_v63  ;;  %v11761_v60 = vsub.s32 0, %v11758_v59  ;;  %v11764_v61 = vsub.s32 2, %v11758_v59  ;;  %v722_v62 = vld [vmem:[%s13707_s3] sm:$0xf]  ;;  %v11770_v63 = vsub.s32 1, %v11758_v59 }
  0xde   : > { %2441 = vmatmul.mubr.bf16.gmra.mrb[12].mxu0 %v9820_v0  ;;  %2893 = vmatmul.mubr.bf16.gmra.mrb[12].mxu1 %v9820_v0  ;;  %v11773_v0 = vsub.s32 3, %v11758_v59 }
  0xdf   : > { %2450 = vmatprep.mubr.bf16.mxu0 %v9824_v1  ;;  %2902 = vmatprep.mubr.bf16.mxu1 %v9824_v1  ;;  %v11776_v1 = vrot.slane %v722_v62, %v11761_v60 }
  0xe0   : > { %2504 = vmatpush1.bf16.msra.mxu0 %v9851_v2  ;;  %2955 = vmatprep.subr.bf16.mxu1 %v9868_v3  ;;  %v11779_v2 = vrot.slane %v722_v62, %v11764_v61  ;;  %v11782_v3 = vrot.slane %v722_v62, %v11770_v63 }
  0xe1   : > { %2505 = vmatprep.subr.bf16.mxu0 %v9865_v4  ;;  %2956 = vmatpush1.bf16.msra.mxu1 %v9866_v5  ;;  %v11785_v4 = vrot.slane %v722_v62, %v11773_v0  ;;  %v9987_v62 = vld [vmem:[%s13710_s6 + $0x64] ss:$16 sps:$4 sm:$0xff]  }
  0xe2   : > { %2957 = vmatprep.subr.bf16.mxu1 %v9871_v6 }
  0xe4   : > { %2506 = vmatpush1.bf16.msra.mxu0 %v9863_v7 }
  0xe5   : > { %2958 = vmatpush1.bf16.msra.mxu1 %v9869_v8  ;;  %3548 = vmatprep.subr.bf16.mxu0 %v9882_v9 }
  0xe6   : > { %2451 = vmatmul.mubr.bf16.gmra.mrb[16].mxu0 %v9826_v10  ;;  %2903 = vmatmul.mubr.bf16.gmra.mrb[16].mxu1 %v9826_v10 }
  0xe7   : > { %2460 = vmatprep.mubr.bf16.mxu0 %v9836_v11  ;;  %2912 = vmatprep.mubr.bf16.mxu1 %v9836_v11 }
  0xee   : > { %2461 = vmatmul.mubr.bf16.gmra.mrb[20].mxu0 %v9838_v12  ;;  %2913 = vmatmul.mubr.bf16.gmra.mrb[20].mxu1 %v9838_v12 }
  0xef   : > { %2470 = vmatprep.mubr.bf16.mxu0 %v9848_v13  ;;  %2922 = vmatprep.mubr.bf16.mxu1 %v9848_v13 }
  0xf6   : > { %2471 = vmatmul.mubr.bf16.gmra.mrb[24].mxu0 %v9850_v14  ;;  %2923 = vmatmul.mubr.bf16.gmra.mrb[24].mxu1 %v9850_v14 }
  0xf7   : > { %2480 = vmatprep.mubr.bf16.mxu0 %v9860_v15  ;;  %2932 = vmatprep.mubr.bf16.mxu1 %v9860_v15 }
  0xfe   : > { %2481 = vmatmul.mubr.bf16.gmra.mrb[28].mxu0 %v9862_v16  ;;  %2933 = vmatmul.mubr.bf16.gmra.mrb[28].mxu1 %v9862_v16 }
  0xff   : > { %2523 = vmatprep.mubr.bf16.mxu0 %v10833_v17  ;;  %2975 = vmatprep.mubr.bf16.mxu1 %v10833_v17 }
 0x106   : > { %2524 = vmatmul.mubr.bf16.vlgmr.msra.gmra.mrb[0].mxu0 %v9872_v18  ;;  %2976 = vmatmul.mubr.bf16.vlgmr.msra.gmra.mrb[0].mxu1 %v9872_v18 }
 0x107   : > { %2533 = vmatprep.mubr.bf16.mxu0 %v10833_v17  ;;  %2985 = vmatprep.mubr.bf16.mxu1 %v10833_v17 }
 0x108   : > { %3549 = vmatpush1.bf16.msra.mxu0 %v9880_v19 }
 0x109   : > { %3550 = vmatprep.subr.bf16.mxu0 %v9885_v20  ;;  %v9976_v20 = vld [vmem:[%s13710_s6] ss:$16 sps:$4 sm:$0xff]  }
 0x10c   : > { %3551 = vmatpush1.bf16.msra.mxu0 %v9883_v21 }
 0x10d   : > { %3552 = vmatprep.subr.bf16.mxu0 %v9888_v22 }
 0x10e   : > { %2534 = vmatmul.mubr.bf16.gmra.mrb[4].mxu0 %v9873_v23  ;;  %2986 = vmatmul.mubr.bf16.gmra.mrb[4].mxu1 %v9873_v23  ;;  %v9978_v23 = vld [vmem:[%s13710_s6 + $0x4] ss:$16 sps:$4 sm:$0xff]  }
 0x10f   : > { %2543 = vmatprep.mubr.bf16.mxu0 %v10833_v17  ;;  %2995 = vmatprep.mubr.bf16.mxu1 %v10833_v17 }
 0x110   : > { %3553 = vmatpush1.bf16.msra.mxu0 %v9886_v24  ;;  %4092 = vmatprep.subr.bf16.mxu1 %v9978_v23  ;;  %v9990_v23 = vld [vmem:[%s13710_s6 + $0x84] ss:$16 sps:$4 sm:$0xff]  }
 0x111   : > { %3554 = vmatprep.subr.bf16.mxu0 %v9891_v25  ;;  %4093 = vmatpush1.bf16.msra.mxu1 %v9976_v20 }
 0x114   : > { %3555 = vmatpush1.bf16.msra.mxu0 %v9889_v26 }
 0x115   : > { %3556 = vmatprep.subr.bf16.mxu0 %v9894_v27 }
 0x116   : > { %2544 = vmatmul.mubr.bf16.gmra.mrb[8].mxu0 %v9874_v28  ;;  %2996 = vmatmul.mubr.bf16.gmra.mrb[8].mxu1 %v9874_v28  ;;  %v9981_v28 = vld [vmem:[%s13710_s6 + $0x24] ss:$16 sps:$4 sm:$0xff]  }
 0x117   : > { %2553 = vmatprep.mubr.bf16.mxu0 %v10833_v17  ;;  %3005 = vmatprep.mubr.bf16.mxu1 %v10833_v17 }
 0x118   : > { %3557 = vmatpush1.bf16.msra.mxu0 %v9892_v29  ;;  %4094 = vmatprep.subr.bf16.mxu1 %v9981_v28  ;;  %v9939_v28 = vld [vmem:[%s13708_s4 + $0x134] ss:$8 sps:$4 sm:$0xff]  }
 0x119   : > { %3558 = vmatprep.subr.bf16.mxu0 %v9897_v30 }
 0x11c   : > { %3559 = vmatpush1.bf16.msra.mxu0 %v9895_v31 }
 0x11d   : > { %3560 = vmatprep.subr.bf16.mxu0 %v9900_v32 }
 0x11e   : > { %2554 = vmatmul.mubr.bf16.gmra.mrb[12].mxu0 %v9875_v33  ;;  %3006 = vmatmul.mubr.bf16.gmra.mrb[12].mxu1 %v9875_v33 }
 0x11f   : > { %2563 = vmatprep.mubr.bf16.mxu0 %v10833_v17  ;;  %3015 = vmatprep.mubr.bf16.mxu1 %v10833_v17 }
 0x120   : > { %3561 = vmatpush1.bf16.msra.mxu0 %v9898_v34 }
 0x121   : > { %3562 = vmatprep.subr.bf16.mxu0 %v9903_v35  ;;  %v9979_v35 = vld [vmem:[%s13710_s6 + $0x20] ss:$16 sps:$4 sm:$0xff]  }
 0x122   : > { %4095 = vmatpush1.bf16.msra.mxu1 %v9979_v35 }
 0x124   : > { %3563 = vmatpush1.bf16.msra.mxu0 %v9901_v36 }
 0x125   : > { %3564 = vmatprep.subr.bf16.mxu0 %v9906_v37 }
 0x126   : > { %2564 = vmatmul.mubr.bf16.gmra.mrb[16].mxu0 %v9876_v38  ;;  %3016 = vmatmul.mubr.bf16.gmra.mrb[16].mxu1 %v9876_v38 }
 0x127   : > { %2573 = vmatprep.mubr.bf16.mxu0 %v10833_v17  ;;  %3025 = vmatprep.mubr.bf16.mxu1 %v10833_v17 }
 0x128   : > { %3565 = vmatpush1.bf16.msra.mxu0 %v9904_v39 }
 0x129   : > { %3566 = vmatprep.subr.bf16.mxu0 %v9909_v40  ;;  %v9928_v40 = vld [vmem:[%s13708_s4 + $0x100] ss:$8 sps:$4 sm:$0xff]  }
 0x12c   : > { %3567 = vmatpush1.bf16.msra.mxu0 %v9907_v41  ;;  %v9984_v41 = vld [vmem:[%s13710_s6 + $0x44] ss:$16 sps:$4 sm:$0xff]  }
 0x12d   : > { %3568 = vmatprep.subr.bf16.mxu0 %v9912_v42  ;;  %4096 = vmatprep.subr.bf16.mxu1 %v9984_v41 }
 0x12e   : > { %2574 = vmatmul.mubr.bf16.gmra.mrb[20].mxu0 %v9877_v43  ;;  %3026 = vmatmul.mubr.bf16.gmra.mrb[20].mxu1 %v9877_v43 }
 0x12f   : > { %2583 = vmatprep.mubr.bf16.mxu0 %v10833_v17  ;;  %3035 = vmatprep.mubr.bf16.mxu1 %v10833_v17 }
 0x130   : > { %3569 = vmatpush1.bf16.msra.mxu0 %v9910_v44 }
 0x131   : > { %3570 = vmatprep.subr.bf16.mxu0 %v9915_v45 }
 0x134   : > { %3571 = vmatpush1.bf16.msra.mxu0 %v9913_v46  ;;  %v9933_v46 = vld [vmem:[%s13708_s4 + $0x114] ss:$8 sps:$4 sm:$0xff]  }
 0x135   : > { %3572 = vmatprep.subr.bf16.mxu0 %v9918_v47 }
 0x136   : > { %2584 = vmatmul.mubr.bf16.gmra.mrb[24].mxu0 %v9878_v48  ;;  %3036 = vmatmul.mubr.bf16.gmra.mrb[24].mxu1 %v9878_v48 }
 0x137   : > { %2593 = vmatprep.mubr.bf16.mxu0 %v10833_v17  ;;  %3045 = vmatprep.mubr.bf16.mxu1 %v10833_v17 }
 0x138   : > { %3573 = vmatpush1.bf16.msra.mxu0 %v9916_v49 }
 0x139   : > { %3574 = vmatprep.subr.bf16.mxu0 %v9921_v50 }
 0x13c   : > { %3575 = vmatpush1.bf16.msra.mxu0 %v9919_v51 }
 0x13d   : > { %3576 = vmatprep.subr.bf16.mxu0 %v9924_v53 }
 0x13e   : > { %2594 = vmatmul.mubr.bf16.gmra.mrb[28].mxu0 %v9879_v52  ;;  %3046 = vmatmul.mubr.bf16.gmra.mrb[28].mxu1 %v9879_v52 }
 0x13f   : > { %4124 = vmatprep.mubr.bf16.mxu1 %v10833_v17 }
 0x140   : > { %3577 = vmatpush1.bf16.msra.mxu0 %v9922_v54 }
 0x141   : > { %3578 = vmatprep.subr.bf16.mxu0 %v9927_v55  ;;  %v9982_v55 = vld [vmem:[%s13710_s6 + $0x40] ss:$16 sps:$4 sm:$0xff]  }
 0x142   : > { %4097 = vmatpush1.bf16.msra.mxu1 %v9982_v55 }
 0x143   : > { %4098 = vmatprep.subr.bf16.mxu1 %v9987_v62 }
 0x144   : > { %3579 = vmatpush1.bf16.msra.mxu0 %v9925_v56 }
 0x145   : > { %3661 = vmatprep.subr.bf16.mxu0 %v9930_v57 }
 0x1d9   : > { %v2525_v5 = vpop.f32.mrb[0].mxu0  ;;  %v2977_v6 = vpop.f32.mrb[0].mxu1 }
 0x1da   : > { %v8942_v7 = vadd.f32 %v2525_v5, %v11776_v1  ;;  %v8974_v8 = vadd.f32 %v2977_v6, %v11779_v2  ;;  %v2527_v9 = vpop.f32.mrb[1].mxu0  ;;  %v2979_v10 = vpop.f32.mrb[1].mxu1 }
 0x1db   : > { %v8943_v11 = vadd.f32 %v2527_v9, %v11782_v3  ;;  %v8975_v12 = vadd.f32 %v2979_v10, %v11785_v4  ;;  %v2529_v13 = vpop.f32.mrb[2].mxu0  ;;  %v2981_v14 = vpop.f32.mrb[2].mxu1  ;;  %v9936_v9 = vld [vmem:[%s13708_s4 + $0x124] ss:$8 sps:$4 sm:$0xff]  }
 0x1dc   : > { %v8944_v15 = vadd.f32 %v2529_v13, %v11776_v1  ;;  %v8976_v16 = vadd.f32 %v2981_v14, %v11779_v2  ;;  %v2531_v18 = vpop.f32.mrb[3].mxu0  ;;  %v2983_v19 = vpop.f32.mrb[3].mxu1  ;;  %v3056_v24 = vmax.f32 %v8942_v7, 0.0  ;;  %v3058_v25 = vmax.f32 %v8974_v8, 0.0 }
 0x1dd   : > { %v8945_v21 = vadd.f32 %v2531_v18, %v11782_v3  ;;  %v8977_v22 = vadd.f32 %v2983_v19, %v11785_v4  ;;  %v3057_v29 = vmax.f32 %v8943_v11, 0.0  ;;  %v3059_v30 = vmax.f32 %v8975_v12, 0.0 }
 0x1de   : > { %v3060_v26 = vmax.f32 %v8944_v15, 0.0  ;;  %v3062_v27 = vmax.f32 %v8976_v16, 0.0  ;;  %v9985_v16 = vld [vmem:[%s13710_s6 + $0x60] ss:$16 sps:$4 sm:$0xff]  }
 0x1df   : > { %v3061_v31 = vmax.f32 %v8945_v21, 0.0  ;;  %v3063_v32 = vmax.f32 %v8977_v22, 0.0  ;;  %v9934_v22 = vld [vmem:[%s13708_s4 + $0x120] ss:$8 sps:$4 sm:$0xff]   ;;  %4099 = vmatpush1.bf16.msra.mxu1 %v9985_v16 }
 0x1e0   : > { %v3120_v33 = vpack.c.bf16 %v3060_v26, %v3056_v24  ;;  %v11804_v34 = vpack.c.bf16 %v3062_v27, %v3058_v25  ;;  %4100 = vmatprep.subr.bf16.mxu1 %v9990_v23 }
 0x1e1   : > { %v3121_v36 = vpack.c.bf16 %v3061_v31, %v3057_v29  ;;  %v11809_v37 = vpack.c.bf16 %v3063_v32, %v3059_v30  ;;  %v2535_v38 = vpop.f32.mrb[4].mxu0  ;;  %v2987_v39 = vpop.f32.mrb[4].mxu1 }
 0x1e2   : > { %v8946_v42 = vadd.f32 %v2535_v38, %v11776_v1  ;;  %v8978_v43 = vadd.f32 %v2987_v39, %v11779_v2  ;;  %v2537_v44 = vpop.f32.mrb[5].mxu0  ;;  %v2989_v45 = vpop.f32.mrb[5].mxu1  ;;  %v9988_v39 = vld [vmem:[%s13710_s6 + $0x80] ss:$16 sps:$4 sm:$0xff]  }
 0x1e3   : > { %v8947_v47 = vadd.f32 %v2537_v44, %v11782_v3  ;;  %v8979_v48 = vadd.f32 %v2989_v45, %v11785_v4  ;;  %v2539_v49 = vpop.f32.mrb[6].mxu0  ;;  %v2991_v50 = vpop.f32.mrb[6].mxu1  ;;  %3580 = vmatprep.mubr.bf16.mxu0 %v3121_v36  ;;  %4101 = vmatpush1.bf16.msra.mxu1 %v9988_v39 }
 0x1e4   : > { %v8948_v51 = vadd.f32 %v2539_v49, %v11776_v1  ;;  %v8980_v52 = vadd.f32 %v2991_v50, %v11779_v2  ;;  %v2541_v53 = vpop.f32.mrb[7].mxu0  ;;  %v2993_v54 = vpop.f32.mrb[7].mxu1  ;;  %3581 = vmatmul.mubr.bf16.vlgmr.msra.gmra.mrb[32].mxu0 %v3120_v33  ;;  %v3064_v5 = vmax.f32 %v8946_v42, 0.0  ;;  %v3066_v6 = vmax.f32 %v8978_v43, 0.0  ;;  %v9937_v42 = vld [vmem:[%s13708_s4 + $0x130] ss:$8 sps:$4 sm:$0xff]  }
 0x1e5   : > { %v8949_v56 = vadd.f32 %v2541_v53, %v11782_v3  ;;  %v8981_v57 = vadd.f32 %v2993_v54, %v11785_v4  ;;  %3662 = vmatpush1.bf16.msra.mxu0 %v9928_v40  ;;  %v3065_v10 = vmax.f32 %v8947_v47, 0.0  ;;  %v3067_v11 = vmax.f32 %v8979_v48, 0.0  ;;  %v9942_v47 = vld [vmem:[%s13708_s4 + $0x144] ss:$8 sps:$4 sm:$0xff]  }
 0x1e6   : > { %v3068_v7 = vmax.f32 %v8948_v51, 0.0  ;;  %v3070_v8 = vmax.f32 %v8980_v52, 0.0  ;;  %3663 = vmatprep.subr.bf16.mxu0 %v9933_v46 }
 0x1e7   : > { %v3069_v12 = vmax.f32 %v8949_v56, 0.0  ;;  %v3071_v13 = vmax.f32 %v8981_v57, 0.0 }
 0x1e8   : > { %v3124_v14 = vpack.c.bf16 %v3068_v7, %v3064_v5  ;;  %v11840_v15 = vpack.c.bf16 %v3070_v8, %v3066_v6  ;;  %v9945_v8 = vld [vmem:[%s13708_s4 + $0x154] ss:$8 sps:$4 sm:$0xff]  }
 0x1e9   : > { %v3125_v18 = vpack.c.bf16 %v3069_v12, %v3065_v10  ;;  %v11845_v19 = vpack.c.bf16 %v3071_v13, %v3067_v11  ;;  %v2545_v20 = vpop.f32.mrb[8].mxu0  ;;  %v2997_v21 = vpop.f32.mrb[8].mxu1  ;;  %3664 = vmatpush1.bf16.msra.mxu0 %v9931_v58  ;;  %v9940_v58 = vld [vmem:[%s13708_s4 + $0x140] ss:$8 sps:$4 sm:$0xff]  }
 0x1ea   : > { %v8950_v24 = vadd.f32 %v2545_v20, %v11776_v1  ;;  %v8982_v25 = vadd.f32 %v2997_v21, %v11779_v2  ;;  %v2547_v26 = vpop.f32.mrb[9].mxu0  ;;  %v2999_v27 = vpop.f32.mrb[9].mxu1  ;;  %3665 = vmatprep.subr.bf16.mxu0 %v9936_v9 }
 0x1eb   : > { %v8951_v29 = vadd.f32 %v2547_v26, %v11782_v3  ;;  %v8983_v30 = vadd.f32 %v2999_v27, %v11785_v4  ;;  %v2549_v31 = vpop.f32.mrb[10].mxu0  ;;  %v3001_v32 = vpop.f32.mrb[10].mxu1  ;;  %3590 = vmatprep.mubr.bf16.mxu0 %v3125_v18  ;;  %v9948_v27 = vld [vmem:[%s13708_s4 + $0x164] ss:$8 sps:$4 sm:$0xff]  }
 0x1ec   : > { %v8952_v33 = vadd.f32 %v2549_v31, %v11776_v1  ;;  %v8984_v35 = vadd.f32 %v3001_v32, %v11779_v2  ;;  %v2551_v36 = vpop.f32.mrb[11].mxu0  ;;  %v3003_v38 = vpop.f32.mrb[11].mxu1  ;;  %3591 = vmatmul.mubr.bf16.gmra.mrb[36].mxu0 %v3124_v14  ;;  %v3072_v43 = vmax.f32 %v8950_v24, 0.0  ;;  %v3074_v44 = vmax.f32 %v8982_v25, 0.0 }
 0x1ed   : > { %v8953_v40 = vadd.f32 %v2551_v36, %v11782_v3  ;;  %v8985_v41 = vadd.f32 %v3003_v38, %v11785_v4  ;;  %3666 = vmatpush1.bf16.msra.mxu0 %v9934_v22  ;;  %v3073_v48 = vmax.f32 %v8951_v29, 0.0  ;;  %v3075_v49 = vmax.f32 %v8983_v30, 0.0  ;;  %v9943_v22 = vld [vmem:[%s13708_s4 + $0x150] ss:$8 sps:$4 sm:$0xff]  }
 0x1ee   : > { %v3076_v45 = vmax.f32 %v8952_v33, 0.0  ;;  %v3078_v46 = vmax.f32 %v8984_v35, 0.0  ;;  %3667 = vmatprep.subr.bf16.mxu0 %v9939_v28 }
 0x1ef   : > { %v3077_v50 = vmax.f32 %v8953_v40, 0.0  ;;  %v3079_v51 = vmax.f32 %v8985_v41, 0.0  ;;  %v9946_v40 = vld [vmem:[%s13708_s4 + $0x160] ss:$8 sps:$4 sm:$0xff]  }
 0x1f0   : > { %v3128_v52 = vpack.c.bf16 %v3076_v45, %v3072_v43  ;;  %v11873_v53 = vpack.c.bf16 %v3078_v46, %v3074_v44  ;;  %v9951_v45 = vld [vmem:[%s13708_s4 + $0x174] ss:$8 sps:$4 sm:$0xff]  }
 0x1f1   : > { %v3129_v54 = vpack.c.bf16 %v3077_v50, %v3073_v48  ;;  %v11875_v55 = vpack.c.bf16 %v3079_v51, %v3075_v49  ;;  %v2555_v56 = vpop.f32.mrb[12].mxu0  ;;  %v3007_v57 = vpop.f32.mrb[12].mxu1  ;;  %3668 = vmatpush1.bf16.msra.mxu0 %v9937_v42 }
 0x1f2   : > { %v8954_v62 = vadd.f32 %v2555_v56, %v11776_v1  ;;  %v8986_v5 = vadd.f32 %v3007_v57, %v11779_v2  ;;  %v2557_v6 = vpop.f32.mrb[13].mxu0  ;;  %v3009_v7 = vpop.f32.mrb[13].mxu1  ;;  %3669 = vmatprep.subr.bf16.mxu0 %v9942_v47 }
 0x1f3   : > { %v8955_v9 = vadd.f32 %v2557_v6, %v11782_v3  ;;  %v8987_v10 = vadd.f32 %v3009_v7, %v11785_v4  ;;  %v2559_v11 = vpop.f32.mrb[14].mxu0  ;;  %v3011_v12 = vpop.f32.mrb[14].mxu1  ;;  %3600 = vmatprep.mubr.bf16.mxu0 %v3129_v54 }
 0x1f4   : > { %v8956_v13 = vadd.f32 %v2559_v11, %v11776_v1  ;;  %v8988_v14 = vadd.f32 %v3011_v12, %v11779_v2  ;;  %v2561_v16 = vpop.f32.mrb[15].mxu0  ;;  %v3013_v18 = vpop.f32.mrb[15].mxu1  ;;  %3601 = vmatmul.mubr.bf16.gmra.mrb[40].mxu0 %v3128_v52  ;;  %v3080_v23 = vmax.f32 %v8954_v62, 0.0  ;;  %v3082_v24 = vmax.f32 %v8986_v5, 0.0 }
 0x1f5   : > { %v8957_v20 = vadd.f32 %v2561_v16, %v11782_v3  ;;  %v8989_v21 = vadd.f32 %v3013_v18, %v11785_v4  ;;  %3670 = vmatpush1.bf16.msra.mxu0 %v9940_v58  ;;  %v3081_v28 = vmax.f32 %v8955_v9, 0.0  ;;  %v3083_v29 = vmax.f32 %v8987_v10, 0.0  ;;  %v9949_v58 = vld [vmem:[%s13708_s4 + $0x170] ss:$8 sps:$4 sm:$0xff]  }
 0x1f6   : > { %v3084_v25 = vmax.f32 %v8956_v13, 0.0  ;;  %v3086_v26 = vmax.f32 %v8988_v14, 0.0  ;;  %3671 = vmatprep.subr.bf16.mxu0 %v9945_v8  ;;  %v9954_v8 = vld [vmem:[%s13708_s4 + $0x184] ss:$8 sps:$4 sm:$0xff]  }
 0x1f7   : > { %v3085_v30 = vmax.f32 %v8957_v20, 0.0  ;;  %v3087_v31 = vmax.f32 %v8989_v21, 0.0 }
 0x1f8   : > { %v3132_v32 = vpack.c.bf16 %v3084_v25, %v3080_v23  ;;  %v11897_v33 = vpack.c.bf16 %v3086_v26, %v3082_v24 }
 0x1f9   : > { %v3133_v35 = vpack.c.bf16 %v3085_v30, %v3081_v28  ;;  %v11899_v36 = vpack.c.bf16 %v3087_v31, %v3083_v29  ;;  %v2565_v38 = vpop.f32.mrb[16].mxu0  ;;  %v3017_v39 = vpop.f32.mrb[16].mxu1  ;;  %3672 = vmatpush1.bf16.msra.mxu0 %v9943_v22  ;;  %v9952_v22 = vld [vmem:[%s13708_s4 + $0x180] ss:$8 sps:$4 sm:$0xff]  }
 0x1fa   : > { %v8958_v41 = vadd.f32 %v2565_v38, %v11776_v1  ;;  %v8990_v42 = vadd.f32 %v3017_v39, %v11779_v2  ;;  %v2567_v43 = vpop.f32.mrb[17].mxu0  ;;  %v3019_v44 = vpop.f32.mrb[17].mxu1  ;;  %3673 = vmatprep.subr.bf16.mxu0 %v9948_v27  ;;  %v9957_v27 = vld [vmem:[%s13708_s4 + $0x194] ss:$8 sps:$4 sm:$0xff]  }
 0x1fb   : > { %v8959_v46 = vadd.f32 %v2567_v43, %v11782_v3  ;;  %v8991_v47 = vadd.f32 %v3019_v44, %v11785_v4  ;;  %v2569_v48 = vpop.f32.mrb[18].mxu0  ;;  %v3021_v49 = vpop.f32.mrb[18].mxu1  ;;  %3610 = vmatprep.mubr.bf16.mxu0 %v3133_v35 }
 0x1fc   : > { %v8960_v50 = vadd.f32 %v2569_v48, %v11776_v1  ;;  %v8992_v51 = vadd.f32 %v3021_v49, %v11779_v2  ;;  %v2571_v52 = vpop.f32.mrb[19].mxu0  ;;  %v3023_v54 = vpop.f32.mrb[19].mxu1  ;;  %3611 = vmatmul.mubr.bf16.gmra.mrb[44].mxu0 %v3132_v32  ;;  %v3088_v62 = vmax.f32 %v8958_v41, 0.0  ;;  %v3090_v5 = vmax.f32 %v8990_v42, 0.0  ;;  %v9955_v42 = vld [vmem:[%s13708_s4 + $0x190] ss:$8 sps:$4 sm:$0xff]  }
 0x1fd   : > { %v8961_v56 = vadd.f32 %v2571_v52, %v11782_v3  ;;  %v8993_v57 = vadd.f32 %v3023_v54, %v11785_v4  ;;  %3674 = vmatpush1.bf16.msra.mxu0 %v9946_v40  ;;  %v3089_v9 = vmax.f32 %v8959_v46, 0.0  ;;  %v3091_v10 = vmax.f32 %v8991_v47, 0.0  ;;  %v9960_v47 = vld [vmem:[%s13708_s4 + $0x1a4] ss:$8 sps:$4 sm:$0xff]  }
 0x1fe   : > { %v3092_v6 = vmax.f32 %v8960_v50, 0.0  ;;  %v3094_v7 = vmax.f32 %v8992_v51, 0.0  ;;  %3675 = vmatprep.subr.bf16.mxu0 %v9951_v45 }
 0x1ff   : > { %v3093_v11 = vmax.f32 %v8961_v56, 0.0  ;;  %v3095_v12 = vmax.f32 %v8993_v57, 0.0 }
 0x200   : > { %v3136_v13 = vpack.c.bf16 %v3092_v6, %v3088_v62  ;;  %v11921_v14 = vpack.c.bf16 %v3094_v7, %v3090_v5  ;;  %v9958_v5 = vld [vmem:[%s13708_s4 + $0x1a0] ss:$8 sps:$4 sm:$0xff]  }
 0x201   : > { %v3137_v16 = vpack.c.bf16 %v3093_v11, %v3089_v9  ;;  %v11923_v18 = vpack.c.bf16 %v3095_v12, %v3091_v10  ;;  %v2575_v20 = vpop.f32.mrb[20].mxu0  ;;  %v3027_v21 = vpop.f32.mrb[20].mxu1  ;;  %3676 = vmatpush1.bf16.msra.mxu0 %v9949_v58  ;;  %v9963_v10 = vld [vmem:[%s13708_s4 + $0x1b4] ss:$8 sps:$4 sm:$0xff]  }
 0x202   : > { %v8962_v23 = vadd.f32 %v2575_v20, %v11776_v1  ;;  %v8994_v24 = vadd.f32 %v3027_v21, %v11779_v2  ;;  %v2577_v25 = vpop.f32.mrb[21].mxu0  ;;  %v3029_v26 = vpop.f32.mrb[21].mxu1  ;;  %3677 = vmatprep.subr.bf16.mxu0 %v9954_v8 }
 0x203   : > { %v8963_v28 = vadd.f32 %v2577_v25, %v11782_v3  ;;  %v8995_v29 = vadd.f32 %v3029_v26, %v11785_v4  ;;  %v2579_v30 = vpop.f32.mrb[22].mxu0  ;;  %v3031_v31 = vpop.f32.mrb[22].mxu1  ;;  %3620 = vmatprep.mubr.bf16.mxu0 %v3137_v16  ;;  %v9961_v26 = vld [vmem:[%s13708_s4 + $0x1b0] ss:$8 sps:$4 sm:$0xff]  }
 0x204   : > { %v8964_v32 = vadd.f32 %v2579_v30, %v11776_v1  ;;  %v8996_v35 = vadd.f32 %v3031_v31, %v11779_v2  ;;  %v2581_v38 = vpop.f32.mrb[23].mxu0  ;;  %v3033_v39 = vpop.f32.mrb[23].mxu1  ;;  %3621 = vmatmul.mubr.bf16.gmra.mrb[48].mxu0 %v3136_v13  ;;  %v3096_v43 = vmax.f32 %v8962_v23, 0.0  ;;  %v3098_v44 = vmax.f32 %v8994_v24, 0.0  ;;  %v9966_v31 = vld [vmem:[%s13708_s4 + $0x1c4] ss:$8 sps:$4 sm:$0xff]  }
 0x205   : > { %v8965_v40 = vadd.f32 %v2581_v38, %v11782_v3  ;;  %v8997_v41 = vadd.f32 %v3033_v39, %v11785_v4  ;;  %3678 = vmatpush1.bf16.msra.mxu0 %v9952_v22  ;;  %v3097_v48 = vmax.f32 %v8963_v28, 0.0  ;;  %v3099_v49 = vmax.f32 %v8995_v29, 0.0 }
 0x206   : > { %v3100_v45 = vmax.f32 %v8964_v32, 0.0  ;;  %v3102_v46 = vmax.f32 %v8996_v35, 0.0  ;;  %3679 = vmatprep.subr.bf16.mxu0 %v9957_v27 }
 0x207   : > { %v3101_v50 = vmax.f32 %v8965_v40, 0.0  ;;  %v3103_v51 = vmax.f32 %v8997_v41, 0.0 }
 0x208   : > { %v3140_v52 = vpack.c.bf16 %v3100_v45, %v3096_v43  ;;  %v11945_v54 = vpack.c.bf16 %v3102_v46, %v3098_v44  ;;  %v9964_v46 = vld [vmem:[%s13708_s4 + $0x1c0] ss:$8 sps:$4 sm:$0xff]  }
 0x209   : > { %v3141_v56 = vpack.c.bf16 %v3101_v50, %v3097_v48  ;;  %v11947_v57 = vpack.c.bf16 %v3103_v51, %v3099_v49  ;;  %v2585_v58 = vpop.f32.mrb[24].mxu0  ;;  %v3037_v62 = vpop.f32.mrb[24].mxu1  ;;  %3680 = vmatpush1.bf16.msra.mxu0 %v9955_v42  ;;  %v9969_v51 = vld [vmem:[%s13708_s4 + $0x1d4] ss:$8 sps:$4 sm:$0xff]  }
 0x20a   : > { %v8966_v6 = vadd.f32 %v2585_v58, %v11776_v1  ;;  %v8998_v7 = vadd.f32 %v3037_v62, %v11779_v2  ;;  %v2587_v8 = vpop.f32.mrb[25].mxu0  ;;  %v3039_v9 = vpop.f32.mrb[25].mxu1  ;;  %3681 = vmatprep.subr.bf16.mxu0 %v9960_v47 }
 0x20b   : > { %v8967_v11 = vadd.f32 %v2587_v8, %v11782_v3  ;;  %v8999_v12 = vadd.f32 %v3039_v9, %v11785_v4  ;;  %v2589_v13 = vpop.f32.mrb[26].mxu0  ;;  %v3041_v16 = vpop.f32.mrb[26].mxu1  ;;  %3630 = vmatprep.mubr.bf16.mxu0 %v3141_v56 }
 0x20c   : > { %v8968_v20 = vadd.f32 %v2589_v13, %v11776_v1  ;;  %v9000_v21 = vadd.f32 %v3041_v16, %v11779_v2  ;;  %v2591_v22 = vpop.f32.mrb[27].mxu0  ;;  %v3043_v23 = vpop.f32.mrb[27].mxu1  ;;  %3631 = vmatmul.mubr.bf16.gmra.mrb[52].mxu0 %v3140_v52  ;;  %v3104_v27 = vmax.f32 %v8966_v6, 0.0  ;;  %v3106_v28 = vmax.f32 %v8998_v7, 0.0 }
 0x20d   : > { %v8969_v24 = vadd.f32 %v2591_v22, %v11782_v3  ;;  %v9001_v25 = vadd.f32 %v3043_v23, %v11785_v4  ;;  %3682 = vmatpush1.bf16.msra.mxu0 %v9958_v5  ;;  %v3105_v32 = vmax.f32 %v8967_v11, 0.0  ;;  %v3107_v35 = vmax.f32 %v8999_v12, 0.0  ;;  %v9967_v11 = vld [vmem:[%s13708_s4 + $0x1d0] ss:$8 sps:$4 sm:$0xff]  }
 0x20e   : > { %v3108_v29 = vmax.f32 %v8968_v20, 0.0  ;;  %v3110_v30 = vmax.f32 %v9000_v21, 0.0  ;;  %3683 = vmatprep.subr.bf16.mxu0 %v9963_v10 }
 0x20f   : > { %v3109_v38 = vmax.f32 %v8969_v24, 0.0  ;;  %v3111_v39 = vmax.f32 %v9001_v25, 0.0 }
 0x210   : > { %v3144_v40 = vpack.c.bf16 %v3108_v29, %v3104_v27  ;;  %v11969_v41 = vpack.c.bf16 %v3110_v30, %v3106_v28  ;;  %v9975_v27 = vld [vmem:[%s13708_s4 + $0x1f4] ss:$8 sps:$4 sm:$0xff]   ;;  %v9973_v28 = vld [vmem:[%s13708_s4 + $0x1f0] ss:$8 sps:$4 sm:$0xff]  }
 0x211   : > { %v3145_v42 = vpack.c.bf16 %v3109_v38, %v3105_v32  ;;  %v3147_v43 = vpack.c.bf16 %v3111_v39, %v3107_v35  ;;  %v2595_v44 = vpop.f32.mrb[28].mxu0  ;;  %v3047_v45 = vpop.f32.mrb[28].mxu1  ;;  %3684 = vmatpush1.bf16.msra.mxu0 %v9961_v26  ;;  %v9970_v26 = vld [vmem:[%s13708_s4 + $0x1e0] ss:$8 sps:$4 sm:$0xff]  }
 0x212   : > { %v8970_v47 = vadd.f32 %v2595_v44, %v11776_v1  ;;  %v9002_v48 = vadd.f32 %v3047_v45, %v11779_v2  ;;  %v2597_v49 = vpop.f32.mrb[29].mxu0  ;;  %v3049_v50 = vpop.f32.mrb[29].mxu1  ;;  %3685 = vmatprep.subr.bf16.mxu0 %v9966_v31 }
 0x213   : > { %v8971_v52 = vadd.f32 %v2597_v49, %v11782_v3  ;;  %v9003_v56 = vadd.f32 %v3049_v50, %v11785_v4  ;;  %v2599_v58 = vpop.f32.mrb[30].mxu0  ;;  %v3051_v62 = vpop.f32.mrb[30].mxu1  ;;  %3640 = vmatprep.mubr.bf16.mxu0 %v3145_v42 }
 0x214   : > { %v8972_v5 = vadd.f32 %v2599_v58, %v11776_v1  ;;  %v9004_v6 = vadd.f32 %v3051_v62, %v11779_v2  ;;  %v2601_v7 = vpop.f32.mrb[31].mxu0  ;;  %v3053_v8 = vpop.f32.mrb[31].mxu1  ;;  %3641 = vmatmul.mubr.bf16.gmra.mrb[56].mxu0 %v3144_v40  ;;  %v3112_v12 = vmax.f32 %v8970_v47, 0.0  ;;  %v3114_v13 = vmax.f32 %v9002_v48, 0.0  ;;  %v9972_v1 = vld [vmem:[%s13708_s4 + $0x1e4] ss:$8 sps:$4 sm:$0xff]  }
 0x215   : > { %v8973_v9 = vadd.f32 %v2601_v7, %v11782_v3  ;;  %v9005_v10 = vadd.f32 %v3053_v8, %v11785_v4  ;;  %3686 = vmatpush1.bf16.msra.mxu0 %v9964_v46  ;;  %v3113_v2 = vmax.f32 %v8971_v52, 0.0  ;;  %v3115_v21 = vmax.f32 %v9003_v56, 0.0  ;;  %v3822_v58 = vld [vmem:[%s12072_s26] sm:$0xff] }
 0x216   : > { %v3116_v16 = vmax.f32 %v8972_v5, 0.0  ;;  %v3118_v20 = vmax.f32 %v9004_v6, 0.0  ;;  %3687 = vmatprep.subr.bf16.mxu0 %v9969_v51 }
 0x217   : > { %v3117_v22 = vmax.f32 %v8973_v9, 0.0  ;;  %v3119_v3 = vmax.f32 %v9005_v10, 0.0  ;;  %v3823_v9 = vld [vmem:[%s12072_s26 + $0x8] sm:$0xff] }
 0x218   : > { %v3148_v23 = vpack.c.bf16 %v3116_v16, %v3112_v12  ;;  %v3150_v4 = vpack.c.bf16 %v3118_v20, %v3114_v13  ;;  %v10024_v20 = vld [vmem:[%s13712_s8] ss:$28 sps:$4 sm:$0xff]  }
 0x219   : > { %v3149_v24 = vpack.c.bf16 %v3117_v22, %v3113_v2  ;;  %v3151_v25 = vpack.c.bf16 %v3119_v3, %v3115_v21  ;;  %3688 = vmatpush1.bf16.msra.mxu0 %v9967_v11 }
 0x21a   : > { %3689 = vmatprep.subr.bf16.mxu0 %v9972_v1  ;;  %v10026_v1 = vld [vmem:[%s13712_s8 + $0x4] ss:$28 sps:$4 sm:$0xff]  }
 0x21b   : > { %3650 = vmatprep.mubr.bf16.mxu0 %v3149_v24 }
 0x21c   : > { %3651 = vmatmul.mubr.bf16.gmra.mrb[60].mxu0 %v3148_v23 }
 0x21d   : > { %3690 = vmatpush1.bf16.msra.mxu0 %v9970_v26  ;;  %3693 = vmatprep.mubr.bf16.mxu0 %v11809_v37  ;;  %v9991_v37 = vld [vmem:[%s13710_s6 + $0xa0] ss:$16 sps:$4 sm:$0xff]   ;;  %v10030_v26 = vld [vmem:[%s13712_s8 + $0x38] ss:$28 sps:$4 sm:$0xff]  }
 0x21e   : > { %3691 = vmatprep.subr.bf16.mxu0 %v9975_v27 }
 0x221   : > { %3692 = vmatpush1.bf16.msra.mxu0 %v9973_v28  ;;  %v10038_v28 = vld [vmem:[%s13712_s8 + $0x74] ss:$28 sps:$4 sm:$0xff]  }
 0x222   : > { %5859 = vmatprep.subr.bf16.mxu0 %v10026_v1 }
 0x224   : > { %3694 = vmatmul.mubr.bf16.vlgmr.msra.gmra.mrb[32].mxu0 %v11804_v34  ;;  %v9993_v34 = vld [vmem:[%s13710_s6 + $0xa4] ss:$16 sps:$4 sm:$0xff]  }
 0x225   : > { %3703 = vmatprep.mubr.bf16.mxu0 %v11845_v19  ;;  %4102 = vmatprep.subr.bf16.mxu1 %v9993_v34  ;;  %v9994_v19 = vld [vmem:[%s13710_s6 + $0xc0] ss:$16 sps:$4 sm:$0xff]  }
 0x226   : > { %4103 = vmatpush1.bf16.msra.mxu1 %v9991_v37  ;;  %5860 = vmatpush1.bf16.msra.mxu0 %v10024_v20  ;;  %v10048_v20 = vld [vmem:[%s13712_s8 + $0xe0] ss:$28 sps:$4 sm:$0xff]  }
 0x22c   : > { %3704 = vmatmul.mubr.bf16.gmra.mrb[36].mxu0 %v11840_v15  ;;  %v9996_v15 = vld [vmem:[%s13710_s6 + $0xc4] ss:$16 sps:$4 sm:$0xff]  }
 0x22d   : > { %3713 = vmatprep.mubr.bf16.mxu0 %v11875_v55  ;;  %4104 = vmatprep.subr.bf16.mxu1 %v9996_v15  ;;  %v9997_v55 = vld [vmem:[%s13710_s6 + $0xe0] ss:$16 sps:$4 sm:$0xff]   ;;  %v10000_v15 = vld [vmem:[%s13710_s6 + $0x8] ss:$16 sps:$4 sm:$0xff]  }
 0x22e   : > { %4105 = vmatpush1.bf16.msra.mxu1 %v9994_v19  ;;  %v3824_v19 = vld [vmem:[%s12072_s26 + $0x10] sm:$0xff] }
 0x234   : > { %3714 = vmatmul.mubr.bf16.gmra.mrb[40].mxu0 %v11873_v53  ;;  %v9999_v53 = vld [vmem:[%s13710_s6 + $0xe4] ss:$16 sps:$4 sm:$0xff]  }
 0x235   : > { %3723 = vmatprep.mubr.bf16.mxu0 %v11899_v36  ;;  %4106 = vmatprep.subr.bf16.mxu1 %v9999_v53  ;;  %v3216_v36 = vld [vmem:[%s13709_s5] sm:$0x3] }
 0x236   : > { %4107 = vmatpush1.bf16.msra.mxu1 %v9997_v55 }
 0x23c   : > { %3724 = vmatmul.mubr.bf16.gmra.mrb[44].mxu0 %v11897_v33  ;;  %v10002_v33 = vld [vmem:[%s13710_s6 + $0xc] ss:$16 sps:$4 sm:$0xff]  }
 0x23d   : > { %3733 = vmatprep.mubr.bf16.mxu0 %v11923_v18  ;;  %4205 = vmatprep.subr.bf16.mxu1 %v10002_v33  ;;  %v12042_v18 = vrot.slane %v3216_v36, %v11770_v63 }
 0x244   : > { %3734 = vmatmul.mubr.bf16.gmra.mrb[48].mxu0 %v11921_v14  ;;  %v12039_v14 = vrot.slane %v3216_v36, %v11761_v60  ;;  %v10005_v36 = vld [vmem:[%s13710_s6 + $0x2c] ss:$16 sps:$4 sm:$0xff]  }
 0x245   : > { %3743 = vmatprep.mubr.bf16.mxu0 %v11947_v57 }
 0x24c   : > { %3744 = vmatmul.mubr.bf16.gmra.mrb[52].mxu0 %v11945_v54 }
 0x24d   : > { %3753 = vmatprep.mubr.bf16.mxu0 %v3147_v43 }
 0x254   : > { %3754 = vmatmul.mubr.bf16.gmra.mrb[56].mxu0 %v11969_v41 }
 0x255   : > { %3763 = vmatprep.mubr.bf16.mxu0 %v3151_v25 }
 0x25c   : > { %3764 = vmatmul.mubr.bf16.gmra.mrb[60].mxu0 %v3150_v4  ;;  %v10032_v4 = vld [vmem:[%s13712_s8 + $0x3c] ss:$28 sps:$4 sm:$0xff]  }
 0x25d   : > { %5861 = vmatprep.subr.bf16.mxu0 %v10032_v4 }
 0x25e   : > { %5862 = vmatpush1.bf16.msra.mxu0 %v10030_v26 }
 0x25f   : > { %5863 = vmatprep.subr.bf16.mxu0 %v10038_v28 }
 0x2f7   : > { %v3695_v54 = vpop.f32.mrb[32].mxu0 }
 0x2f8   : > { %v9006_v57 = vadd.f32 %v3695_v54, %v12039_v14  ;;  %v3697_v29 = vpop.f32.mrb[33].mxu0 }
 0x2f9   : > { %v9007_v30 = vadd.f32 %v3697_v29, %v12042_v18  ;;  %v3699_v31 = vpop.f32.mrb[34].mxu0 }
 0x2fa   : > { %7819 = vst [vmem:[%s12047_s22] sm:$0xff] %v9006_v57  ;;  %v9008_v32 = vadd.f32 %v3699_v31, %v12039_v14  ;;  %v3701_v35 = vpop.f32.mrb[35].mxu0  ;;  %v10036_v31 = vld [vmem:[%s13712_s8 + $0x70] ss:$28 sps:$4 sm:$0xff]  }
 0x2fb   : > { %v3774_v38 = vmul.f32 0.5, %v9007_v30  ;;  %7820 = vst [vmem:[%s12047_s22 + $0x8] sm:$0xff] %v9007_v30  ;;  %v9009_v39 = vadd.f32 %v3701_v35, %v12042_v18  ;;  %v3825_v30 = vld [vmem:[%s12072_s26 + $0x18] sm:$0xff]  ;;  %5864 = vmatpush1.bf16.msra.mxu0 %v10036_v31 }
 0x2fc   : > { %7821 = vst [vmem:[%s12047_s22 + $0x10] sm:$0xff] %v9008_v32 }
 0x2fd   : > { %v3790_v40 = vmul.f32 1.442695, %v3774_v38  ;;  %v3775_v41 = vmul.f32 0.5, %v9009_v39  ;;  %7822 = vst [vmem:[%s12047_s22 + $0x18] sm:$0xff] %v9009_v39  ;;  %v10044_v39 = vld [vmem:[%s13712_s8 + $0xac] ss:$28 sps:$4 sm:$0xff]  }
 0x2fe   : > { %5865 = vmatprep.subr.bf16.mxu0 %v10044_v39  ;;  %v3829_v39 = vld [vmem:[%s12072_s26 + $0x38] sm:$0xff] }
 0x2ff   : > { %10344 = vpow2.f32 %v3790_v40  ;;  %v3792_v42 = vmul.f32 1.442695, %v3775_v41  ;;  %v3705_v43 = vpop.f32.mrb[36].mxu0 }
 0x300   : > { %v12058_v44 = vadd.f32 %v3705_v43, %v12039_v14  ;;  %v3707_v45 = vpop.f32.mrb[37].mxu0  ;;  %v10003_v43 = vld [vmem:[%s13710_s6 + $0x28] ss:$16 sps:$4 sm:$0xff]  }
 0x301   : > { %10346 = vpow2.f32 %v3792_v42  ;;  %v9011_v46 = vadd.f32 %v3707_v45, %v12042_v18  ;;  %v3709_v47 = vpop.f32.mrb[38].mxu0 }
 0x302   : > { %7823 = vst [vmem:[%s12047_s22 + $0x20] sm:$0xff] %v12058_v44  ;;  %v12065_v48 = vadd.f32 %v3709_v47, %v12039_v14  ;;  %v3711_v49 = vpop.f32.mrb[39].mxu0  ;;  %v10008_v47 = vld [vmem:[%s13710_s6 + $0x4c] ss:$16 sps:$4 sm:$0xff]  }
 0x303   : > { %v3776_v50 = vmul.f32 0.5, %v9011_v46  ;;  %7824 = vst [vmem:[%s12047_s22 + $0x28] sm:$0xff] %v9011_v46  ;;  %v9013_v51 = vadd.f32 %v3711_v49, %v12042_v18 }
 0x304   : > { %7825 = vst [vmem:[%s12047_s22 + $0x30] sm:$0xff] %v12065_v48 }
 0x305   : > { %v3794_v52 = vmul.f32 1.442695, %v3776_v50  ;;  %v3777_v56 = vmul.f32 0.5, %v9013_v51  ;;  %7826 = vst [vmem:[%s12047_s22 + $0x38] sm:$0xff] %v9013_v51  ;;  %v10042_v51 = vld [vmem:[%s13712_s8 + $0xa8] ss:$28 sps:$4 sm:$0xff]  }
 0x306   : > { %5866 = vmatpush1.bf16.msra.mxu0 %v10042_v51 }
 0x307   : > { %10348 = vpow2.f32 %v3794_v52  ;;  %v3796_v62 = vmul.f32 1.442695, %v3777_v56  ;;  %v3715_v5 = vpop.f32.mrb[40].mxu0 }
 0x308   : > { %v12079_v6 = vadd.f32 %v3715_v5, %v12039_v14  ;;  %v3717_v7 = vpop.f32.mrb[41].mxu0  ;;  %v10006_v5 = vld [vmem:[%s13710_s6 + $0x48] ss:$16 sps:$4 sm:$0xff]  }
 0x309   : > { %v10345_v8 = vpop.eup %10344  ;;  %10350 = vpow2.f32 %v3796_v62  ;;  %v9015_v10 = vadd.f32 %v3717_v7, %v12042_v18  ;;  %v3719_v11 = vpop.f32.mrb[42].mxu0  ;;  %v3826_v62 = vld [vmem:[%s12072_s26 + $0x20] sm:$0xff] }
 0x30a   : > { %v3838_v12 = vmul.f32 %v10345_v8, %v3822_v58  ;;  %7827 = vst [vmem:[%s12047_s22 + $0x40] sm:$0xff] %v12079_v6  ;;  %v12086_v13 = vadd.f32 %v3719_v11, %v12039_v14  ;;  %v3721_v16 = vpop.f32.mrb[43].mxu0 }
 0x30b   : > { %v10347_v2 = vpop.eup %10346  ;;  %v3778_v21 = vmul.f32 0.5, %v9015_v10  ;;  %7828 = vst [vmem:[%s12047_s22 + $0x48] sm:$0xff] %v9015_v10  ;;  %v9017_v22 = vadd.f32 %v3721_v16, %v12042_v18  ;;  %v3827_v16 = vld [vmem:[%s12072_s26 + $0x28] sm:$0xff] }
 0x30c   : > { %v3839_v3 = vmul.f32 %v10347_v2, %v3823_v9  ;;  %7829 = vst [vmem:[%s12047_s22 + $0x50] sm:$0xff] %v12086_v13  ;;  %v3854_v23 = vadd.f32 %v9006_v57, %v3838_v12  ;;  %v10011_v9 = vld [vmem:[%s13710_s6 + $0x6c] ss:$16 sps:$4 sm:$0xff]  }
 0x30d   : > { %v3798_v24 = vmul.f32 1.442695, %v3778_v21  ;;  %v3779_v25 = vmul.f32 0.5, %v9017_v22  ;;  %7830 = vst [vmem:[%s12047_s22 + $0x58] sm:$0xff] %v9017_v22  ;;  %v10056_v22 = vld [vmem:[%s13712_s8 + $0x11c] ss:$28 sps:$4 sm:$0xff]  }
 0x30e   : > { %v3855_v27 = vadd.f32 %v9008_v32, %v3839_v3 }
 0x30f   : > { %10352 = vpow2.f32 %v3798_v24  ;;  %v3800_v34 = vmul.f32 1.442695, %v3779_v25  ;;  %v3725_v37 = vpop.f32.mrb[44].mxu0  ;;  %v10009_v24 = vld [vmem:[%s13710_s6 + $0x68] ss:$16 sps:$4 sm:$0xff]  }
 0x310   : > { %v12113_v53 = vadd.f32 %v3725_v37, %v12039_v14  ;;  %v3727_v55 = vpop.f32.mrb[45].mxu0  ;;  %v12115_v33 = vpack.c.bf16 %v3855_v27, %v3854_v23  ;;  %v10014_v27 = vld [vmem:[%s13710_s6 + $0x8c] ss:$16 sps:$4 sm:$0xff]   ;;  %v10054_v37 = vld [vmem:[%s13712_s8 + $0x118] ss:$28 sps:$4 sm:$0xff]  }
 0x311   : > { %v10349_v54 = vpop.eup %10348  ;;  %10354 = vpow2.f32 %v3800_v34  ;;  %v9019_v57 = vadd.f32 %v3727_v55, %v12042_v18  ;;  %v3729_v29 = vpop.f32.mrb[46].mxu0 }
 0x312   : > { %7831 = vst [vmem:[%s12047_s22 + $0x60] sm:$0xff] %v12113_v53  ;;  %v12128_v32 = vadd.f32 %v3729_v29, %v12039_v14  ;;  %v3731_v35 = vpop.f32.mrb[47].mxu0  ;;  %4125 = vmatmul.mubr.bf16.vlgmr.msra.gmra.mrb[32].mxu1 %v12115_v33  ;;  %v3840_v38 = vmul.f32 %v10349_v54, %v3824_v19  ;;  %v10012_v54 = vld [vmem:[%s13710_s6 + $0x88] ss:$16 sps:$4 sm:$0xff]  }
 0x313   : > { %v10351_v40 = vpop.eup %10350  ;;  %v3780_v41 = vmul.f32 0.5, %v9019_v57  ;;  %7832 = vst [vmem:[%s12047_s22 + $0x68] sm:$0xff] %v9019_v57  ;;  %v9021_v42 = vadd.f32 %v3731_v35, %v12042_v18  ;;  %4206 = vmatpush1.bf16.msra.mxu1 %v10000_v15  ;;  %4134 = vmatprep.mubr.bf16.mxu1 %v10833_v17 }
 0x314   : > { %7833 = vst [vmem:[%s12047_s22 + $0x70] sm:$0xff] %v12128_v32  ;;  %v3841_v45 = vmul.f32 %v10351_v40, %v3825_v30  ;;  %v3856_v46 = vadd.f32 %v12058_v44, %v3840_v38  ;;  %4207 = vmatprep.subr.bf16.mxu1 %v10005_v36  ;;  %v10050_v44 = vld [vmem:[%s13712_s8 + $0xe4] ss:$28 sps:$4 sm:$0xff]   ;;  %v3828_v36 = vld [vmem:[%s12072_s26 + $0x30] sm:$0xff]  ;;  %v10017_v30 = vld [vmem:[%s13710_s6 + $0xac] ss:$16 sps:$4 sm:$0xff]  }
 0x315   : > { %v3802_v49 = vmul.f32 1.442695, %v3780_v41  ;;  %v3781_v50 = vmul.f32 0.5, %v9021_v42  ;;  %7834 = vst [vmem:[%s12047_s22 + $0x78] sm:$0xff] %v9021_v42  ;;  %5867 = vmatprep.subr.bf16.mxu0 %v10050_v44  ;;  %v10060_v40 = vld [vmem:[%s13712_s8 + $0x150] ss:$28 sps:$4 sm:$0xff]  }
 0x316   : > { %v3857_v52 = vadd.f32 %v12065_v48, %v3841_v45  ;;  %5868 = vmatpush1.bf16.msra.mxu0 %v10048_v20  ;;  %v10068_v45 = vld [vmem:[%s13712_s8 + $0x18c] ss:$28 sps:$4 sm:$0xff]  }
 0x317   : > { %10356 = vpow2.f32 %v3802_v49  ;;  %v3804_v56 = vmul.f32 1.442695, %v3781_v50  ;;  %v3735_v58 = vpop.f32.mrb[48].mxu0  ;;  %4208 = vmatpush1.bf16.msra.mxu1 %v10003_v43  ;;  %5869 = vmatprep.subr.bf16.mxu0 %v10056_v22  ;;  %v10015_v50 = vld [vmem:[%s13710_s6 + $0xa8] ss:$16 sps:$4 sm:$0xff]  }
 0x318   : > { %v12159_v7 = vadd.f32 %v3735_v58, %v12039_v14  ;;  %v3737_v48 = vpop.f32.mrb[49].mxu0  ;;  %v12161_v8 = vpack.c.bf16 %v3857_v52, %v3856_v46  ;;  %4209 = vmatprep.subr.bf16.mxu1 %v10008_v47  ;;  %v10020_v44 = vld [vmem:[%s13710_s6 + $0xcc] ss:$16 sps:$4 sm:$0xff]  }
 0x319   : > { %v10353_v10 = vpop.eup %10352  ;;  %10358 = vpow2.f32 %v3804_v56  ;;  %v9023_v11 = vadd.f32 %v3737_v48, %v12042_v18  ;;  %v3739_v12 = vpop.f32.mrb[50].mxu0  ;;  %v10023_v20 = vld [vmem:[%s13710_s6 + $0xec] ss:$16 sps:$4 sm:$0xff]  }
 0x31a   : > { %7835 = vst [vmem:[%s12047_s22 + $0x80] sm:$0xff] %v12159_v7  ;;  %v12174_v1 = vadd.f32 %v3739_v12, %v12039_v14  ;;  %v3741_v2 = vpop.f32.mrb[51].mxu0  ;;  %4135 = vmatmul.mubr.bf16.gmra.mrb[36].mxu1 %v12161_v8  ;;  %v3842_v21 = vmul.f32 %v10353_v10, %v3826_v62  ;;  %5870 = vmatpush1.bf16.msra.mxu0 %v10054_v37  ;;  %v10066_v62 = vld [vmem:[%s13712_s8 + $0x188] ss:$28 sps:$4 sm:$0xff]  }
 0x31b   : > { %v10355_v3 = vpop.eup %10354  ;;  %v3782_v23 = vmul.f32 0.5, %v9023_v11  ;;  %7836 = vst [vmem:[%s12047_s22 + $0x88] sm:$0xff] %v9023_v11  ;;  %v9025_v4 = vadd.f32 %v3741_v2, %v12042_v18  ;;  %4144 = vmatprep.mubr.bf16.mxu1 %v10833_v17  ;;  %4210 = vmatpush1.bf16.msra.mxu1 %v10006_v5  ;;  %v3830_v10 = vld [vmem:[%s12072_s26 + $0x40] sm:$0xff]  ;;  %v10018_v11 = vld [vmem:[%s13710_s6 + $0xc8] ss:$16 sps:$4 sm:$0xff]  }
 0x31c   : > { %7837 = vst [vmem:[%s12047_s22 + $0x90] sm:$0xff] %v12174_v1  ;;  %v3843_v25 = vmul.f32 %v10355_v3, %v3827_v16  ;;  %v3858_v26 = vadd.f32 %v12079_v6, %v3842_v21  ;;  %4211 = vmatprep.subr.bf16.mxu1 %v10011_v9  ;;  %v10062_v6 = vld [vmem:[%s13712_s8 + $0x154] ss:$28 sps:$4 sm:$0xff]   ;;  %v3831_v3 = vld [vmem:[%s12072_s26 + $0x48] sm:$0xff] }
 0x31d   : > { %v3806_v28 = vmul.f32 1.442695, %v3782_v23  ;;  %v3783_v34 = vmul.f32 0.5, %v9025_v4  ;;  %7838 = vst [vmem:[%s12047_s22 + $0x98] sm:$0xff] %v9025_v4  ;;  %5871 = vmatprep.subr.bf16.mxu0 %v10062_v6  ;;  %v10072_v23 = vld [vmem:[%s13712_s8 + $0x1c0] ss:$28 sps:$4 sm:$0xff]  }
 0x31e   : > { %v3859_v15 = vadd.f32 %v12086_v13, %v3843_v25  ;;  %5872 = vmatpush1.bf16.msra.mxu0 %v10060_v40  ;;  %v10021_v37 = vld [vmem:[%s13710_s6 + $0xe8] ss:$16 sps:$4 sm:$0xff]  }
 0x31f   : > { %10360 = vpow2.f32 %v3806_v28  ;;  %v3808_v19 = vmul.f32 1.442695, %v3783_v34  ;;  %v3745_v55 = vpop.f32.mrb[52].mxu0  ;;  %4212 = vmatpush1.bf16.msra.mxu1 %v10009_v24  ;;  %5873 = vmatprep.subr.bf16.mxu0 %v10068_v45  ;;  %v3833_v45 = vld [vmem:[%s12072_s26 + $0x58] sm:$0xff] }
 0x320   : > { %v12205_v57 = vadd.f32 %v3745_v55, %v12039_v14  ;;  %v3747_v13 = vpop.f32.mrb[53].mxu0  ;;  %v12207_v29 = vpack.c.bf16 %v3859_v15, %v3858_v26  ;;  %4213 = vmatprep.subr.bf16.mxu1 %v10014_v27  ;;  %v10080_v26 = vld [vmem:[%s13712_s8 + $0x1fc] ss:$28 sps:$4 sm:$0xff]  }
 0x321   : > { %v10357_v31 = vpop.eup %10356  ;;  %10362 = vpow2.f32 %v3808_v19  ;;  %v9027_v35 = vadd.f32 %v3747_v13, %v12042_v18  ;;  %v3749_v38 = vpop.f32.mrb[54].mxu0  ;;  %v10029_v19 = vld [vmem:[%s13712_s8 + $0xc] ss:$28 sps:$4 sm:$0xff]  }
 0x322   : > { %7839 = vst [vmem:[%s12047_s22 + $0xa0] sm:$0xff] %v12205_v57  ;;  %v12220_v41 = vadd.f32 %v3749_v38, %v12039_v14  ;;  %v3751_v42 = vpop.f32.mrb[55].mxu0  ;;  %4145 = vmatmul.mubr.bf16.gmra.mrb[40].mxu1 %v12207_v29  ;;  %v3844_v43 = vmul.f32 %v10357_v31, %v3828_v36  ;;  %5874 = vmatpush1.bf16.msra.mxu0 %v10066_v62 }
 0x323   : > { %v10359_v46 = vpop.eup %10358  ;;  %v3784_v47 = vmul.f32 0.5, %v9027_v35  ;;  %7840 = vst [vmem:[%s12047_s22 + $0xa8] sm:$0xff] %v9027_v35  ;;  %v9029_v49 = vadd.f32 %v3751_v42, %v12042_v18  ;;  %4154 = vmatprep.mubr.bf16.mxu1 %v10833_v17  ;;  %4214 = vmatpush1.bf16.msra.mxu1 %v10012_v54  ;;  %v10078_v54 = vld [vmem:[%s13712_s8 + $0x1f8] ss:$28 sps:$4 sm:$0xff]  }
 0x324   : > { %7841 = vst [vmem:[%s12047_s22 + $0xb0] sm:$0xff] %v12220_v41  ;;  %v3845_v51 = vmul.f32 %v10359_v46, %v3829_v39  ;;  %v3860_v52 = vadd.f32 %v12113_v53, %v3844_v43  ;;  %4215 = vmatprep.subr.bf16.mxu1 %v10017_v30  ;;  %v10074_v53 = vld [vmem:[%s13712_s8 + $0x1c4] ss:$28 sps:$4 sm:$0xff]   ;;  %v3832_v35 = vld [vmem:[%s12072_s26 + $0x50] sm:$0xff] }
 0x325   : > { %v3810_v56 = vmul.f32 1.442695, %v3784_v47  ;;  %v3785_v58 = vmul.f32 0.5, %v9029_v49  ;;  %7842 = vst [vmem:[%s12047_s22 + $0xb8] sm:$0xff] %v9029_v49  ;;  %5875 = vmatprep.subr.bf16.mxu0 %v10074_v53  ;;  %v10084_v46 = vld [vmem:[%s13712_s8 + $0x230] ss:$28 sps:$4 sm:$0xff]  }
 0x326   : > { %v3861_v5 = vadd.f32 %v12128_v32, %v3845_v51  ;;  %5876 = vmatpush1.bf16.msra.mxu0 %v10072_v23  ;;  %v10092_v51 = vld [vmem:[%s13712_s8 + $0x26c] ss:$28 sps:$4 sm:$0xff]   ;;  %v10102_v23 = vld [vmem:[%s13712_s8 + $0x2d8] ss:$28 sps:$4 sm:$0xff]  }
 0x327   : > { %10364 = vpow2.f32 %v3810_v56  ;;  %v3812_v48 = vmul.f32 1.442695, %v3785_v58  ;;  %v3755_v9 = vpop.f32.mrb[56].mxu0  ;;  %4216 = vmatpush1.bf16.msra.mxu1 %v10015_v50  ;;  %5877 = vmatprep.subr.bf16.mxu0 %v10080_v26  ;;  %v10090_v53 = vld [vmem:[%s13712_s8 + $0x268] ss:$28 sps:$4 sm:$0xff]  }
 0x328   : > { %v12251_v12 = vadd.f32 %v3755_v9, %v12039_v14  ;;  %v3757_v32 = vpop.f32.mrb[57].mxu0  ;;  %v12253_v16 = vpack.c.bf16 %v3861_v5, %v3860_v52  ;;  %4217 = vmatprep.subr.bf16.mxu1 %v10020_v44 }
 0x329   : > { %v10361_v2 = vpop.eup %10360  ;;  %10366 = vpow2.f32 %v3812_v48  ;;  %v9031_v21 = vadd.f32 %v3757_v32, %v12042_v18  ;;  %v3759_v22 = vpop.f32.mrb[58].mxu0  ;;  %v3835_v32 = vld [vmem:[%s12072_s26 + $0x68] sm:$0xff] }
 0x32a   : > { %7843 = vst [vmem:[%s12047_s22 + $0xc0] sm:$0xff] %v12251_v12  ;;  %v12266_v4 = vadd.f32 %v3759_v22, %v12039_v14  ;;  %v3761_v24 = vpop.f32.mrb[59].mxu0  ;;  %4155 = vmatmul.mubr.bf16.gmra.mrb[44].mxu1 %v12253_v16  ;;  %v3846_v25 = vmul.f32 %v10361_v2, %v3830_v10  ;;  %5878 = vmatpush1.bf16.msra.mxu0 %v10078_v54  ;;  %v3834_v10 = vld [vmem:[%s12072_s26 + $0x60] sm:$0xff]  ;;  %v10104_v2 = vld [vmem:[%s13712_s8 + $0x2dc] ss:$28 sps:$4 sm:$0xff]  }
 0x32b   : > { %v10363_v27 = vpop.eup %10362  ;;  %v3786_v28 = vmul.f32 0.5, %v9031_v21  ;;  %7844 = vst [vmem:[%s12047_s22 + $0xc8] sm:$0xff] %v9031_v21  ;;  %v9033_v34 = vadd.f32 %v3761_v24, %v12042_v18  ;;  %4164 = vmatprep.mubr.bf16.mxu1 %v10833_v17  ;;  %4218 = vmatpush1.bf16.msra.mxu1 %v10018_v11  ;;  %v10041_v54 = vld [vmem:[%s13712_s8 + $0x7c] ss:$28 sps:$4 sm:$0xff]  }
 0x32c   : > { %7845 = vst [vmem:[%s12047_s22 + $0xd0] sm:$0xff] %v12266_v4  ;;  %v3847_v15 = vmul.f32 %v10363_v27, %v3831_v3  ;;  %v3862_v6 = vadd.f32 %v12159_v7, %v3846_v25  ;;  %4219 = vmatprep.subr.bf16.mxu1 %v10023_v20  ;;  %v10086_v7 = vld [vmem:[%s13712_s8 + $0x234] ss:$28 sps:$4 sm:$0xff]   ;;  %v10096_v20 = vld [vmem:[%s13712_s8 + $0x2a0] ss:$28 sps:$4 sm:$0xff]  }
 0x32d   : > { %v3814_v55 = vmul.f32 1.442695, %v3786_v28  ;;  %v3787_v36 = vmul.f32 0.5, %v9033_v34  ;;  %7846 = vst [vmem:[%s12047_s22 + $0xd8] sm:$0xff] %v9033_v34  ;;  %5879 = vmatprep.subr.bf16.mxu0 %v10086_v7  ;;  %v3836_v25 = vld [vmem:[%s12072_s26 + $0x70] sm:$0xff]  ;;  %v3837_v28 = vld [vmem:[%s12072_s26 + $0x78] sm:$0xff] }
 0x32e   : > { %v3863_v13 = vadd.f32 %v12174_v1, %v3847_v15  ;;  %5880 = vmatpush1.bf16.msra.mxu0 %v10084_v46  ;;  %v10045_v7 = vld [vmem:[%s13712_s8 + $0xb0] ss:$28 sps:$4 sm:$0xff]   ;;  %v10114_v46 = vld [vmem:[%s13712_s8 + $0x348] ss:$28 sps:$4 sm:$0xff]  }
 0x32f   : > { %10368 = vpow2.f32 %v3814_v55  ;;  %v3816_v30 = vmul.f32 1.442695, %v3787_v36  ;;  %v3765_v31 = vpop.f32.mrb[60].mxu0  ;;  %4220 = vmatpush1.bf16.msra.mxu1 %v10021_v37  ;;  %5881 = vmatprep.subr.bf16.mxu0 %v10092_v51  ;;  %v10035_v55 = vld [vmem:[%s13712_s8 + $0x44] ss:$28 sps:$4 sm:$0xff]  }
 0x330   : > { %v12294_v38 = vadd.f32 %v3765_v31, %v12039_v14  ;;  %v3767_v39 = vpop.f32.mrb[61].mxu0  ;;  %v12296_v40 = vpack.c.bf16 %v3863_v13, %v3862_v6  ;;  %6085 = vmatprep.subr.bf16.mxu1 %v10029_v19  ;;  %v10033_v36 = vld [vmem:[%s13712_s8 + $0x40] ss:$28 sps:$4 sm:$0xff]   ;;  %v10039_v13 = vld [vmem:[%s13712_s8 + $0x78] ss:$28 sps:$4 sm:$0xff]  }
 0x331   : > { %v10365_v1 = vpop.eup %10364  ;;  %10370 = vpow2.f32 %v3816_v30  ;;  %v9035_v42 = vadd.f32 %v3767_v39, %v12042_v18  ;;  %v3769_v43 = vpop.f32.mrb[62].mxu0  ;;  %v10053_v30 = vld [vmem:[%s13712_s8 + $0xec] ss:$28 sps:$4 sm:$0xff]   ;;  %v10110_v39 = vld [vmem:[%s13712_s8 + $0x314] ss:$28 sps:$4 sm:$0xff]  }
 0x332   : > { %7847 = vst [vmem:[%s12047_s22 + $0xe0] sm:$0xff] %v12294_v38  ;;  %v9036_v47 = vadd.f32 %v3769_v43, %v12039_v14  ;;  %v3771_v49 = vpop.f32.mrb[63].mxu0  ;;  %4165 = vmatmul.mubr.bf16.gmra.mrb[48].mxu1 %v12296_v40  ;;  %v3848_v50 = vmul.f32 %v10365_v1, %v3832_v35  ;;  %5882 = vmatpush1.bf16.msra.mxu0 %v10090_v53  ;;  %v10051_v31 = vld [vmem:[%s13712_s8 + $0xe8] ss:$28 sps:$4 sm:$0xff]   ;;  %v10057_v35 = vld [vmem:[%s13712_s8 + $0x120] ss:$28 sps:$4 sm:$0xff]  }
 0x333   : > { %v10367_v52 = vpop.eup %10366  ;;  %v3788_v44 = vmul.f32 0.5, %v9035_v42  ;;  %7848 = vst [vmem:[%s12047_s22 + $0xe8] sm:$0xff] %v9035_v42  ;;  %v9037_v56 = vadd.f32 %v3771_v49, %v12042_v18  ;;  %4174 = vmatprep.mubr.bf16.mxu1 %v10833_v17  ;;  %v10098_v18 = vld [vmem:[%s13712_s8 + $0x2a4] ss:$28 sps:$4 sm:$0xff]   ;;  %v10108_v1 = vld [vmem:[%s13712_s8 + $0x310] ss:$28 sps:$4 sm:$0xff]  }
 0x334   : > { %7849 = vst [vmem:[%s12047_s22 + $0xf0] sm:$0xff] %v9036_v47  ;;  %v3849_v14 = vmul.f32 %v10367_v52, %v3833_v45  ;;  %v3864_v58 = vadd.f32 %v12205_v57, %v3848_v50  ;;  %5883 = vmatprep.subr.bf16.mxu0 %v10098_v18  ;;  %v10071_v42 = vld [vmem:[%s13712_s8 + $0x194] ss:$28 sps:$4 sm:$0xff]   ;;  %v10116_v43 = vld [vmem:[%s13712_s8 + $0x34c] ss:$28 sps:$4 sm:$0xff]  }
 0x335   : > { %v3818_v62 = vmul.f32 1.442695, %v3788_v44  ;;  %v3789_v5 = vmul.f32 0.5, %v9037_v56  ;;  %7850 = vst [vmem:[%s12047_s22 + $0xf8] sm:$0xff] %v9037_v56  ;;  %v10069_v45 = vld [vmem:[%s13712_s8 + $0x190] ss:$28 sps:$4 sm:$0xff]  }
 0x336   : > { %v3865_v48 = vadd.f32 %v12220_v41, %v3849_v14  ;;  %5884 = vmatpush1.bf16.msra.mxu0 %v10096_v20  ;;  %v10075_v49 = vld [vmem:[%s13712_s8 + $0x1c8] ss:$28 sps:$4 sm:$0xff]   ;;  %v10081_v51 = vld [vmem:[%s13712_s8 + $0x200] ss:$28 sps:$4 sm:$0xff]   ;;  %v10087_v44 = vld [vmem:[%s13712_s8 + $0x238] ss:$28 sps:$4 sm:$0xff]  }
 0x337   : > { %10372 = vpow2.f32 %v3818_v62  ;;  %v3820_v9 = vmul.f32 1.442695, %v3789_v5  ;;  %5885 = vmatprep.subr.bf16.mxu0 %v10104_v2  ;;  %v10083_v50 = vld [vmem:[%s13712_s8 + $0x204] ss:$28 sps:$4 sm:$0xff]   ;;  %v10089_v52 = vld [vmem:[%s13712_s8 + $0x23c] ss:$28 sps:$4 sm:$0xff]  }
 0x338   : > { %v12324_v11 = vpack.c.bf16 %v3865_v48, %v3864_v58  ;;  %v10093_v56 = vld [vmem:[%s13712_s8 + $0x270] ss:$28 sps:$4 sm:$0xff]   ;;  %v10099_v58 = vld [vmem:[%s13712_s8 + $0x2a8] ss:$28 sps:$4 sm:$0xff]   ;;  %v10105_v5 = vld [vmem:[%s13712_s8 + $0x2e0] ss:$28 sps:$4 sm:$0xff]  }
 0x339   : > { %v10369_v57 = vpop.eup %10368  ;;  %10374 = vpow2.f32 %v3820_v9  ;;  %v10101_v14 = vld [vmem:[%s13712_s8 + $0x2ac] ss:$28 sps:$4 sm:$0xff]   ;;  %v10107_v62 = vld [vmem:[%s13712_s8 + $0x2e4] ss:$28 sps:$4 sm:$0xff]   ;;  %v10113_v53 = vld [vmem:[%s13712_s8 + $0x31c] ss:$28 sps:$4 sm:$0xff]  }
 0x33a   : > { %4175 = vmatmul.mubr.bf16.gmra.mrb[52].mxu1 %v12324_v11  ;;  %v3850_v41 = vmul.f32 %v10369_v57, %v3834_v10  ;;  %5886 = vmatpush1.bf16.msra.mxu0 %v10102_v23  ;;  %v10111_v48 = vld [vmem:[%s13712_s8 + $0x318] ss:$28 sps:$4 sm:$0xff]   ;;  %v10117_v18 = vld [vmem:[%s13712_s8 + $0x350] ss:$28 sps:$4 sm:$0xff]   ;;  %v12480_v10 = vld [vmem:[%s13711_s7] sm:$0xf] }
 0x33b   : > { %v10371_v21 = vpop.eup %10370  ;;  %4184 = vmatprep.mubr.bf16.mxu1 %v10833_v17  ;;  %5887 = vmatprep.subr.bf16.mxu0 %v10110_v39  ;;  %v10125_v9 = vld [vmem:[%s13712_s8 + $0x38c] ss:$28 sps:$4 sm:$0xff]   ;;  %v12488_v57 = vrot.slane %v12480_v10, %v11770_v63  ;;  %v10137_v39 = vld [vmem:[%s13712_s8 + $0x3fc] ss:$28 sps:$4 sm:$0xff]  }
 0x33c   : > { %v3851_v22 = vmul.f32 %v10371_v21, %v3835_v32  ;;  %v3866_v3 = vadd.f32 %v12251_v12, %v3850_v41 }
 0x33e   : > { %v3867_v24 = vadd.f32 %v12266_v4, %v3851_v22  ;;  %v10027_v4 = vld [vmem:[%s13712_s8 + $0x8] ss:$28 sps:$4 sm:$0xff]   ;;  %5888 = vmatpush1.bf16.msra.mxu0 %v10108_v1 }
 0x33f   : > { %5889 = vmatprep.subr.bf16.mxu0 %v10116_v43 }
 0x340   : > { %v12341_v26 = vpack.c.bf16 %v3867_v24, %v3866_v3 }
 0x341   : > { %v10373_v27 = vpop.eup %10372 }
 0x342   : > { %4185 = vmatmul.mubr.bf16.gmra.mrb[56].mxu1 %v12341_v26  ;;  %v3852_v34 = vmul.f32 %v10373_v27, %v3836_v25  ;;  %5890 = vmatpush1.bf16.msra.mxu0 %v10114_v46  ;;  %v10132_v46 = vld [vmem:[%s13712_s8 + $0x3f0] ss:$28 sps:$4 sm:$0xff]  }
 0x343   : > { %v10375_v37 = vpop.eup %10374  ;;  %4194 = vmatprep.mubr.bf16.mxu1 %v10833_v17 }
 0x344   : > { %v3853_v12 = vmul.f32 %v10375_v37, %v3837_v28  ;;  %v3868_v15 = vadd.f32 %v12294_v38, %v3852_v34  ;;  %v10065_v38 = vld [vmem:[%s13712_s8 + $0x15c] ss:$28 sps:$4 sm:$0xff]  }
 0x346   : > { %v3869_v6 = vadd.f32 %v9036_v47, %v3853_v12  ;;  %v10122_v47 = vld [vmem:[%s13712_s8 + $0x384] ss:$28 sps:$4 sm:$0xff]  }
 0x347   : > { %5972 = vmatprep.subr.bf16.mxu0 %v10122_v47  ;;  %v10120_v12 = vld [vmem:[%s13712_s8 + $0x380] ss:$28 sps:$4 sm:$0xff]  }
 0x348   : > { %v12347_v19 = vpack.c.bf16 %v3869_v6, %v3868_v15  ;;  %v10123_v15 = vld [vmem:[%s13712_s8 + $0x388] ss:$28 sps:$4 sm:$0xff]  }
 0x34a   : > { %4195 = vmatmul.mubr.bf16.gmra.mrb[60].mxu1 %v12347_v19 }
 0x34b   : > { %4237 = vmatprep.mubr.bf16.mxu1 %v10833_v17 }
 0x352   : > { %4238 = vmatmul.mubr.bf16.vlgmr.msra.gmra.mrb[64].mxu1 %v12115_v33  ;;  %v10047_v33 = vld [vmem:[%s13712_s8 + $0xb4] ss:$28 sps:$4 sm:$0xff]  }
 0x353   : > { %4247 = vmatprep.mubr.bf16.mxu1 %v10833_v17  ;;  %6086 = vmatpush1.bf16.msra.mxu1 %v10027_v4  ;;  %v10128_v4 = vld [vmem:[%s13712_s8 + $0x3bc] ss:$28 sps:$4 sm:$0xff]  }
 0x354   : > { %6087 = vmatprep.subr.bf16.mxu1 %v10035_v55  ;;  %v10131_v55 = vld [vmem:[%s13712_s8 + $0x3c4] ss:$28 sps:$4 sm:$0xff]  }
 0x357   : > { %6088 = vmatpush1.bf16.msra.mxu1 %v10033_v36 }
 0x358   : > { %6089 = vmatprep.subr.bf16.mxu1 %v10041_v54 }
 0x35a   : > { %4248 = vmatmul.mubr.bf16.gmra.mrb[68].mxu1 %v12161_v8  ;;  %v10059_v8 = vld [vmem:[%s13712_s8 + $0x124] ss:$28 sps:$4 sm:$0xff]  }
 0x35b   : > { %4257 = vmatprep.mubr.bf16.mxu1 %v10833_v17  ;;  %6090 = vmatpush1.bf16.msra.mxu1 %v10039_v13 }
 0x35c   : > { %6091 = vmatprep.subr.bf16.mxu1 %v10047_v33 }
 0x35f   : > { %6092 = vmatpush1.bf16.msra.mxu1 %v10045_v7 }
 0x360   : > { %6093 = vmatprep.subr.bf16.mxu1 %v10053_v30  ;;  %v10126_v30 = vld [vmem:[%s13712_s8 + $0x3b8] ss:$28 sps:$4 sm:$0xff]  }
 0x362   : > { %4258 = vmatmul.mubr.bf16.gmra.mrb[72].mxu1 %v12207_v29  ;;  %v10063_v29 = vld [vmem:[%s13712_s8 + $0x158] ss:$28 sps:$4 sm:$0xff]  }
 0x363   : > { %4267 = vmatprep.mubr.bf16.mxu1 %v10833_v17  ;;  %6094 = vmatpush1.bf16.msra.mxu1 %v10051_v31  ;;  %v10129_v31 = vld [vmem:[%s13712_s8 + $0x3c0] ss:$28 sps:$4 sm:$0xff]  }
 0x364   : > { %6095 = vmatprep.subr.bf16.mxu1 %v10059_v8 }
 0x367   : > { %6096 = vmatpush1.bf16.msra.mxu1 %v10057_v35 }
 0x368   : > { %6097 = vmatprep.subr.bf16.mxu1 %v10065_v38  ;;  %v10134_v38 = vld [vmem:[%s13712_s8 + $0x3f4] ss:$28 sps:$4 sm:$0xff]  }
 0x36a   : > { %4268 = vmatmul.mubr.bf16.gmra.mrb[76].mxu1 %v12253_v16  ;;  %v10077_v16 = vld [vmem:[%s13712_s8 + $0x1cc] ss:$28 sps:$4 sm:$0xff]  }
 0x36b   : > { %4277 = vmatprep.mubr.bf16.mxu1 %v10833_v17  ;;  %6098 = vmatpush1.bf16.msra.mxu1 %v10063_v29 }
 0x36c   : > { %6099 = vmatprep.subr.bf16.mxu1 %v10071_v42 }
 0x36f   : > { %6100 = vmatpush1.bf16.msra.mxu1 %v10069_v45 }
 0x370   : > { %6101 = vmatprep.subr.bf16.mxu1 %v10077_v16  ;;  %v10135_v16 = vld [vmem:[%s13712_s8 + $0x3f8] ss:$28 sps:$4 sm:$0xff]  }
 0x372   : > { %4278 = vmatmul.mubr.bf16.gmra.mrb[80].mxu1 %v12296_v40  ;;  %v10095_v40 = vld [vmem:[%s13712_s8 + $0x274] ss:$28 sps:$4 sm:$0xff]  }
 0x373   : > { %4287 = vmatprep.mubr.bf16.mxu1 %v10833_v17  ;;  %6102 = vmatpush1.bf16.msra.mxu1 %v10075_v49 }
 0x374   : > { %6103 = vmatprep.subr.bf16.mxu1 %v10083_v50  ;;  %v10140_v50 = vld [vmem:[%s13712_s8 + $0x42c] ss:$28 sps:$4 sm:$0xff]  }
 0x377   : > { %6104 = vmatpush1.bf16.msra.mxu1 %v10081_v51  ;;  %v10143_v51 = vld [vmem:[%s13712_s8 + $0x434] ss:$28 sps:$4 sm:$0xff]  }
 0x378   : > { %6105 = vmatprep.subr.bf16.mxu1 %v10089_v52 }
 0x37a   : > { %4288 = vmatmul.mubr.bf16.gmra.mrb[84].mxu1 %v12324_v11  ;;  %v12484_v11 = vrot.slane %v12480_v10, %v11761_v60 }
 0x37b   : > { %4297 = vmatprep.mubr.bf16.mxu1 %v10833_v17  ;;  %6106 = vmatpush1.bf16.msra.mxu1 %v10087_v44 }
 0x37c   : > { %6107 = vmatprep.subr.bf16.mxu1 %v10095_v40 }
 0x37f   : > { %6108 = vmatpush1.bf16.msra.mxu1 %v10093_v56 }
 0x380   : > { %6109 = vmatprep.subr.bf16.mxu1 %v10101_v14 }
 0x382   : > { %4298 = vmatmul.mubr.bf16.gmra.mrb[88].mxu1 %v12341_v26 }
 0x383   : > { %4307 = vmatprep.mubr.bf16.mxu1 %v10833_v17  ;;  %6110 = vmatpush1.bf16.msra.mxu1 %v10099_v58  ;;  %v10119_v17 = vld [vmem:[%s13712_s8 + $0x354] ss:$28 sps:$4 sm:$0xff]   ;;  %v10138_v58 = vld [vmem:[%s13712_s8 + $0x428] ss:$28 sps:$4 sm:$0xff]  }
 0x384   : > { %6111 = vmatprep.subr.bf16.mxu1 %v10107_v62  ;;  %v10141_v62 = vld [vmem:[%s13712_s8 + $0x430] ss:$28 sps:$4 sm:$0xff]  }
 0x387   : > { %6112 = vmatpush1.bf16.msra.mxu1 %v10105_v5 }
 0x388   : > { %6113 = vmatprep.subr.bf16.mxu1 %v10113_v53 }
 0x38a   : > { %4308 = vmatmul.mubr.bf16.gmra.mrb[92].mxu1 %v12347_v19 }
 0x38b   : > { %6114 = vmatpush1.bf16.msra.mxu1 %v10111_v48  ;;  %v10146_v48 = vld [vmem:[%s13712_s8 + $0x464] ss:$28 sps:$4 sm:$0xff]  }
 0x38c   : > { %6115 = vmatprep.subr.bf16.mxu1 %v10119_v17  ;;  %v10149_v17 = vld [vmem:[%s13712_s8 + $0x46c] ss:$28 sps:$4 sm:$0xff]  }
 0x38f   : > { %6116 = vmatpush1.bf16.msra.mxu1 %v10117_v18 }
 0x390   : > { %6198 = vmatprep.subr.bf16.mxu1 %v10125_v9 }
 0x3e5   : > { %v4126_v32 = vpop.f32.mrb[32].mxu1 }
 0x3e6   : > { %v4127_v20 = vadd.f32 %v4126_v32, %v12484_v11  ;;  %v4128_v41 = vpop.f32.mrb[33].mxu1 }
 0x3e7   : > { %v4129_v2 = vadd.f32 %v4128_v41, %v12488_v57  ;;  %v4130_v21 = vpop.f32.mrb[34].mxu1 }
 0x3e8   : > { %v4131_v22 = vadd.f32 %v4130_v21, %v12484_v11  ;;  %v4132_v3 = vpop.f32.mrb[35].mxu1  ;;  %v4318_v24 = vmax.f32 %v4127_v20, 0.0  ;;  %v10147_v21 = vld [vmem:[%s13712_s8 + $0x468] ss:$28 sps:$4 sm:$0xff]  }
 0x3e9   : > { %v4133_v23 = vadd.f32 %v4132_v3, %v12488_v57  ;;  %v4319_v26 = vmax.f32 %v4129_v2, 0.0  ;;  %v10144_v2 = vld [vmem:[%s13712_s8 + $0x460] ss:$28 sps:$4 sm:$0xff]  }
 0x3ea   : > { %v4322_v25 = vmax.f32 %v4131_v22, 0.0 }
 0x3eb   : > { %v4323_v27 = vmax.f32 %v4133_v23, 0.0  ;;  %v10152_v23 = vld [vmem:[%s13712_s8 + $0x49c] ss:$28 sps:$4 sm:$0xff]  }
 0x3ec   : > { %v12494_v28 = vpack.c.bf16 %v4322_v25, %v4318_v24  ;;  %v10155_v24 = vld [vmem:[%s13712_s8 + $0x4a4] ss:$28 sps:$4 sm:$0xff]  }
 0x3ed   : > { %v12496_v34 = vpack.c.bf16 %v4323_v27, %v4319_v26  ;;  %v4136_v37 = vpop.f32.mrb[36].mxu1 }
 0x3ee   : > { %v4137_v6 = vadd.f32 %v4136_v37, %v12484_v11  ;;  %v4138_v19 = vpop.f32.mrb[37].mxu1 }
 0x3ef   : > { %v4139_v36 = vadd.f32 %v4138_v19, %v12488_v57  ;;  %v4140_v54 = vpop.f32.mrb[38].mxu1  ;;  %5891 = vmatprep.mubr.bf16.mxu0 %v12496_v34  ;;  %6117 = vmatprep.mubr.bf16.mxu1 %v12496_v34 }
 0x3f0   : > { %v4141_v13 = vadd.f32 %v4140_v54, %v12484_v11  ;;  %v4142_v33 = vpop.f32.mrb[39].mxu1  ;;  %5892 = vmatmul.mubr.bf16.vlgmr.msra.gmra.mrb[64].mxu0 %v12494_v28  ;;  %6118 = vmatmul.mubr.bf16.vlgmr.msra.gmra.mrb[96].mxu1 %v12494_v28  ;;  %v4326_v8 = vmax.f32 %v4137_v6, 0.0  ;;  %v10153_v6 = vld [vmem:[%s13712_s8 + $0x4a0] ss:$28 sps:$4 sm:$0xff]  }
 0x3f1   : > { %v4143_v7 = vadd.f32 %v4142_v33, %v12488_v57  ;;  %5973 = vmatpush1.bf16.msra.mxu0 %v10120_v12  ;;  %6199 = vmatpush1.bf16.msra.mxu1 %v10123_v15  ;;  %v4327_v29 = vmax.f32 %v4139_v36, 0.0  ;;  %v10150_v15 = vld [vmem:[%s13712_s8 + $0x498] ss:$28 sps:$4 sm:$0xff]  }
 0x3f2   : > { %v4330_v35 = vmax.f32 %v4141_v13, 0.0  ;;  %5974 = vmatprep.subr.bf16.mxu0 %v10128_v4  ;;  %6200 = vmatprep.subr.bf16.mxu1 %v10131_v55  ;;  %v10158_v55 = vld [vmem:[%s13712_s8 + $0x4d4] ss:$28 sps:$4 sm:$0xff]   ;;  %v10161_v36 = vld [vmem:[%s13712_s8 + $0x4dc] ss:$28 sps:$4 sm:$0xff]  }
 0x3f3   : > { %v4331_v1 = vmax.f32 %v4143_v7, 0.0 }
 0x3f4   : > { %v12530_v42 = vpack.c.bf16 %v4330_v35, %v4326_v8  ;;  %v10159_v8 = vld [vmem:[%s13712_s8 + $0x4d8] ss:$28 sps:$4 sm:$0xff]  }
 0x3f5   : > { %v12532_v43 = vpack.c.bf16 %v4331_v1, %v4327_v29  ;;  %v4146_v45 = vpop.f32.mrb[40].mxu1  ;;  %5975 = vmatpush1.bf16.msra.mxu0 %v10126_v30  ;;  %6201 = vmatpush1.bf16.msra.mxu1 %v10129_v31  ;;  %v10156_v31 = vld [vmem:[%s13712_s8 + $0x4d0] ss:$28 sps:$4 sm:$0xff]  }
 0x3f6   : > { %v4147_v47 = vadd.f32 %v4146_v45, %v12484_v11  ;;  %v4148_v49 = vpop.f32.mrb[41].mxu1  ;;  %5976 = vmatprep.subr.bf16.mxu0 %v10134_v38  ;;  %6202 = vmatprep.subr.bf16.mxu1 %v10137_v39  ;;  %v10164_v39 = vld [vmem:[%s13712_s8 + $0x50c] ss:$28 sps:$4 sm:$0xff]   ;;  %v10167_v29 = vld [vmem:[%s13712_s8 + $0x514] ss:$28 sps:$4 sm:$0xff]  }
 0x3f7   : > { %v4149_v52 = vadd.f32 %v4148_v49, %v12488_v57  ;;  %v4150_v44 = vpop.f32.mrb[42].mxu1  ;;  %5901 = vmatprep.mubr.bf16.mxu0 %v12532_v43  ;;  %6127 = vmatprep.mubr.bf16.mxu1 %v12532_v43  ;;  %v10162_v49 = vld [vmem:[%s13712_s8 + $0x508] ss:$28 sps:$4 sm:$0xff]  }
 0x3f8   : > { %v4151_v40 = vadd.f32 %v4150_v44, %v12484_v11  ;;  %v4152_v56 = vpop.f32.mrb[43].mxu1  ;;  %5902 = vmatmul.mubr.bf16.gmra.mrb[68].mxu0 %v12530_v42  ;;  %6128 = vmatmul.mubr.bf16.gmra.mrb[100].mxu1 %v12530_v42  ;;  %v4334_v5 = vmax.f32 %v4147_v47, 0.0  ;;  %v10170_v44 = vld [vmem:[%s13712_s8 + $0x544] ss:$28 sps:$4 sm:$0xff]  }
 0x3f9   : > { %v4153_v14 = vadd.f32 %v4152_v56, %v12488_v57  ;;  %5977 = vmatpush1.bf16.msra.mxu0 %v10132_v46  ;;  %6203 = vmatpush1.bf16.msra.mxu1 %v10135_v16  ;;  %v4335_v18 = vmax.f32 %v4149_v52, 0.0 }
 0x3fa   : > { %v4338_v53 = vmax.f32 %v4151_v40, 0.0  ;;  %5978 = vmatprep.subr.bf16.mxu0 %v10140_v50  ;;  %6204 = vmatprep.subr.bf16.mxu1 %v10143_v51  ;;  %v10165_v50 = vld [vmem:[%s13712_s8 + $0x510] ss:$28 sps:$4 sm:$0xff]  }
 0x3fb   : > { %v4339_v9 = vmax.f32 %v4153_v14, 0.0  ;;  %v10173_v40 = vld [vmem:[%s13712_s8 + $0x54c] ss:$28 sps:$4 sm:$0xff]  }
 0x3fc   : > { %v12566_v32 = vpack.c.bf16 %v4338_v53, %v4334_v5  ;;  %v10168_v53 = vld [vmem:[%s13712_s8 + $0x540] ss:$28 sps:$4 sm:$0xff]  }
 0x3fd   : > { %v12568_v20 = vpack.c.bf16 %v4339_v9, %v4335_v18  ;;  %v4156_v41 = vpop.f32.mrb[44].mxu1  ;;  %5979 = vmatpush1.bf16.msra.mxu0 %v10138_v58  ;;  %6205 = vmatpush1.bf16.msra.mxu1 %v10141_v62  ;;  %v10176_v9 = vld [vmem:[%s13712_s8 + $0x57c] ss:$28 sps:$4 sm:$0xff]  }
 0x3fe   : > { %v4157_v22 = vadd.f32 %v4156_v41, %v12484_v11  ;;  %v4158_v3 = vpop.f32.mrb[45].mxu1  ;;  %5980 = vmatprep.subr.bf16.mxu0 %v10146_v48  ;;  %6206 = vmatprep.subr.bf16.mxu1 %v10149_v17  ;;  %v10171_v48 = vld [vmem:[%s13712_s8 + $0x548] ss:$28 sps:$4 sm:$0xff]  }
 0x3ff   : > { %v4159_v25 = vadd.f32 %v4158_v3, %v12488_v57  ;;  %v4160_v26 = vpop.f32.mrb[46].mxu1  ;;  %5911 = vmatprep.mubr.bf16.mxu0 %v12568_v20  ;;  %6137 = vmatprep.mubr.bf16.mxu1 %v12568_v20  ;;  %v10179_v41 = vld [vmem:[%s13712_s8 + $0x584] ss:$28 sps:$4 sm:$0xff]  }
 0x400   : > { %v4161_v27 = vadd.f32 %v4160_v26, %v12484_v11  ;;  %v4162_v37 = vpop.f32.mrb[47].mxu1  ;;  %5912 = vmatmul.mubr.bf16.gmra.mrb[72].mxu0 %v12566_v32  ;;  %6138 = vmatmul.mubr.bf16.gmra.mrb[104].mxu1 %v12566_v32  ;;  %v4342_v19 = vmax.f32 %v4157_v22, 0.0 }
 0x401   : > { %v4163_v12 = vadd.f32 %v4162_v37, %v12488_v57  ;;  %5981 = vmatpush1.bf16.msra.mxu0 %v10144_v2  ;;  %6207 = vmatpush1.bf16.msra.mxu1 %v10147_v21  ;;  %v4343_v54 = vmax.f32 %v4159_v25, 0.0  ;;  %v10177_v25 = vld [vmem:[%s13712_s8 + $0x580] ss:$28 sps:$4 sm:$0xff]   ;;  %v10182_v37 = vld [vmem:[%s13712_s8 + $0x5b4] ss:$28 sps:$4 sm:$0xff]  }
 0x402   : > { %v4346_v4 = vmax.f32 %v4161_v27, 0.0  ;;  %5982 = vmatprep.subr.bf16.mxu0 %v10152_v23  ;;  %6208 = vmatprep.subr.bf16.mxu1 %v10155_v24  ;;  %v10174_v24 = vld [vmem:[%s13712_s8 + $0x578] ss:$28 sps:$4 sm:$0xff]  }
 0x403   : > { %v4347_v13 = vmax.f32 %v4163_v12, 0.0  ;;  %v10185_v12 = vld [vmem:[%s13712_s8 + $0x5bc] ss:$28 sps:$4 sm:$0xff]  }
 0x404   : > { %v12602_v33 = vpack.c.bf16 %v4346_v4, %v4342_v19 }
 0x405   : > { %v12604_v7 = vpack.c.bf16 %v4347_v13, %v4343_v54  ;;  %v4166_v30 = vpop.f32.mrb[48].mxu1  ;;  %5983 = vmatpush1.bf16.msra.mxu0 %v10150_v15  ;;  %6209 = vmatpush1.bf16.msra.mxu1 %v10153_v6  ;;  %v10183_v54 = vld [vmem:[%s13712_s8 + $0x5b8] ss:$28 sps:$4 sm:$0xff]  }
 0x406   : > { %v4167_v35 = vadd.f32 %v4166_v30, %v12484_v11  ;;  %v4168_v38 = vpop.f32.mrb[49].mxu1  ;;  %5984 = vmatprep.subr.bf16.mxu0 %v10158_v55  ;;  %6210 = vmatprep.subr.bf16.mxu1 %v10161_v36  ;;  %v10180_v36 = vld [vmem:[%s13712_s8 + $0x5b0] ss:$28 sps:$4 sm:$0xff]  }
 0x407   : > { %v4169_v1 = vadd.f32 %v4168_v38, %v12488_v57  ;;  %v4170_v45 = vpop.f32.mrb[50].mxu1  ;;  %5921 = vmatprep.mubr.bf16.mxu0 %v12604_v7  ;;  %6147 = vmatprep.mubr.bf16.mxu1 %v12604_v7 }
 0x408   : > { %v4171_v46 = vadd.f32 %v4170_v45, %v12484_v11  ;;  %v4172_v16 = vpop.f32.mrb[51].mxu1  ;;  %5922 = vmatmul.mubr.bf16.gmra.mrb[76].mxu0 %v12602_v33  ;;  %6148 = vmatmul.mubr.bf16.gmra.mrb[108].mxu1 %v12602_v33  ;;  %v4350_v51 = vmax.f32 %v4167_v35, 0.0  ;;  %v10186_v45 = vld [vmem:[%s13712_s8 + $0x5e8] ss:$28 sps:$4 sm:$0xff]  }
 0x409   : > { %v4173_v47 = vadd.f32 %v4172_v16, %v12488_v57  ;;  %5985 = vmatpush1.bf16.msra.mxu0 %v10156_v31  ;;  %6211 = vmatpush1.bf16.msra.mxu1 %v10159_v8  ;;  %v4351_v56 = vmax.f32 %v4169_v1, 0.0  ;;  %v10188_v31 = vld [vmem:[%s13712_s8 + $0x5ec] ss:$28 sps:$4 sm:$0xff]   ;;  %v10191_v8 = vld [vmem:[%s13712_s8 + $0x5f4] ss:$28 sps:$4 sm:$0xff]  }
 0x40a   : > { %v4354_v52 = vmax.f32 %v4171_v46, 0.0  ;;  %5986 = vmatprep.subr.bf16.mxu0 %v10164_v39  ;;  %6212 = vmatprep.subr.bf16.mxu1 %v10167_v29  ;;  %v10189_v46 = vld [vmem:[%s13712_s8 + $0x5f0] ss:$28 sps:$4 sm:$0xff]  }
 0x40b   : > { %v4355_v14 = vmax.f32 %v4173_v47, 0.0 }
 0x40c   : > { %v12638_v58 = vpack.c.bf16 %v4354_v52, %v4350_v51 }
 0x40d   : > { %v12640_v62 = vpack.c.bf16 %v4355_v14, %v4351_v56  ;;  %v4176_v5 = vpop.f32.mrb[52].mxu1  ;;  %5987 = vmatpush1.bf16.msra.mxu0 %v10162_v49  ;;  %6213 = vmatpush1.bf16.msra.mxu1 %v10165_v50  ;;  %v10194_v49 = vld [vmem:[%s13712_s8 + $0x624] ss:$28 sps:$4 sm:$0xff]   ;;  %v10197_v50 = vld [vmem:[%s13712_s8 + $0x62c] ss:$28 sps:$4 sm:$0xff]  }
 0x40e   : > { %v4177_v17 = vadd.f32 %v4176_v5, %v12484_v11  ;;  %v4178_v18 = vpop.f32.mrb[53].mxu1  ;;  %5988 = vmatprep.subr.bf16.mxu0 %v10170_v44  ;;  %6214 = vmatprep.subr.bf16.mxu1 %v10173_v40  ;;  %v10192_v14 = vld [vmem:[%s13712_s8 + $0x620] ss:$28 sps:$4 sm:$0xff]   ;;  %v10195_v5 = vld [vmem:[%s13712_s8 + $0x628] ss:$28 sps:$4 sm:$0xff]  }
 0x40f   : > { %v4179_v2 = vadd.f32 %v4178_v18, %v12488_v57  ;;  %v4180_v21 = vpop.f32.mrb[54].mxu1  ;;  %5931 = vmatprep.mubr.bf16.mxu0 %v12640_v62  ;;  %6157 = vmatprep.mubr.bf16.mxu1 %v12640_v62  ;;  %v10203_v18 = vld [vmem:[%s13712_s8 + $0x664] ss:$28 sps:$4 sm:$0xff]  }
 0x410   : > { %v4181_v22 = vadd.f32 %v4180_v21, %v12484_v11  ;;  %v4182_v3 = vpop.f32.mrb[55].mxu1  ;;  %5932 = vmatmul.mubr.bf16.gmra.mrb[80].mxu0 %v12638_v58  ;;  %6158 = vmatmul.mubr.bf16.gmra.mrb[112].mxu1 %v12638_v58  ;;  %v4358_v26 = vmax.f32 %v4177_v17, 0.0  ;;  %v10200_v17 = vld [vmem:[%s13712_s8 + $0x65c] ss:$28 sps:$4 sm:$0xff]  }
 0x411   : > { %v4183_v23 = vadd.f32 %v4182_v3, %v12488_v57  ;;  %5989 = vmatpush1.bf16.msra.mxu0 %v10168_v53  ;;  %6215 = vmatpush1.bf16.msra.mxu1 %v10171_v48  ;;  %v4359_v15 = vmax.f32 %v4179_v2, 0.0  ;;  %v10198_v3 = vld [vmem:[%s13712_s8 + $0x658] ss:$28 sps:$4 sm:$0xff]  }
 0x412   : > { %v4362_v27 = vmax.f32 %v4181_v22, 0.0  ;;  %5990 = vmatprep.subr.bf16.mxu0 %v10176_v9  ;;  %6216 = vmatprep.subr.bf16.mxu1 %v10179_v41 }
 0x413   : > { %v4363_v6 = vmax.f32 %v4183_v23, 0.0  ;;  %v10201_v23 = vld [vmem:[%s13712_s8 + $0x660] ss:$28 sps:$4 sm:$0xff]  }
 0x414   : > { %v12674_v19 = vpack.c.bf16 %v4362_v27, %v4358_v26  ;;  %v10209_v26 = vld [vmem:[%s13712_s8 + $0x69c] ss:$28 sps:$4 sm:$0xff]  }
 0x415   : > { %v12676_v4 = vpack.c.bf16 %v4363_v6, %v4359_v15  ;;  %v4186_v55 = vpop.f32.mrb[56].mxu1  ;;  %5991 = vmatpush1.bf16.msra.mxu0 %v10174_v24  ;;  %6217 = vmatpush1.bf16.msra.mxu1 %v10177_v25 }
 0x416   : > { %v4187_v13 = vadd.f32 %v4186_v55, %v12484_v11  ;;  %v4188_v30 = vpop.f32.mrb[57].mxu1  ;;  %5992 = vmatprep.subr.bf16.mxu0 %v10182_v37  ;;  %6218 = vmatprep.subr.bf16.mxu1 %v10185_v12  ;;  %v12752_v12 = vrot.slane %v12480_v10, %v11773_v0 }
 0x417   : > { %v4189_v35 = vadd.f32 %v4188_v30, %v12488_v57  ;;  %v4190_v38 = vpop.f32.mrb[58].mxu1  ;;  %5941 = vmatprep.mubr.bf16.mxu0 %v12676_v4  ;;  %6167 = vmatprep.mubr.bf16.mxu1 %v12676_v4 }
 0x418   : > { %v4191_v39 = vadd.f32 %v4190_v38, %v12484_v11  ;;  %v4192_v29 = vpop.f32.mrb[59].mxu1  ;;  %5942 = vmatmul.mubr.bf16.gmra.mrb[84].mxu0 %v12674_v19  ;;  %6168 = vmatmul.mubr.bf16.gmra.mrb[116].mxu1 %v12674_v19  ;;  %v4366_v16 = vmax.f32 %v4187_v13, 0.0 }
 0x419   : > { %v4193_v1 = vadd.f32 %v4192_v29, %v12488_v57  ;;  %5993 = vmatpush1.bf16.msra.mxu0 %v10180_v36  ;;  %6219 = vmatpush1.bf16.msra.mxu1 %v10183_v54  ;;  %v4367_v51 = vmax.f32 %v4189_v35, 0.0  ;;  %v10204_v36 = vld [vmem:[%s13712_s8 + $0x690] ss:$28 sps:$4 sm:$0xff]   ;;  %v10207_v54 = vld [vmem:[%s13712_s8 + $0x698] ss:$28 sps:$4 sm:$0xff]  }
 0x41a   : > { %v4370_v47 = vmax.f32 %v4191_v39, 0.0  ;;  %5994 = vmatprep.subr.bf16.mxu0 %v10188_v31  ;;  %6220 = vmatprep.subr.bf16.mxu1 %v10191_v8  ;;  %v10215_v31 = vld [vmem:[%s13712_s8 + $0x6d4] ss:$28 sps:$4 sm:$0xff]  }
 0x41b   : > { %v4371_v52 = vmax.f32 %v4193_v1, 0.0  ;;  %v10210_v1 = vld [vmem:[%s13712_s8 + $0x6c8] ss:$28 sps:$4 sm:$0xff]  }
 0x41c   : > { %v12710_v44 = vpack.c.bf16 %v4370_v47, %v4366_v16  ;;  %v10218_v47 = vld [vmem:[%s13712_s8 + $0x14] ss:$28 sps:$4 sm:$0xff]  }
 0x41d   : > { %v12712_v40 = vpack.c.bf16 %v4371_v52, %v4367_v51  ;;  %v4196_v56 = vpop.f32.mrb[60].mxu1  ;;  %5995 = vmatpush1.bf16.msra.mxu0 %v10186_v45  ;;  %6221 = vmatpush1.bf16.msra.mxu1 %v10189_v46  ;;  %v10213_v45 = vld [vmem:[%s13712_s8 + $0x6d0] ss:$28 sps:$4 sm:$0xff]  }
 0x41e   : > { %v4197_v53 = vadd.f32 %v4196_v56, %v12484_v11  ;;  %v4198_v48 = vpop.f32.mrb[61].mxu1  ;;  %5996 = vmatprep.subr.bf16.mxu0 %v10194_v49  ;;  %6222 = vmatprep.subr.bf16.mxu1 %v10197_v50  ;;  %v10219_v49 = vld [vmem:[%s13712_s8 + $0x1d8] ss:$28 sps:$4 sm:$0xff]  }
 0x41f   : > { %v4199_v9 = vadd.f32 %v4198_v48, %v12488_v57  ;;  %v4200_v41 = vpop.f32.mrb[62].mxu1  ;;  %5951 = vmatprep.mubr.bf16.mxu0 %v12712_v40  ;;  %6177 = vmatprep.mubr.bf16.mxu1 %v12712_v40 }
 0x420   : > { %v4201_v2 = vadd.f32 %v4200_v41, %v12484_v11  ;;  %v4202_v21 = vpop.f32.mrb[63].mxu1  ;;  %5952 = vmatmul.mubr.bf16.gmra.mrb[88].mxu0 %v12710_v44  ;;  %6178 = vmatmul.mubr.bf16.gmra.mrb[120].mxu1 %v12710_v44  ;;  %v4374_v24 = vmax.f32 %v4197_v53, 0.0  ;;  %v12742_v11 = vrot.slane %v12480_v10, %v11764_v61  ;;  %v10212_v10 = vld [vmem:[%s13712_s8 + $0x6cc] ss:$28 sps:$4 sm:$0xff]   ;;  %v10220_v53 = vld [vmem:[%s13712_s8 + $0x18] ss:$28 sps:$4 sm:$0xff]  }
 0x421   : > { %v4203_v22 = vadd.f32 %v4202_v21, %v12488_v57  ;;  %5997 = vmatpush1.bf16.msra.mxu0 %v10192_v14  ;;  %6223 = vmatpush1.bf16.msra.mxu1 %v10195_v5  ;;  %v10206_v57 = vld [vmem:[%s13712_s8 + $0x694] ss:$28 sps:$4 sm:$0xff]   ;;  %v4375_v27 = vmax.f32 %v4199_v9, 0.0 }
 0x422   : > { %v4378_v25 = vmax.f32 %v4201_v2, 0.0  ;;  %5998 = vmatprep.subr.bf16.mxu0 %v10200_v17  ;;  %6224 = vmatprep.subr.bf16.mxu1 %v10203_v18  ;;  %v10216_v5 = vld [vmem:[%s13712_s8 + $0x10] ss:$28 sps:$4 sm:$0xff]  }
 0x423   : > { %v4379_v37 = vmax.f32 %v4203_v22, 0.0  ;;  %v10223_v18 = vld [vmem:[%s13712_s8 + $0x4c] ss:$28 sps:$4 sm:$0xff]  }
 0x424   : > { %v12754_v15 = vpack.c.bf16 %v4378_v25, %v4374_v24  ;;  %v10227_v9 = vld [vmem:[%s13712_s8 + $0x210] ss:$28 sps:$4 sm:$0xff]  }
 0x425   : > { %v12756_v6 = vpack.c.bf16 %v4379_v37, %v4375_v27  ;;  %v4239_v55 = vpop.f32.mrb[64].mxu1  ;;  %5999 = vmatpush1.bf16.msra.mxu0 %v10198_v3  ;;  %6225 = vmatpush1.bf16.msra.mxu1 %v10201_v23  ;;  %v10221_v23 = vld [vmem:[%s13712_s8 + $0x48] ss:$28 sps:$4 sm:$0xff]   ;;  %v10228_v24 = vld [vmem:[%s13712_s8 + $0x50] ss:$28 sps:$4 sm:$0xff]  }
 0x426   : > { %v4240_v13 = vadd.f32 %v4239_v55, %v12742_v11  ;;  %v4241_v30 = vpop.f32.mrb[65].mxu1  ;;  %6000 = vmatprep.subr.bf16.mxu0 %v10206_v57  ;;  %6226 = vmatprep.subr.bf16.mxu1 %v10209_v26  ;;  %v10226_v26 = vld [vmem:[%s13712_s8 + $0x84] ss:$28 sps:$4 sm:$0xff]  }
 0x427   : > { %v4242_v8 = vadd.f32 %v4241_v30, %v12752_v12  ;;  %v4243_v35 = vpop.f32.mrb[66].mxu1  ;;  %5961 = vmatprep.mubr.bf16.mxu0 %v12756_v6  ;;  %6187 = vmatprep.mubr.bf16.mxu1 %v12756_v6  ;;  %v10235_v27 = vld [vmem:[%s13712_s8 + $0x248] ss:$28 sps:$4 sm:$0xff]   ;;  %v10224_v30 = vld [vmem:[%s13712_s8 + $0x80] ss:$28 sps:$4 sm:$0xff]  }
 0x428   : > { %v4244_v38 = vadd.f32 %v4243_v35, %v12742_v11  ;;  %v4245_v39 = vpop.f32.mrb[67].mxu1  ;;  %5962 = vmatmul.mubr.bf16.gmra.mrb[92].mxu0 %v12754_v15  ;;  %6188 = vmatmul.mubr.bf16.gmra.mrb[124].mxu1 %v12754_v15  ;;  %v4320_v46 = vmax.f32 %v4240_v13, 0.0  ;;  %v10231_v35 = vld [vmem:[%s13712_s8 + $0xbc] ss:$28 sps:$4 sm:$0xff]  }
 0x429   : > { %v4246_v29 = vadd.f32 %v4245_v39, %v12752_v12  ;;  %6001 = vmatpush1.bf16.msra.mxu0 %v10204_v36  ;;  %6227 = vmatpush1.bf16.msra.mxu1 %v10207_v54  ;;  %v4321_v50 = vmax.f32 %v4242_v8, 0.0 }
 0x42a   : > { %v4324_v16 = vmax.f32 %v4244_v38, 0.0  ;;  %6002 = vmatprep.subr.bf16.mxu0 %v10212_v10  ;;  %6228 = vmatprep.subr.bf16.mxu1 %v10215_v31  ;;  %v10236_v10 = vld [vmem:[%s13712_s8 + $0x88] ss:$28 sps:$4 sm:$0xff]   ;;  %v10243_v38 = vld [vmem:[%s13712_s8 + $0x280] ss:$28 sps:$4 sm:$0xff]  }
 0x42b   : > { %v4325_v51 = vmax.f32 %v4246_v29, 0.0 }
 0x42c   : > { %v12790_v52 = vpack.c.bf16 %v4324_v16, %v4320_v46  ;;  %v10229_v16 = vld [vmem:[%s13712_s8 + $0xb8] ss:$28 sps:$4 sm:$0xff]  }
 0x42d   : > { %v12792_v56 = vpack.c.bf16 %v4325_v51, %v4321_v50  ;;  %v4249_v14 = vpop.f32.mrb[68].mxu1  ;;  %6003 = vmatpush1.bf16.msra.mxu0 %v10210_v1  ;;  %6229 = vmatpush1.bf16.msra.mxu1 %v10213_v45  ;;  %v10234_v51 = vld [vmem:[%s13712_s8 + $0xf4] ss:$28 sps:$4 sm:$0xff]  }
 0x42e   : > { %v4250_v48 = vadd.f32 %v4249_v14, %v12742_v11  ;;  %v4251_v17 = vpop.f32.mrb[69].mxu1  ;;  %6311 = vmatprep.subr.bf16.mxu0 %v10218_v47  ;;  %8814 = vmatprep.subr.bf16.mxu1 %v10219_v49  ;;  %v10244_v47 = vld [vmem:[%s13712_s8 + $0xc0] ss:$28 sps:$4 sm:$0xff]   ;;  %v10251_v14 = vld [vmem:[%s13712_s8 + $0x2b8] ss:$28 sps:$4 sm:$0xff]  }
 0x42f   : > { %v4252_v41 = vadd.f32 %v4251_v17, %v12752_v12  ;;  %v4253_v2 = vpop.f32.mrb[70].mxu1  ;;  %6004 = vmatprep.mubr.bf16.mxu0 %v12792_v56  ;;  %6230 = vmatprep.mubr.bf16.mxu1 %v12792_v56 }
 0x430   : > { %v4254_v21 = vadd.f32 %v4253_v2, %v12742_v11  ;;  %v4255_v22 = vpop.f32.mrb[71].mxu1  ;;  %6005 = vmatmul.mubr.bf16.vlgmr.msra.gmra.mrb[64].mxu0 %v12790_v52  ;;  %6231 = vmatmul.mubr.bf16.vlgmr.msra.gmra.mrb[96].mxu1 %v12790_v52  ;;  %v4328_v25 = vmax.f32 %v4250_v48, 0.0 }
 0x431   : > { %v4256_v3 = vadd.f32 %v4255_v22, %v12752_v12  ;;  %6312 = vmatpush1.bf16.msra.mxu0 %v10216_v5  ;;  %8815 = vmatpush3.bf16.msra.mxu1 %v10220_v53  ;;  %v4329_v37 = vmax.f32 %v4252_v41, 0.0  ;;  %v10252_v41 = vld [vmem:[%s13712_s8 + $0xf8] ss:$28 sps:$4 sm:$0xff]   ;;  %v10239_v22 = vld [vmem:[%s13712_s8 + $0x12c] ss:$28 sps:$4 sm:$0xff]  }
 0x432   : > { %v4332_v57 = vmax.f32 %v4254_v21, 0.0  ;;  %6313 = vmatprep.subr.bf16.mxu0 %v10223_v18  ;;  %8816 = vmatprep.subr.bf16.mxu1 %v10227_v9  ;;  %v10232_v9 = vld [vmem:[%s13712_s8 + $0xf0] ss:$28 sps:$4 sm:$0xff]  }
 0x433   : > { %v4333_v55 = vmax.f32 %v4256_v3, 0.0  ;;  %v10259_v3 = vld [vmem:[%s13712_s8 + $0x2f0] ss:$28 sps:$4 sm:$0xff]  }
 0x434   : > { %v12826_v36 = vpack.c.bf16 %v4332_v57, %v4328_v25 }
 0x435   : > { %v12828_v54 = vpack.c.bf16 %v4333_v55, %v4329_v37  ;;  %v4259_v13 = vpop.f32.mrb[72].mxu1  ;;  %6314 = vmatpush1.bf16.msra.mxu0 %v10221_v23  ;;  %8817 = vmatpush3.bf16.msra.mxu1 %v10228_v24  ;;  %v10260_v37 = vld [vmem:[%s13712_s8 + $0x130] ss:$28 sps:$4 sm:$0xff]  }
 0x436   : > { %v4260_v31 = vadd.f32 %v4259_v13, %v12742_v11  ;;  %v4261_v8 = vpop.f32.mrb[73].mxu1  ;;  %6315 = vmatprep.subr.bf16.mxu0 %v10226_v26  ;;  %8818 = vmatprep.subr.bf16.mxu1 %v10235_v27  ;;  %v10237_v27 = vld [vmem:[%s13712_s8 + $0x128] ss:$28 sps:$4 sm:$0xff]  }
 0x437   : > { %v4262_v39 = vadd.f32 %v4261_v8, %v12752_v12  ;;  %v4263_v29 = vpop.f32.mrb[74].mxu1  ;;  %6014 = vmatprep.mubr.bf16.mxu0 %v12828_v54  ;;  %6240 = vmatprep.mubr.bf16.mxu1 %v12828_v54 }
 0x438   : > { %v4264_v1 = vadd.f32 %v4263_v29, %v12742_v11  ;;  %v4265_v45 = vpop.f32.mrb[75].mxu1  ;;  %6015 = vmatmul.mubr.bf16.gmra.mrb[68].mxu0 %v12826_v36  ;;  %6241 = vmatmul.mubr.bf16.gmra.mrb[100].mxu1 %v12826_v36  ;;  %v4336_v49 = vmax.f32 %v4260_v31, 0.0  ;;  %v10240_v29 = vld [vmem:[%s13712_s8 + $0x160] ss:$28 sps:$4 sm:$0xff]  }
 0x439   : > { %v4266_v46 = vadd.f32 %v4265_v45, %v12752_v12  ;;  %6316 = vmatpush1.bf16.msra.mxu0 %v10224_v30  ;;  %8819 = vmatpush3.bf16.msra.mxu1 %v10236_v10  ;;  %v4337_v5 = vmax.f32 %v4262_v39, 0.0  ;;  %v10242_v30 = vld [vmem:[%s13712_s8 + $0x164] ss:$28 sps:$4 sm:$0xff]  }
 0x43a   : > { %v4340_v50 = vmax.f32 %v4264_v1, 0.0  ;;  %6317 = vmatprep.subr.bf16.mxu0 %v10231_v35  ;;  %8820 = vmatprep.subr.bf16.mxu1 %v10243_v38  ;;  %v10267_v10 = vld [vmem:[%s13712_s8 + $0x328] ss:$28 sps:$4 sm:$0xff]  }
 0x43b   : > { %v4341_v53 = vmax.f32 %v4266_v46, 0.0  ;;  %v10268_v1 = vld [vmem:[%s13712_s8 + $0x168] ss:$28 sps:$4 sm:$0xff]  }
 0x43c   : > { %v12862_v48 = vpack.c.bf16 %v4340_v50, %v4336_v49 }
 0x43d   : > { %v12864_v17 = vpack.c.bf16 %v4341_v53, %v4337_v5  ;;  %v4269_v18 = vpop.f32.mrb[76].mxu1  ;;  %6318 = vmatpush1.bf16.msra.mxu0 %v10229_v16  ;;  %8821 = vmatpush3.bf16.msra.mxu1 %v10244_v47  ;;  %v10247_v16 = vld [vmem:[%s13712_s8 + $0x19c] ss:$28 sps:$4 sm:$0xff]  }
 0x43e   : > { %v4270_v2 = vadd.f32 %v4269_v18, %v12742_v11  ;;  %v4271_v21 = vpop.f32.mrb[77].mxu1  ;;  %6319 = vmatprep.subr.bf16.mxu0 %v10234_v51  ;;  %8822 = vmatprep.subr.bf16.mxu1 %v10251_v14  ;;  %v10275_v47 = vld [vmem:[%s13712_s8 + $0x360] ss:$28 sps:$4 sm:$0xff]   ;;  %v10245_v53 = vld [vmem:[%s13712_s8 + $0x198] ss:$28 sps:$4 sm:$0xff]  }
 0x43f   : > { %v4272_v23 = vadd.f32 %v4271_v21, %v12752_v12  ;;  %v4273_v24 = vpop.f32.mrb[78].mxu1  ;;  %6024 = vmatprep.mubr.bf16.mxu0 %v12864_v17  ;;  %6250 = vmatprep.mubr.bf16.mxu1 %v12864_v17  ;;  %v10276_v18 = vld [vmem:[%s13712_s8 + $0x1a0] ss:$28 sps:$4 sm:$0xff]   ;;  %v10283_v21 = vld [vmem:[%s13712_s8 + $0x558] ss:$28 sps:$4 sm:$0xff]  }
 0x440   : > { %v4274_v25 = vadd.f32 %v4273_v24, %v12742_v11  ;;  %v4275_v57 = vpop.f32.mrb[79].mxu1  ;;  %6025 = vmatmul.mubr.bf16.gmra.mrb[72].mxu0 %v12862_v48  ;;  %6251 = vmatmul.mubr.bf16.gmra.mrb[104].mxu1 %v12862_v48  ;;  %v4344_v55 = vmax.f32 %v4270_v2, 0.0  ;;  %v10250_v2 = vld [vmem:[%s13712_s8 + $0x1d4] ss:$28 sps:$4 sm:$0xff]  }
 0x441   : > { %v4276_v26 = vadd.f32 %v4275_v57, %v12752_v12  ;;  %6320 = vmatpush1.bf16.msra.mxu0 %v10232_v9  ;;  %8823 = vmatpush3.bf16.msra.mxu1 %v10252_v41  ;;  %v4345_v31 = vmax.f32 %v4272_v23, 0.0  ;;  %v10248_v57 = vld [vmem:[%s13712_s8 + $0x1d0] ss:$28 sps:$4 sm:$0xff]  }
 0x442   : > { %v4348_v13 = vmax.f32 %v4274_v25, 0.0  ;;  %6321 = vmatprep.subr.bf16.mxu0 %v10239_v22  ;;  %8824 = vmatprep.subr.bf16.mxu1 %v10259_v3 }
 0x443   : > { %v4349_v8 = vmax.f32 %v4276_v26, 0.0 }
 0x444   : > { %v12898_v35 = vpack.c.bf16 %v4348_v13, %v4344_v55 }
 0x445   : > { %v12900_v38 = vpack.c.bf16 %v4349_v8, %v4345_v31  ;;  %v4279_v39 = vpop.f32.mrb[80].mxu1  ;;  %6322 = vmatpush1.bf16.msra.mxu0 %v10237_v27  ;;  %8825 = vmatpush3.bf16.msra.mxu1 %v10260_v37  ;;  %v10255_v37 = vld [vmem:[%s13712_s8 + $0x20c] ss:$28 sps:$4 sm:$0xff]  }
 0x446   : > { %v4280_v45 = vadd.f32 %v4279_v39, %v12742_v11  ;;  %v4281_v46 = vpop.f32.mrb[81].mxu1  ;;  %6323 = vmatprep.subr.bf16.mxu0 %v10242_v30  ;;  %8826 = vmatprep.subr.bf16.mxu1 %v10267_v10  ;;  %v10253_v8 = vld [vmem:[%s13712_s8 + $0x208] ss:$28 sps:$4 sm:$0xff]  }
 0x447   : > { %v4282_v49 = vadd.f32 %v4281_v46, %v12752_v12  ;;  %v4283_v50 = vpop.f32.mrb[82].mxu1  ;;  %6034 = vmatprep.mubr.bf16.mxu0 %v12900_v38  ;;  %6260 = vmatprep.mubr.bf16.mxu1 %v12900_v38 }
 0x448   : > { %v4284_v51 = vadd.f32 %v4283_v50, %v12742_v11  ;;  %v4285_v14 = vpop.f32.mrb[83].mxu1  ;;  %6035 = vmatmul.mubr.bf16.gmra.mrb[76].mxu0 %v12898_v35  ;;  %6261 = vmatmul.mubr.bf16.gmra.mrb[108].mxu1 %v12898_v35  ;;  %v4352_v9 = vmax.f32 %v4280_v45, 0.0  ;;  %v10256_v50 = vld [vmem:[%s13712_s8 + $0x240] ss:$28 sps:$4 sm:$0xff]  }
 0x449   : > { %v4286_v5 = vadd.f32 %v4285_v14, %v12752_v12  ;;  %6324 = vmatpush1.bf16.msra.mxu0 %v10240_v29  ;;  %8827 = vmatpush3.bf16.msra.mxu1 %v10268_v1  ;;  %v4353_v22 = vmax.f32 %v4282_v49, 0.0  ;;  %v10258_v1 = vld [vmem:[%s13712_s8 + $0x244] ss:$28 sps:$4 sm:$0xff]  }
 0x44a   : > { %v4356_v41 = vmax.f32 %v4284_v51, 0.0  ;;  %6325 = vmatprep.subr.bf16.mxu0 %v10247_v16  ;;  %8828 = vmatprep.subr.bf16.mxu1 %v10275_v47 }
 0x44b   : > { %v4357_v3 = vmax.f32 %v4286_v5, 0.0  ;;  %v10263_v5 = vld [vmem:[%s13712_s8 + $0x27c] ss:$28 sps:$4 sm:$0xff]  }
 0x44c   : > { %v12934_v23 = vpack.c.bf16 %v4356_v41, %v4352_v9 }
 0x44d   : > { %v12936_v24 = vpack.c.bf16 %v4357_v3, %v4353_v22  ;;  %v4289_v25 = vpop.f32.mrb[84].mxu1  ;;  %6326 = vmatpush1.bf16.msra.mxu0 %v10245_v53  ;;  %8829 = vmatpush3.bf16.msra.mxu1 %v10276_v18 }
 0x44e   : > { %v4290_v26 = vadd.f32 %v4289_v25, %v12742_v11  ;;  %v4291_v27 = vpop.f32.mrb[85].mxu1  ;;  %6327 = vmatprep.subr.bf16.mxu0 %v10250_v2  ;;  %8878 = vmatprep.subr.bf16.mxu1 %v10283_v21  ;;  %v10261_v21 = vld [vmem:[%s13712_s8 + $0x278] ss:$28 sps:$4 sm:$0xff]  }
 0x44f   : > { %v4292_v55 = vadd.f32 %v4291_v27, %v12752_v12  ;;  %v4293_v13 = vpop.f32.mrb[86].mxu1  ;;  %6044 = vmatprep.mubr.bf16.mxu0 %v12936_v24  ;;  %6270 = vmatprep.mubr.bf16.mxu1 %v12936_v24  ;;  %v10266_v25 = vld [vmem:[%s13712_s8 + $0x2b4] ss:$28 sps:$4 sm:$0xff]  }
 0x450   : > { %v4294_v30 = vadd.f32 %v4293_v13, %v12742_v11  ;;  %v4295_v10 = vpop.f32.mrb[87].mxu1  ;;  %6045 = vmatmul.mubr.bf16.gmra.mrb[80].mxu0 %v12934_v23  ;;  %6271 = vmatmul.mubr.bf16.gmra.mrb[112].mxu1 %v12934_v23  ;;  %v4360_v39 = vmax.f32 %v4290_v26, 0.0  ;;  %v10264_v13 = vld [vmem:[%s13712_s8 + $0x2b0] ss:$28 sps:$4 sm:$0xff]  }
 0x451   : > { %v4296_v31 = vadd.f32 %v4295_v10, %v12752_v12  ;;  %6328 = vmatpush1.bf16.msra.mxu0 %v10248_v57  ;;  %v4361_v45 = vmax.f32 %v4292_v55, 0.0 }
 0x452   : > { %v4364_v29 = vmax.f32 %v4294_v30, 0.0  ;;  %6329 = vmatprep.subr.bf16.mxu0 %v10255_v37 }
 0x453   : > { %v4365_v46 = vmax.f32 %v4296_v31, 0.0  ;;  %v10271_v31 = vld [vmem:[%s13712_s8 + $0x2ec] ss:$28 sps:$4 sm:$0xff]  }
 0x454   : > { %v12958_v16 = vpack.c.bf16 %v4364_v29, %v4360_v39 }
 0x455   : > { %v12960_v47 = vpack.c.bf16 %v4365_v46, %v4361_v45  ;;  %v4299_v49 = vpop.f32.mrb[88].mxu1  ;;  %6330 = vmatpush1.bf16.msra.mxu0 %v10253_v8  ;;  %v10269_v46 = vld [vmem:[%s13712_s8 + $0x2e8] ss:$28 sps:$4 sm:$0xff]  }
 0x456   : > { %v4300_v51 = vadd.f32 %v4299_v49, %v12742_v11  ;;  %v4301_v14 = vpop.f32.mrb[89].mxu1  ;;  %6331 = vmatprep.subr.bf16.mxu0 %v10258_v1 }
 0x457   : > { %v4302_v53 = vadd.f32 %v4301_v14, %v12752_v12  ;;  %v4303_v18 = vpop.f32.mrb[90].mxu1  ;;  %6054 = vmatprep.mubr.bf16.mxu0 %v12960_v47  ;;  %6280 = vmatprep.mubr.bf16.mxu1 %v12960_v47 }
 0x458   : > { %v4304_v9 = vadd.f32 %v4303_v18, %v12742_v11  ;;  %v4305_v41 = vpop.f32.mrb[91].mxu1  ;;  %6055 = vmatmul.mubr.bf16.gmra.mrb[84].mxu0 %v12958_v16  ;;  %6281 = vmatmul.mubr.bf16.gmra.mrb[116].mxu1 %v12958_v16  ;;  %v4368_v22 = vmax.f32 %v4300_v51, 0.0  ;;  %v10274_v51 = vld [vmem:[%s13712_s8 + $0x324] ss:$28 sps:$4 sm:$0xff]   ;;  %v10279_v18 = vld [vmem:[%s13712_s8 + $0x35c] ss:$28 sps:$4 sm:$0xff]  }
 0x459   : > { %v4306_v2 = vadd.f32 %v4305_v41, %v12752_v12  ;;  %6332 = vmatpush1.bf16.msra.mxu0 %v10256_v50  ;;  %v4369_v57 = vmax.f32 %v4302_v53, 0.0  ;;  %v10282_v41 = vld [vmem:[%s13712_s8 + $0x394] ss:$28 sps:$4 sm:$0xff]  }
 0x45a   : > { %v4372_v3 = vmax.f32 %v4304_v9, 0.0  ;;  %6333 = vmatprep.subr.bf16.mxu0 %v10263_v5  ;;  %v10277_v9 = vld [vmem:[%s13712_s8 + $0x358] ss:$28 sps:$4 sm:$0xff]  }
 0x45b   : > { %v4373_v26 = vmax.f32 %v4306_v2, 0.0  ;;  %v10280_v2 = vld [vmem:[%s13712_s8 + $0x390] ss:$28 sps:$4 sm:$0xff]  }
 0x45c   : > { %v12982_v27 = vpack.c.bf16 %v4372_v3, %v4368_v22  ;;  %v10287_v22 = vld [vmem:[%s13712_s8 + $0x3cc] ss:$28 sps:$4 sm:$0xff]  }
 0x45d   : > { %v12984_v37 = vpack.c.bf16 %v4373_v26, %v4369_v57  ;;  %v4309_v55 = vpop.f32.mrb[92].mxu1  ;;  %6334 = vmatpush1.bf16.msra.mxu0 %v10261_v21  ;;  %v10284_v21 = vld [vmem:[%s13712_s8 + $0x398] ss:$28 sps:$4 sm:$0xff]   ;;  %v10285_v3 = vld [vmem:[%s13712_s8 + $0x3c8] ss:$28 sps:$4 sm:$0xff]  }
 0x45e   : > { %v4310_v30 = vadd.f32 %v4309_v55, %v12742_v11  ;;  %v4311_v10 = vpop.f32.mrb[93].mxu1  ;;  %6335 = vmatprep.subr.bf16.mxu0 %v10266_v25  ;;  %v10290_v25 = vld [vmem:[%s13712_s8 + $0x404] ss:$28 sps:$4 sm:$0xff]   ;;  %v10292_v57 = vld [vmem:[%s13712_s8 + $0x3d0] ss:$28 sps:$4 sm:$0xff]  }
 0x45f   : > { %v4312_v8 = vadd.f32 %v4311_v10, %v12752_v12  ;;  %v4313_v39 = vpop.f32.mrb[94].mxu1  ;;  %6064 = vmatprep.mubr.bf16.mxu0 %v12984_v37  ;;  %6290 = vmatprep.mubr.bf16.mxu1 %v12984_v37  ;;  %v10295_v26 = vld [vmem:[%s13712_s8 + $0x43c] ss:$28 sps:$4 sm:$0xff]   ;;  %v10300_v55 = vld [vmem:[%s13712_s8 + $0x408] ss:$28 sps:$4 sm:$0xff]  }
 0x460   : > { %v4314_v29 = vadd.f32 %v4313_v39, %v12742_v11  ;;  %v4315_v1 = vpop.f32.mrb[95].mxu1  ;;  %6065 = vmatmul.mubr.bf16.gmra.mrb[88].mxu0 %v12982_v27  ;;  %6291 = vmatmul.mubr.bf16.gmra.mrb[120].mxu1 %v12982_v27  ;;  %v4376_v49 = vmax.f32 %v4310_v30, 0.0  ;;  %v10293_v30 = vld [vmem:[%s13712_s8 + $0x438] ss:$28 sps:$4 sm:$0xff]  }
 0x461   : > { %v4316_v45 = vadd.f32 %v4315_v1, %v12752_v12  ;;  %6336 = vmatpush1.bf16.msra.mxu0 %v10264_v13  ;;  %v4377_v11 = vmax.f32 %v4312_v8, 0.0  ;;  %v10272_v12 = vld [vmem:[%s13712_s8 + $0x320] ss:$28 sps:$4 sm:$0xff]   ;;  %v10298_v10 = vld [vmem:[%s13712_s8 + $0x474] ss:$28 sps:$4 sm:$0xff]  }
 0x462   : > { %v4380_v50 = vmax.f32 %v4314_v29, 0.0  ;;  %6337 = vmatprep.subr.bf16.mxu0 %v10271_v31  ;;  %v10307_v13 = vld [vmem:[%s13712_s8 + $0x600] ss:$28 sps:$4 sm:$0xff]   ;;  %v10296_v31 = vld [vmem:[%s13712_s8 + $0x470] ss:$28 sps:$4 sm:$0xff]  }
 0x463   : > { %v4381_v14 = vmax.f32 %v4316_v45, 0.0  ;;  %v10315_v8 = vld [vmem:[%s13712_s8 + $0x638] ss:$28 sps:$4 sm:$0xff]   ;;  %v10301_v29 = vld [vmem:[%s13712_s8 + $0x4a8] ss:$28 sps:$4 sm:$0xff]  }
 0x464   : > { %v13006_v5 = vpack.c.bf16 %v4380_v50, %v4376_v49  ;;  %v10316_v39 = vld [vmem:[%s13712_s8 + $0x478] ss:$28 sps:$4 sm:$0xff]   ;;  %v10323_v1 = vld [vmem:[%s13712_s8 + $0x670] ss:$28 sps:$4 sm:$0xff]   ;;  %v10304_v45 = vld [vmem:[%s13712_s8 + $0x4e0] ss:$28 sps:$4 sm:$0xff]  }
 0x465   : > { %v13008_v53 = vpack.c.bf16 %v4381_v14, %v4377_v11  ;;  %6338 = vmatpush1.bf16.msra.mxu0 %v10269_v46  ;;  %v10311_v46 = vld [vmem:[%s13712_s8 + $0x51c] ss:$28 sps:$4 sm:$0xff]   ;;  %v10331_v49 = vld [vmem:[%s13712_s8 + $0x6a8] ss:$28 sps:$4 sm:$0xff]   ;;  %v10312_v11 = vld [vmem:[%s13712_s8 + $0x550] ss:$28 sps:$4 sm:$0xff]  }
 0x466   : > { %6339 = vmatprep.subr.bf16.mxu0 %v10274_v51  ;;  %v10309_v50 = vld [vmem:[%s13712_s8 + $0x518] ss:$28 sps:$4 sm:$0xff]   ;;  %v10339_v14 = vld [vmem:[%s13712_s8 + $0x6e0] ss:$28 sps:$4 sm:$0xff]  }
 0x467   : > { %6074 = vmatprep.mubr.bf16.mxu0 %v13008_v53  ;;  %6300 = vmatprep.mubr.bf16.mxu1 %v13008_v53  ;;  %v10314_v51 = vld [vmem:[%s13712_s8 + $0x554] ss:$28 sps:$4 sm:$0xff]  }
 0x468   : > { %6075 = vmatmul.mubr.bf16.gmra.mrb[92].mxu0 %v13006_v5  ;;  %6301 = vmatmul.mubr.bf16.gmra.mrb[124].mxu1 %v13006_v5 }
 0x469   : > { %6340 = vmatpush1.bf16.msra.mxu0 %v10272_v12  ;;  %6343 = vmatprep.mubr.bf16.mxu0 %v12496_v34  ;;  %v10340_v12 = vld [vmem:[%s13712_s8 + $0x520] ss:$28 sps:$4 sm:$0xff]  }
 0x46a   : > { %6569 = vmatprep.mubr.bf16.mxu1 %v12496_v34  ;;  %6341 = vmatprep.subr.bf16.mxu0 %v10279_v18  ;;  %v10291_v34 = vld [vmem:[%s13712_s8 + $0x590] ss:$28 sps:$4 sm:$0xff]   ;;  %v10317_v18 = vld [vmem:[%s13712_s8 + $0x588] ss:$28 sps:$4 sm:$0xff]  }
 0x46d   : > { %6342 = vmatpush1.bf16.msra.mxu0 %v10277_v9  ;;  %v10322_v9 = vld [vmem:[%s13712_s8 + $0x5c4] ss:$28 sps:$4 sm:$0xff]  }
 0x46e   : > { %6424 = vmatprep.subr.bf16.mxu0 %v10282_v41  ;;  %v10327_v41 = vld [vmem:[%s13712_s8 + $0x5fc] ss:$28 sps:$4 sm:$0xff]  }
 0x470   : > { %6344 = vmatmul.mubr.bf16.vlgmr.msra.gmra.mrb[96].mxu0 %v12494_v28  ;;  %6570 = vmatmul.mubr.bf16.vlgmr.msra.gmra.mrb[128].mxu1 %v12494_v28  ;;  %v10299_v28 = vld [vmem:[%s13712_s8 + $0x5c8] ss:$28 sps:$4 sm:$0xff]  }
 0x471   : > { %6353 = vmatprep.mubr.bf16.mxu0 %v12532_v43  ;;  %6425 = vmatpush1.bf16.msra.mxu0 %v10280_v2  ;;  %v10330_v2 = vld [vmem:[%s13712_s8 + $0x634] ss:$28 sps:$4 sm:$0xff]  }
 0x472   : > { %6577 = vmatprep.mubr.bf16.mxu1 %v12532_v43  ;;  %8879 = vmatpush3.bf16.msra.mxu1 %v10284_v21  ;;  %v10288_v43 = vld [vmem:[%s13712_s8 + $0x400] ss:$28 sps:$4 sm:$0xff]   ;;  %v10328_v21 = vld [vmem:[%s13712_s8 + $0x630] ss:$28 sps:$4 sm:$0xff]  }
 0x473   : > { %6426 = vmatprep.subr.bf16.mxu0 %v10287_v22  ;;  %8880 = vmatprep.subr.bf16.mxu1 %v10291_v34  ;;  %v10338_v22 = vld [vmem:[%s13712_s8 + $0x6a4] ss:$28 sps:$4 sm:$0xff]  }
 0x474   : > { %v10336_v34 = vld [vmem:[%s13712_s8 + $0x6a0] ss:$28 sps:$4 sm:$0xff]  }
 0x475   : > { %6427 = vmatpush1.bf16.msra.mxu0 %v10285_v3 }
 0x476   : > { %6428 = vmatprep.subr.bf16.mxu0 %v10290_v25  ;;  %8881 = vmatpush3.bf16.msra.mxu1 %v10292_v57 }
 0x477   : > { %8882 = vmatprep.subr.bf16.mxu1 %v10299_v28 }
 0x478   : > { %6354 = vmatmul.mubr.bf16.gmra.mrb[100].mxu0 %v12530_v42  ;;  %6578 = vmatmul.mubr.bf16.gmra.mrb[132].mxu1 %v12530_v42  ;;  %v10308_v42 = vld [vmem:[%s13712_s8 + $0x440] ss:$28 sps:$4 sm:$0xff]  }
 0x479   : > { %6363 = vmatprep.mubr.bf16.mxu0 %v12568_v20  ;;  %6429 = vmatpush1.bf16.msra.mxu0 %v10288_v43 }
 0x47a   : > { %6585 = vmatprep.mubr.bf16.mxu1 %v12568_v20  ;;  %6430 = vmatprep.subr.bf16.mxu0 %v10295_v26  ;;  %v10303_v20 = vld [vmem:[%s13712_s8 + $0x4ac] ss:$28 sps:$4 sm:$0xff]  }
 0x47b   : > { %8883 = vmatpush3.bf16.msra.mxu1 %v10300_v55 }
 0x47c   : > { %8884 = vmatprep.subr.bf16.mxu1 %v10307_v13 }
 0x47d   : > { %6431 = vmatpush1.bf16.msra.mxu0 %v10293_v30 }
 0x47e   : > { %6432 = vmatprep.subr.bf16.mxu0 %v10298_v10 }
 0x47f   : > { %8885 = vmatpush3.bf16.msra.mxu1 %v10308_v42 }
 0x480   : > { %6364 = vmatmul.mubr.bf16.gmra.mrb[104].mxu0 %v12566_v32  ;;  %6586 = vmatmul.mubr.bf16.gmra.mrb[136].mxu1 %v12566_v32  ;;  %v10306_v32 = vld [vmem:[%s13712_s8 + $0x4e4] ss:$28 sps:$4 sm:$0xff]  }
 0x481   : > { %6373 = vmatprep.mubr.bf16.mxu0 %v12604_v7  ;;  %6433 = vmatpush1.bf16.msra.mxu0 %v10296_v31 }
 0x482   : > { %6593 = vmatprep.mubr.bf16.mxu1 %v12604_v7  ;;  %6434 = vmatprep.subr.bf16.mxu0 %v10303_v20  ;;  %v10324_v7 = vld [vmem:[%s13712_s8 + $0x4b0] ss:$28 sps:$4 sm:$0xff]  }
 0x483   : > { %8886 = vmatprep.subr.bf16.mxu1 %v10315_v8 }
 0x484   : > { %8887 = vmatpush3.bf16.msra.mxu1 %v10316_v39 }
 0x485   : > { %6435 = vmatpush1.bf16.msra.mxu0 %v10301_v29  ;;  %8888 = vmatprep.subr.bf16.mxu1 %v10323_v1 }
 0x486   : > { %6436 = vmatprep.subr.bf16.mxu0 %v10306_v32 }
 0x488   : > { %6374 = vmatmul.mubr.bf16.gmra.mrb[108].mxu0 %v12602_v33  ;;  %6594 = vmatmul.mubr.bf16.gmra.mrb[140].mxu1 %v12602_v33  ;;  %v10332_v33 = vld [vmem:[%s13712_s8 + $0x4e8] ss:$28 sps:$4 sm:$0xff]  }
 0x489   : > { %6383 = vmatprep.mubr.bf16.mxu0 %v12640_v62  ;;  %6437 = vmatpush1.bf16.msra.mxu0 %v10304_v45 }
 0x48a   : > { %6601 = vmatprep.mubr.bf16.mxu1 %v12640_v62  ;;  %6438 = vmatprep.subr.bf16.mxu0 %v10311_v46  ;;  %v10319_v62 = vld [vmem:[%s13712_s8 + $0x58c] ss:$28 sps:$4 sm:$0xff]  }
 0x48b   : > { %8889 = vmatpush3.bf16.msra.mxu1 %v10324_v7 }
 0x48c   : > { %8890 = vmatprep.subr.bf16.mxu1 %v10331_v49 }
 0x48d   : > { %6439 = vmatpush1.bf16.msra.mxu0 %v10309_v50 }
 0x48e   : > { %6440 = vmatprep.subr.bf16.mxu0 %v10314_v51 }
 0x48f   : > { %8891 = vmatpush3.bf16.msra.mxu1 %v10332_v33 }
 0x490   : > { %6384 = vmatmul.mubr.bf16.gmra.mrb[112].mxu0 %v12638_v58  ;;  %6602 = vmatmul.mubr.bf16.gmra.mrb[144].mxu1 %v12638_v58  ;;  %v10320_v58 = vld [vmem:[%s13712_s8 + $0x5c0] ss:$28 sps:$4 sm:$0xff]  }
 0x491   : > { %6393 = vmatprep.mubr.bf16.mxu0 %v12676_v4  ;;  %6441 = vmatpush1.bf16.msra.mxu0 %v10312_v11 }
 0x492   : > { %6609 = vmatprep.mubr.bf16.mxu1 %v12676_v4  ;;  %6442 = vmatprep.subr.bf16.mxu0 %v10319_v62  ;;  %v10325_v4 = vld [vmem:[%s13712_s8 + $0x5f8] ss:$28 sps:$4 sm:$0xff]  }
 0x493   : > { %8892 = vmatprep.subr.bf16.mxu1 %v10339_v14 }
 0x494   : > { %8893 = vmatpush3.bf16.msra.mxu1 %v10340_v12 }
 0x495   : > { %6443 = vmatpush1.bf16.msra.mxu0 %v10317_v18 }
 0x496   : > { %6444 = vmatprep.subr.bf16.mxu0 %v10322_v9 }
 0x498   : > { %6394 = vmatmul.mubr.bf16.gmra.mrb[116].mxu0 %v12674_v19  ;;  %6610 = vmatmul.mubr.bf16.gmra.mrb[148].mxu1 %v12674_v19  ;;  %v10335_v19 = vld [vmem:[%s13712_s8 + $0x66c] ss:$28 sps:$4 sm:$0xff]  }
 0x499   : > { %6403 = vmatprep.mubr.bf16.mxu0 %v12712_v40  ;;  %6445 = vmatpush1.bf16.msra.mxu0 %v10320_v58 }
 0x49a   : > { %6617 = vmatprep.mubr.bf16.mxu1 %v12712_v40  ;;  %6446 = vmatprep.subr.bf16.mxu0 %v10327_v41  ;;  %v10333_v40 = vld [vmem:[%s13712_s8 + $0x668] ss:$28 sps:$4 sm:$0xff]  }
 0x49d   : > { %6447 = vmatpush1.bf16.msra.mxu0 %v10325_v4 }
 0x49e   : > { %6448 = vmatprep.subr.bf16.mxu0 %v10330_v2 }
 0x4a0   : > { %6404 = vmatmul.mubr.bf16.gmra.mrb[120].mxu0 %v12710_v44  ;;  %6618 = vmatmul.mubr.bf16.gmra.mrb[152].mxu1 %v12710_v44  ;;  %v10343_v44 = vld [vmem:[%s13712_s8 + $0x6dc] ss:$28 sps:$4 sm:$0xff]  }
 0x4a1   : > { %6413 = vmatprep.mubr.bf16.mxu0 %v12756_v6  ;;  %6449 = vmatpush1.bf16.msra.mxu0 %v10328_v21 }
 0x4a2   : > { %6625 = vmatprep.mubr.bf16.mxu1 %v12756_v6  ;;  %6450 = vmatprep.subr.bf16.mxu0 %v10335_v19  ;;  %v10341_v6 = vld [vmem:[%s13712_s8 + $0x6d8] ss:$28 sps:$4 sm:$0xff]  }
 0x4a5   : > { %6451 = vmatpush1.bf16.msra.mxu0 %v10333_v40 }
 0x4a6   : > { %6452 = vmatprep.subr.bf16.mxu0 %v10338_v22 }
 0x4a8   : > { %6414 = vmatmul.mubr.bf16.gmra.mrb[124].mxu0 %v12754_v15  ;;  %6626 = vmatmul.mubr.bf16.gmra.mrb[156].mxu1 %v12754_v15  ;;  %v4670_v15 = vld [vmem:[%s13713_s9] sm:$0xff] }
 0x4a9   : > { %6453 = vmatpush1.bf16.msra.mxu0 %v10336_v34  ;;  %6456 = vmatprep.mubr.bf16.mxu0 %v12792_v56 }
 0x4aa   : > { %6666 = vmatprep.mubr.bf16.mxu1 %v12792_v56  ;;  %6454 = vmatprep.subr.bf16.mxu0 %v10343_v44  ;;  %v13235_v56 = vrot.slane %v4670_v15, %v11764_v61 }
 0x4ad   : > { %6455 = vmatpush1.bf16.msra.mxu0 %v10341_v6 }
 0x4b0   : > { %6457 = vmatmul.mubr.bf16.vlgmr.msra.gmra.mrb[96].mxu0 %v12790_v52  ;;  %6667 = vmatmul.mubr.bf16.vlgmr.msra.gmra.mrb[160].mxu1 %v12790_v52  ;;  %v13232_v52 = vrot.slane %v4670_v15, %v11761_v60 }
 0x4b1   : > { %6466 = vmatprep.mubr.bf16.mxu0 %v12828_v54  ;;  %6674 = vmatprep.mubr.bf16.mxu1 %v12828_v54  ;;  %v13241_v54 = vrot.slane %v4670_v15, %v11773_v0 }
 0x4b8   : > { %6467 = vmatmul.mubr.bf16.gmra.mrb[100].mxu0 %v12826_v36  ;;  %6675 = vmatmul.mubr.bf16.gmra.mrb[164].mxu1 %v12826_v36  ;;  %v13238_v36 = vrot.slane %v4670_v15, %v11770_v63 }
 0x4b9   : > { %6476 = vmatprep.mubr.bf16.mxu0 %v12864_v17  ;;  %6682 = vmatprep.mubr.bf16.mxu1 %v12864_v17 }
 0x4c0   : > { %6477 = vmatmul.mubr.bf16.gmra.mrb[104].mxu0 %v12862_v48  ;;  %6683 = vmatmul.mubr.bf16.gmra.mrb[168].mxu1 %v12862_v48 }
 0x4c1   : > { %6486 = vmatprep.mubr.bf16.mxu0 %v12900_v38  ;;  %6690 = vmatprep.mubr.bf16.mxu1 %v12900_v38 }
 0x4c8   : > { %6487 = vmatmul.mubr.bf16.gmra.mrb[108].mxu0 %v12898_v35  ;;  %6691 = vmatmul.mubr.bf16.gmra.mrb[172].mxu1 %v12898_v35 }
 0x4c9   : > { %6496 = vmatprep.mubr.bf16.mxu0 %v12936_v24  ;;  %6698 = vmatprep.mubr.bf16.mxu1 %v12936_v24 }
 0x4d0   : > { %6497 = vmatmul.mubr.bf16.gmra.mrb[112].mxu0 %v12934_v23  ;;  %6699 = vmatmul.mubr.bf16.gmra.mrb[176].mxu1 %v12934_v23 }
 0x4d1   : > { %6506 = vmatprep.mubr.bf16.mxu0 %v12960_v47  ;;  %6706 = vmatprep.mubr.bf16.mxu1 %v12960_v47 }
 0x4d8   : > { %6507 = vmatmul.mubr.bf16.gmra.mrb[116].mxu0 %v12958_v16  ;;  %6707 = vmatmul.mubr.bf16.gmra.mrb[180].mxu1 %v12958_v16 }
 0x4d9   : > { %6516 = vmatprep.mubr.bf16.mxu0 %v12984_v37  ;;  %6714 = vmatprep.mubr.bf16.mxu1 %v12984_v37 }
 0x4e0   : > { %6517 = vmatmul.mubr.bf16.gmra.mrb[120].mxu0 %v12982_v27  ;;  %6715 = vmatmul.mubr.bf16.gmra.mrb[184].mxu1 %v12982_v27 }
 0x4e1   : > { %6526 = vmatprep.mubr.bf16.mxu0 %v13008_v53  ;;  %6722 = vmatprep.mubr.bf16.mxu1 %v13008_v53 }
 0x4e8   : > { %6527 = vmatmul.mubr.bf16.gmra.mrb[124].mxu0 %v13006_v5  ;;  %6723 = vmatmul.mubr.bf16.gmra.mrb[188].mxu1 %v13006_v5 }
 0x503   : > { %v6006_v48 = vpop.f32.mrb[64].mxu0  ;;  %v6232_v17 = vpop.f32.mrb[96].mxu1 }
 0x504   : > { %v9038_v35 = vadd.f32 %v6006_v48, %v13232_v52  ;;  %v9070_v38 = vadd.f32 %v6232_v17, %v13235_v56  ;;  %v6008_v23 = vpop.f32.mrb[65].mxu0  ;;  %v6234_v24 = vpop.f32.mrb[97].mxu1 }
 0x505   : > { %v9039_v60 = vadd.f32 %v6008_v23, %v13238_v36  ;;  %v9071_v16 = vadd.f32 %v6234_v24, %v13241_v54  ;;  %v6010_v61 = vpop.f32.mrb[66].mxu0  ;;  %v6236_v47 = vpop.f32.mrb[98].mxu1 }
 0x506   : > { %v8571_v27 = vmul.f32 -1.442695, %v9038_v35  ;;  %v8573_v63 = vmul.f32 -1.442695, %v9070_v38  ;;  %v9040_v37 = vadd.f32 %v6010_v61, %v13232_v52  ;;  %v9072_v0 = vadd.f32 %v6236_v47, %v13235_v56  ;;  %v6012_v5 = vpop.f32.mrb[67].mxu0  ;;  %v6238_v53 = vpop.f32.mrb[99].mxu1 }
 0x507   : > { %v8572_v3 = vmul.f32 -1.442695, %v9039_v60  ;;  %v8574_v25 = vmul.f32 -1.442695, %v9071_v16  ;;  %v9041_v57 = vadd.f32 %v6012_v5, %v13238_v36  ;;  %v9073_v28 = vadd.f32 %v6238_v53, %v13241_v54 }
 0x508   : > { %10376 = vpow2.f32 %v8571_v27  ;;  %v8578_v43 = vmul.f32 -1.442695, %v9040_v37  ;;  %v8580_v26 = vmul.f32 -1.442695, %v9072_v0 }
 0x509   : > { %10378 = vpow2.f32 %v8573_v63  ;;  %v8579_v55 = vmul.f32 -1.442695, %v9041_v57  ;;  %v8581_v13 = vmul.f32 -1.442695, %v9073_v28 }
 0x50a   : > { %10380 = vpow2.f32 %v8572_v3 }
 0x50b   : > { %10382 = vpow2.f32 %v8574_v25  ;;  %v6016_v30 = vpop.f32.mrb[68].mxu0  ;;  %v6242_v10 = vpop.f32.mrb[100].mxu1 }
 0x50c   : > { %10384 = vpow2.f32 %v8578_v43  ;;  %v9042_v42 = vadd.f32 %v6016_v30, %v13232_v52  ;;  %v9074_v31 = vadd.f32 %v6242_v10, %v13235_v56  ;;  %v6018_v20 = vpop.f32.mrb[69].mxu0  ;;  %v6244_v8 = vpop.f32.mrb[101].mxu1 }
 0x50d   : > { %10386 = vpow2.f32 %v8580_v26  ;;  %v9043_v39 = vadd.f32 %v6018_v20, %v13238_v36  ;;  %v9075_v29 = vadd.f32 %v6244_v8, %v13241_v54  ;;  %v6020_v1 = vpop.f32.mrb[70].mxu0  ;;  %v6246_v32 = vpop.f32.mrb[102].mxu1 }
 0x50e   : > { %10388 = vpow2.f32 %v8579_v55  ;;  %v8585_v45 = vmul.f32 -1.442695, %v9042_v42  ;;  %v8587_v46 = vmul.f32 -1.442695, %v9074_v31  ;;  %v9044_v7 = vadd.f32 %v6020_v1, %v13232_v52  ;;  %v6022_v49 = vpop.f32.mrb[71].mxu0  ;;  %v6248_v50 = vpop.f32.mrb[103].mxu1 }
 0x50f   : > { %10390 = vpow2.f32 %v8581_v13  ;;  %v8586_v51 = vmul.f32 -1.442695, %v9043_v39  ;;  %v8588_v33 = vmul.f32 -1.442695, %v9075_v29  ;;  %v9076_v61 = vadd.f32 %v6246_v32, %v13235_v56 }
 0x510   : > { %10392 = vpow2.f32 %v8585_v45  ;;  %v8592_v11 = vmul.f32 -1.442695, %v9044_v7  ;;  %v9045_v63 = vadd.f32 %v6022_v49, %v13238_v36  ;;  %v9077_v53 = vadd.f32 %v6248_v50, %v13241_v54 }
 0x511   : > { %10394 = vpow2.f32 %v8587_v46  ;;  %v8594_v10 = vmul.f32 -1.442695, %v9076_v61 }
 0x512   : > { %v10377_v62 = vpop.eup %10376  ;;  %10396 = vpow2.f32 %v8586_v51  ;;  %v8593_v29 = vmul.f32 -1.442695, %v9045_v63  ;;  %v8595_v46 = vmul.f32 -1.442695, %v9077_v53 }
 0x513   : > { %v10379_v14 = vpop.eup %10378  ;;  %v7067_v12 = vadd.f32 1.0, %v10377_v62  ;;  %10398 = vpow2.f32 %v8588_v33  ;;  %v6026_v18 = vpop.f32.mrb[72].mxu0 }
 0x514   : > { %v6252_v9 = vpop.f32.mrb[104].mxu1  ;;  %v10381_v58 = vpop.eup %10380  ;;  %v7069_v41 = vadd.f32 1.0, %v10379_v14  ;;  %10400 = vpow2.f32 %v8592_v11  ;;  %v9046_v43 = vadd.f32 %v6026_v18, %v13232_v52 }
 0x515   : > { %v6028_v4 = vpop.f32.mrb[73].mxu0  ;;  %v6254_v2 = vpop.f32.mrb[105].mxu1  ;;  %10402 = vrcp.f32 %v7067_v12  ;;  %v7068_v19 = vadd.f32 1.0, %v10381_v58  ;;  %v9078_v42 = vadd.f32 %v6252_v9, %v13235_v56 }
 0x516   : > { %v10383_v21 = vpop.eup %10382  ;;  %v6030_v40 = vpop.f32.mrb[74].mxu0  ;;  %10404 = vrcp.f32 %v7069_v41  ;;  %v9047_v1 = vadd.f32 %v6028_v4, %v13238_v36  ;;  %v9079_v7 = vadd.f32 %v6254_v2, %v13241_v54  ;;  %v8599_v50 = vmul.f32 -1.442695, %v9046_v43 }
 0x517   : > { %v6256_v22 = vpop.f32.mrb[106].mxu1  ;;  %v10385_v34 = vpop.eup %10384  ;;  %v7070_v44 = vadd.f32 1.0, %v10383_v21  ;;  %10406 = vrcp.f32 %v7068_v19  ;;  %v9048_v51 = vadd.f32 %v6030_v40, %v13232_v52  ;;  %v8601_v62 = vmul.f32 -1.442695, %v9078_v42 }
 0x518   : > { %v13256_v6 = vpop.f32.mrb[75].mxu0  ;;  %v10387_v15 = vpop.eup %10386  ;;  %v7074_v48 = vadd.f32 1.0, %v10385_v34  ;;  %v9080_v14 = vadd.f32 %v6256_v22, %v13235_v56  ;;  %v8600_v9 = vmul.f32 -1.442695, %v9047_v1  ;;  %v8602_v21 = vmul.f32 -1.442695, %v9079_v7 }
 0x519   : > { %v13258_v17 = vpop.f32.mrb[107].mxu1  ;;  %v10389_v35 = vpop.eup %10388  ;;  %10408 = vrcp.f32 %v7070_v44  ;;  %v7076_v38 = vadd.f32 1.0, %v10387_v15  ;;  %v9049_v58 = vadd.f32 %v13256_v6, %v13238_v36  ;;  %v8606_v44 = vmul.f32 -1.442695, %v9048_v51 }
 0x51a   : > { %v10391_v23 = vpop.eup %10390  ;;  %10410 = vrcp.f32 %v7074_v48  ;;  %v7075_v24 = vadd.f32 1.0, %v10389_v35  ;;  %v9081_v19 = vadd.f32 %v13258_v17, %v13241_v54 }
 0x51b   : > { %v10393_v60 = vpop.eup %10392  ;;  %10412 = vrcp.f32 %v7076_v38  ;;  %v7077_v16 = vadd.f32 1.0, %v10391_v23  ;;  %v6036_v37 = vpop.f32.mrb[76].mxu0  ;;  %v8608_v23 = vmul.f32 -1.442695, %v9080_v14 }
 0x51c   : > { %v10395_v47 = vpop.eup %10394  ;;  %10414 = vrcp.f32 %v7075_v24  ;;  %v7081_v27 = vadd.f32 1.0, %v10393_v60  ;;  %v6262_v3 = vpop.f32.mrb[108].mxu1  ;;  %v9050_v6 = vadd.f32 %v6036_v37, %v13232_v52  ;;  %v8609_v63 = vmul.f32 -1.442695, %v9081_v19 }
 0x51d   : > { %v10397_v0 = vpop.eup %10396  ;;  %10416 = vrcp.f32 %v7077_v16  ;;  %v7083_v5 = vadd.f32 1.0, %v10395_v47  ;;  %v13263_v25 = vpop.f32.mrb[77].mxu0  ;;  %v9082_v17 = vadd.f32 %v6262_v3, %v13235_v56  ;;  %v8607_v47 = vmul.f32 -1.442695, %v9049_v58 }
 0x51e   : > { %v10399_v57 = vpop.eup %10398  ;;  %10418 = vrcp.f32 %v7081_v27  ;;  %v7082_v28 = vadd.f32 1.0, %v10397_v0  ;;  %v13266_v26 = vpop.f32.mrb[109].mxu1 }
 0x51f   : > { %v13268_v55 = vpop.f32.mrb[78].mxu0  ;;  %v10401_v13 = vpop.eup %10400  ;;  %10420 = vrcp.f32 %v7083_v5  ;;  %v7084_v30 = vadd.f32 1.0, %v10399_v57  ;;  %v8613_v5 = vmul.f32 -1.442695, %v9050_v6 }
 0x520   : > { %v13271_v31 = vpop.f32.mrb[110].mxu1  ;;  %v13273_v20 = vpop.f32.mrb[79].mxu0  ;;  %10422 = vrcp.f32 %v7082_v28  ;;  %v7088_v39 = vadd.f32 1.0, %v10401_v13  ;;  %v8615_v28 = vmul.f32 -1.442695, %v9082_v17  ;;  %v9052_v17 = vadd.f32 %v13268_v55, %v13232_v52 }
 0x521   : > { %v10403_v8 = vpop.eup %10402  ;;  %v13276_v32 = vpop.f32.mrb[111].mxu1  ;;  %10424 = vrcp.f32 %v7084_v30  ;;  %v9051_v30 = vadd.f32 %v13263_v25, %v13238_v36 }
 0x522   : > { %v10405_v45 = vpop.eup %10404  ;;  %10426 = vrcp.f32 %v7088_v39 }
 0x523   : > { %v10407_v49 = vpop.eup %10406  ;;  %10428 = vpow2.f32 %v8594_v10  ;;  %v13290_v41 = vpop.f32.mrb[80].mxu0 }
 0x524   : > { %v10409_v33 = vpop.eup %10408  ;;  %v8750_v11 = vpack.c.bf16 %v10407_v49, %v10403_v8  ;;  %10430 = vpow2.f32 %v8593_v29  ;;  %v13292_v4 = vpop.f32.mrb[112].mxu1 }
 0x525   : > { %v10411_v12 = vpop.eup %10410  ;;  %v8751_v18 = vpack.c.bf16 %v10409_v33, %v10405_v45  ;;  %10432 = vpow2.f32 %v8595_v46  ;;  %v13297_v40 = vpop.f32.mrb[81].mxu0 }
 0x526   : > { %v10413_v2 = vpop.eup %10412  ;;  %7755 = vst [vmem:[%s13284_s25] sm:$0xff] %v8750_v11  ;;  %v13299_v22 = vpop.f32.mrb[113].mxu1  ;;  %10434 = vpow2.f32 %v8599_v50 }
 0x527   : > { %v10415_v34 = vpop.eup %10414  ;;  %7756 = vst [vmem:[%s13284_s25 + $0x8] sm:$0xff] %v8751_v18  ;;  %v13303_v15 = vpop.f32.mrb[82].mxu0  ;;  %10436 = vpow2.f32 %v8601_v62  ;;  %v9083_v62 = vadd.f32 %v13266_v26, %v13241_v54 }
 0x528   : > { %v6276_v48 = vpop.f32.mrb[114].mxu1  ;;  %v10417_v35 = vpop.eup %10416  ;;  %v8754_v38 = vpack.c.bf16 %v10415_v34, %v10411_v12  ;;  %10438 = vpow2.f32 %v8600_v9  ;;  %v13336_v9 = vmul.f32 -1.442695, %v9051_v30 }
 0x529   : > { %v13306_v24 = vpop.f32.mrb[83].mxu0  ;;  %v6278_v60 = vpop.f32.mrb[115].mxu1  ;;  %v8755_v61 = vpack.c.bf16 %v10417_v35, %v10413_v2  ;;  %10440 = vpow2.f32 %v8602_v21  ;;  %v13310_v37 = vadd.f32 %v6276_v48, %v13235_v56 }
 0x52a   : > { %v10419_v16 = vpop.eup %10418  ;;  %7759 = vst [vmem:[%s13284_s25 + $0x1c] sm:$0xff] %v8754_v38  ;;  %10442 = vpow2.f32 %v8606_v44  ;;  %v13314_v53 = vadd.f32 %v6278_v60, %v13241_v54 }
 0x52b   : > { %v10421_v27 = vpop.eup %10420  ;;  %7760 = vst [vmem:[%s13284_s25 + $0x24] sm:$0xff] %v8755_v61  ;;  %10444 = vpow2.f32 %v8608_v23  ;;  %v6056_v10 = vpop.f32.mrb[84].mxu0  ;;  %v13350_v23 = vmul.f32 -1.442695, %v9083_v62  ;;  %v9084_v61 = vadd.f32 %v13271_v31, %v13235_v56 }
 0x52c   : > { %v10423_v0 = vpop.eup %10422  ;;  %10446 = vpow2.f32 %v8607_v47  ;;  %v6282_v42 = vpop.f32.mrb[116].mxu1  ;;  %v13322_v39 = vadd.f32 %v6056_v10, %v13232_v52  ;;  %v9053_v47 = vadd.f32 %v13273_v20, %v13238_v36 }
 0x52d   : > { %v10425_v3 = vpop.eup %10424  ;;  %v8758_v57 = vpack.c.bf16 %v10423_v0, %v10419_v16  ;;  %10448 = vpow2.f32 %v8609_v63  ;;  %v13325_v29 = vadd.f32 %v6282_v42, %v13235_v56  ;;  %v6058_v1 = vpop.f32.mrb[85].mxu0 }
 0x52e   : > { %v13316_v43 = vpop.eup %10426  ;;  %v8759_v13 = vpack.c.bf16 %v10425_v3, %v10421_v27  ;;  %v6284_v45 = vpop.f32.mrb[117].mxu1  ;;  %10450 = vpow2.f32 %v8613_v5  ;;  %v13329_v49 = vadd.f32 %v6058_v1, %v13238_v36  ;;  %v9085_v5 = vadd.f32 %v13276_v32, %v13241_v54 }
 0x52f   : > { %v10429_v8 = vpop.eup %10428  ;;  %7763 = vst [vmem:[%s13284_s25 + $0x38] sm:$0xff] %v8758_v57  ;;  %v13332_v25 = vadd.f32 %v6284_v45, %v13241_v54  ;;  %v6060_v50 = vpop.f32.mrb[86].mxu0  ;;  %10452 = vpow2.f32 %v8615_v28  ;;  %v8620_v32 = vmul.f32 -1.442695, %v9052_v17 }
 0x530   : > { %v10431_v46 = vpop.eup %10430  ;;  %7764 = vst [vmem:[%s13284_s25 + $0x40] sm:$0xff] %v8759_v13  ;;  %v7090_v7 = vadd.f32 1.0, %v10429_v8  ;;  %v6286_v51 = vpop.f32.mrb[118].mxu1  ;;  %v13339_v19 = vadd.f32 %v6060_v50, %v13232_v52 }
 0x531   : > { %v10433_v33 = vpop.eup %10432  ;;  %v7089_v11 = vadd.f32 1.0, %v10431_v46  ;;  %v6062_v14 = vpop.f32.mrb[87].mxu0  ;;  %v13342_v34 = vadd.f32 %v6286_v51, %v13235_v56  ;;  %v8622_v51 = vmul.f32 -1.442695, %v9084_v61  ;;  %v9087_v61 = vadd.f32 %v13299_v22, %v13241_v54 }
 0x532   : > { %v10435_v12 = vpop.eup %10434  ;;  %10454 = vrcp.f32 %v7090_v7  ;;  %v7091_v18 = vadd.f32 1.0, %v10433_v33  ;;  %v6288_v58 = vpop.f32.mrb[119].mxu1  ;;  %v13345_v26 = vadd.f32 %v6062_v14, %v13238_v36  ;;  %v8621_v33 = vmul.f32 -1.442695, %v9053_v47 }
 0x533   : > { %v10437_v2 = vpop.eup %10436  ;;  %10456 = vrcp.f32 %v7089_v11  ;;  %v7095_v21 = vadd.f32 1.0, %v10435_v12  ;;  %v13348_v48 = vadd.f32 %v6288_v58, %v13241_v54  ;;  %v6066_v27 = vpop.f32.mrb[88].mxu0  ;;  %v9054_v12 = vadd.f32 %v13290_v41, %v13232_v52 }
 0x534   : > { %v10439_v44 = vpop.eup %10438  ;;  %10458 = vrcp.f32 %v7091_v18  ;;  %v7097_v6 = vadd.f32 1.0, %v10437_v2  ;;  %v13361_v3 = vadd.f32 %v6066_v27, %v13232_v52  ;;  %v6292_v55 = vpop.f32.mrb[120].mxu1 }
 0x535   : > { %v10441_v35 = vpop.eup %10440  ;;  %10460 = vrcp.f32 %v7095_v21  ;;  %v7096_v38 = vadd.f32 1.0, %v10439_v44  ;;  %v6068_v57 = vpop.f32.mrb[89].mxu0  ;;  %v13364_v31 = vadd.f32 %v6292_v55, %v13235_v56 }
 0x536   : > { %v10443_v60 = vpop.eup %10442  ;;  %10462 = vrcp.f32 %v7097_v6  ;;  %v7098_v16 = vadd.f32 1.0, %v10441_v35  ;;  %v13367_v20 = vadd.f32 %v6068_v57, %v13238_v36  ;;  %v6294_v30 = vpop.f32.mrb[121].mxu1  ;;  %v8623_v35 = vmul.f32 -1.442695, %v9085_v5 }
 0x537   : > { %v10445_v63 = vpop.eup %10444  ;;  %10464 = vrcp.f32 %v7096_v38  ;;  %v7102_v0 = vadd.f32 1.0, %v10443_v60  ;;  %v6070_v10 = vpop.f32.mrb[90].mxu0  ;;  %v13370_v1 = vadd.f32 %v6294_v30, %v13241_v54  ;;  %v9086_v38 = vadd.f32 %v13292_v4, %v13235_v56 }
 0x538   : > { %v10447_v28 = vpop.eup %10446  ;;  %10466 = vrcp.f32 %v7098_v16  ;;  %v7104_v13 = vadd.f32 1.0, %v10445_v63  ;;  %v6296_v45 = vpop.f32.mrb[122].mxu1  ;;  %v13375_v18 = vadd.f32 %v6070_v10, %v13232_v52  ;;  %v9055_v16 = vadd.f32 %v13297_v40, %v13238_v36 }
 0x539   : > { %v10449_v42 = vpop.eup %10448  ;;  %10468 = vrcp.f32 %v7102_v0  ;;  %v7103_v8 = vadd.f32 1.0, %v10447_v28  ;;  %v6072_v46 = vpop.f32.mrb[91].mxu0  ;;  %v13378_v21 = vadd.f32 %v6296_v45, %v13235_v56  ;;  %v8627_v4 = vmul.f32 -1.442695, %v9054_v12 }
 0x53a   : > { %v10451_v7 = vpop.eup %10450  ;;  %10470 = vrcp.f32 %v7104_v13  ;;  %v7105_v50 = vadd.f32 1.0, %v10449_v42  ;;  %v6298_v11 = vpop.f32.mrb[123].mxu1  ;;  %v13381_v44 = vadd.f32 %v6072_v46, %v13238_v36  ;;  %v9056_v10 = vadd.f32 %v13303_v15, %v13232_v52 }
 0x53b   : > { %v10453_v62 = vpop.eup %10452  ;;  %10472 = vrcp.f32 %v7103_v8  ;;  %v7109_v14 = vadd.f32 1.0, %v10451_v7  ;;  %v13386_v41 = vadd.f32 %v6298_v11, %v13241_v54  ;;  %v6076_v47 = vpop.f32.mrb[92].mxu0  ;;  %v9057_v15 = vadd.f32 %v13306_v24, %v13238_v36 }
 0x53c   : > { %v10455_v58 = vpop.eup %10454  ;;  %10474 = vrcp.f32 %v7105_v50  ;;  %v7111_v2 = vadd.f32 1.0, %v10453_v62  ;;  %v6302_v27 = vpop.f32.mrb[124].mxu1  ;;  %v13395_v5 = vadd.f32 %v6076_v47, %v13232_v52  ;;  %v8629_v50 = vmul.f32 -1.442695, %v9086_v38 }
 0x53d   : > { %v10457_v6 = vpop.eup %10456  ;;  %10476 = vrcp.f32 %v7109_v14  ;;  %v6078_v55 = vpop.f32.mrb[93].mxu0  ;;  %v13400_v40 = vadd.f32 %v6302_v27, %v13235_v56  ;;  %v8636_v24 = vmul.f32 -1.442695, %v13310_v37 }
 0x53e   : > { %v10459_v17 = vpop.eup %10458  ;;  %v8762_v60 = vpack.c.bf16 %v10457_v6, %v13316_v43  ;;  %10478 = vrcp.f32 %v7111_v2  ;;  %v6304_v43 = vpop.f32.mrb[125].mxu1  ;;  %v13403_v22 = vadd.f32 %v6078_v55, %v13238_v36 }
 0x53f   : > { %v10461_v63 = vpop.eup %10460  ;;  %v8763_v0 = vpack.c.bf16 %v10459_v17, %v10455_v58  ;;  %10480 = vpow2.f32 %v13336_v9  ;;  %v13406_v28 = vadd.f32 %v6304_v43, %v13241_v54  ;;  %v6080_v9 = vpop.f32.mrb[94].mxu0  ;;  %v8634_v58 = vmul.f32 -1.442695, %v9056_v10 }
 0x540   : > { %v10463_v57 = vpop.eup %10462  ;;  %7767 = vst [vmem:[%s13284_s25 + $0x54] sm:$0xff] %v8762_v60  ;;  %10482 = vpow2.f32 %v13350_v23  ;;  %v6306_v13 = vpop.f32.mrb[126].mxu1  ;;  %v13412_v23 = vadd.f32 %v6080_v9, %v13232_v52  ;;  %v8630_v52 = vmul.f32 -1.442695, %v9087_v61 }
 0x541   : > { %v10465_v30 = vpop.eup %10464  ;;  %7768 = vst [vmem:[%s13284_s25 + $0x5c] sm:$0xff] %v8763_v0  ;;  %10484 = vpow2.f32 %v8620_v32  ;;  %v13415_v42 = vadd.f32 %v6306_v13, %v13235_v56  ;;  %v6082_v8 = vpop.f32.mrb[95].mxu0  ;;  %v8628_v32 = vmul.f32 -1.442695, %v9055_v16 }
 0x542   : > { %v6308_v45 = vpop.f32.mrb[127].mxu1  ;;  %v10467_v46 = vpop.eup %10466  ;;  %v8766_v7 = vpack.c.bf16 %v10465_v30, %v10461_v63  ;;  %10486 = vpow2.f32 %v8622_v51  ;;  %v13421_v56 = vadd.f32 %v6082_v8, %v13238_v36  ;;  %v8635_v36 = vmul.f32 -1.442695, %v9057_v15 }
 0x543   : > { %v10469_v11 = vpop.eup %10468  ;;  %v8767_v62 = vpack.c.bf16 %v10467_v46, %v10463_v57  ;;  %10488 = vpow2.f32 %v8621_v33  ;;  %v13424_v12 = vadd.f32 %v6308_v45, %v13241_v54  ;;  %v8830_v6 = vpop.f32.mrb[128].mxu1 }
 0x544   : > { %v10471_v14 = vpop.eup %10470  ;;  %7771 = vst [vmem:[%s13284_s25 + $0x70] sm:$0xff] %v8766_v7  ;;  %10490 = vpow2.f32 %v8623_v35  ;;  %v8831_v17 = vpop.f32.mrb[129].mxu1 }
 0x545   : > { %v10473_v51 = vpop.eup %10472  ;;  %7772 = vst [vmem:[%s13284_s25 + $0x78] sm:$0xff] %v8767_v62  ;;  %10492 = vpow2.f32 %v8627_v4  ;;  %v13433_v60 = vadd.f32 %v8831_v17, %v8830_v6  ;;  %v8833_v16 = vpop.f32.mrb[130].mxu1  ;;  %v8637_v17 = vmul.f32 -1.442695, %v13314_v53  ;;  %v8642_v53 = vmul.f32 -1.442695, %v13329_v49 }
 0x546   : > { %v10475_v33 = vpop.eup %10474  ;;  %v8770_v2 = vpack.c.bf16 %v10473_v51, %v10469_v11  ;;  %10494 = vpow2.f32 %v8629_v50  ;;  %v8834_v47 = vpop.f32.mrb[131].mxu1 }
 0x547   : > { %v13428_v35 = vpop.eup %10476  ;;  %v8771_v38 = vpack.c.bf16 %v10475_v33, %v10471_v14  ;;  %10496 = vpow2.f32 %v8628_v32  ;;  %v13436_v63 = vadd.f32 %v8834_v47, %v8833_v16  ;;  %v8641_v47 = vmul.f32 -1.442695, %v13322_v39 }
 0x548   : > { %v13430_v54 = vpop.eup %10478  ;;  %7775 = vst [vmem:[%s13284_s25 + $0x8c] sm:$0xff] %v8770_v2  ;;  %10498 = vpow2.f32 %v8630_v52  ;;  %v8644_v39 = vmul.f32 -1.442695, %v13332_v25  ;;  %v8649_v25 = vmul.f32 -1.442695, %v13345_v26 }
 0x549   : > { %v10481_v61 = vpop.eup %10480  ;;  %7776 = vst [vmem:[%s13284_s25 + $0x94] sm:$0xff] %v8771_v38  ;;  %10500 = vpow2.f32 %v8634_v58 }
 0x54a   : > { %v10483_v27 = vpop.eup %10482  ;;  %v7110_v37 = vadd.f32 1.0, %v10481_v61  ;;  %10502 = vpow2.f32 %v8636_v24 }
 0x54b   : > { %v10485_v0 = vpop.eup %10484  ;;  %v7112_v4 = vadd.f32 1.0, %v10483_v27  ;;  %10504 = vpow2.f32 %v8635_v36  ;;  %v8836_v10 = vpop.f32.mrb[132].mxu1 }
 0x54c   : > { %v10487_v55 = vpop.eup %10486  ;;  %10506 = vrcp.f32 %v7110_v37  ;;  %v7116_v43 = vadd.f32 1.0, %v10485_v0  ;;  %v8837_v46 = vpop.f32.mrb[133].mxu1 }
 0x54d   : > { %v10489_v57 = vpop.eup %10488  ;;  %10508 = vrcp.f32 %v7112_v4  ;;  %v7118_v9 = vadd.f32 1.0, %v10487_v55  ;;  %v13438_v11 = vadd.f32 %v8837_v46, %v8836_v10  ;;  %v8839_v62 = vpop.f32.mrb[134].mxu1  ;;  %v8643_v4 = vmul.f32 -1.442695, %v13325_v29 }
 0x54e   : > { %v10491_v13 = vpop.eup %10490  ;;  %10510 = vrcp.f32 %v7116_v43  ;;  %v7117_v30 = vadd.f32 1.0, %v10489_v57  ;;  %v8840_v14 = vpop.f32.mrb[135].mxu1  ;;  %v8648_v29 = vmul.f32 -1.442695, %v13339_v19  ;;  %v8655_v19 = vmul.f32 -1.442695, %v13361_v3 }
 0x54f   : > { %v10493_v8 = vpop.eup %10492  ;;  %10512 = vrcp.f32 %v7118_v9  ;;  %v7119_v45 = vadd.f32 1.0, %v10491_v13  ;;  %v13440_v58 = vadd.f32 %v8840_v14, %v8839_v62  ;;  %v8651_v62 = vmul.f32 -1.442695, %v13348_v48 }
 0x550   : > { %v10495_v7 = vpop.eup %10494  ;;  %10514 = vrcp.f32 %v7117_v30  ;;  %v7123_v50 = vadd.f32 1.0, %v10493_v8  ;;  %v8658_v3 = vmul.f32 -1.442695, %v13370_v1 }
 0x551   : > { %v10497_v32 = vpop.eup %10496  ;;  %10516 = vrcp.f32 %v7119_v45  ;;  %v7125_v15 = vadd.f32 1.0, %v10495_v7  ;;  %v8650_v45 = vmul.f32 -1.442695, %v13342_v34  ;;  %v8657_v34 = vmul.f32 -1.442695, %v13364_v31 }
 0x552   : > { %v10499_v52 = vpop.eup %10498  ;;  %10518 = vrcp.f32 %v7123_v50  ;;  %v7124_v51 = vadd.f32 1.0, %v10497_v32 }
 0x553   : > { %v10501_v33 = vpop.eup %10500  ;;  %10520 = vrcp.f32 %v7125_v15  ;;  %v7126_v2 = vadd.f32 1.0, %v10499_v52  ;;  %v8842_v27 = vpop.f32.mrb[136].mxu1 }
 0x554   : > { %v10503_v24 = vpop.eup %10502  ;;  %10522 = vrcp.f32 %v7124_v51  ;;  %v7130_v6 = vadd.f32 1.0, %v10501_v33  ;;  %v8843_v55 = vpop.f32.mrb[137].mxu1 }
 0x555   : > { %v10505_v38 = vpop.eup %10504  ;;  %10524 = vrcp.f32 %v7126_v2  ;;  %v7132_v36 = vadd.f32 1.0, %v10503_v24  ;;  %v13448_v9 = vadd.f32 %v8843_v55, %v8842_v27  ;;  %v8845_v13 = vpop.f32.mrb[138].mxu1  ;;  %v8656_v2 = vmul.f32 -1.442695, %v13367_v20 }
 0x556   : > { %v10507_v16 = vpop.eup %10506  ;;  %10526 = vrcp.f32 %v7130_v6  ;;  %v7131_v61 = vadd.f32 1.0, %v10505_v38 }
 0x557   : > { %v10509_v37 = vpop.eup %10508  ;;  %v8774_v0 = vpack.c.bf16 %v10507_v16, %v13428_v35  ;;  %10528 = vrcp.f32 %v7132_v36  ;;  %v8846_v35 = vpop.f32.mrb[139].mxu1 }
 0x558   : > { %v10511_v43 = vpop.eup %10510  ;;  %v8775_v57 = vpack.c.bf16 %v10509_v37, %v13430_v54  ;;  %10530 = vrcp.f32 %v7131_v61  ;;  %v13454_v54 = vadd.f32 %v8846_v35, %v8845_v13 }
 0x559   : > { %v10513_v30 = vpop.eup %10512  ;;  %7779 = vst [vmem:[%s13284_s25 + $0xa8] sm:$0xff] %v8774_v0  ;;  %10532 = vpow2.f32 %v8637_v17 }
 0x55a   : > { %v10515_v10 = vpop.eup %10514  ;;  %7780 = vst [vmem:[%s13284_s25 + $0xb0] sm:$0xff] %v8775_v57  ;;  %10534 = vpow2.f32 %v8641_v47 }
 0x55b   : > { %v10517_v8 = vpop.eup %10516  ;;  %v8778_v49 = vpack.c.bf16 %v10515_v10, %v10511_v43  ;;  %10536 = vpow2.f32 %v8643_v4  ;;  %v8848_v15 = vpop.f32.mrb[140].mxu1 }
 0x55c   : > { %v10519_v46 = vpop.eup %10518  ;;  %v8779_v7 = vpack.c.bf16 %v10517_v8, %v10513_v30  ;;  %10538 = vpow2.f32 %v8642_v53  ;;  %v8849_v51 = vpop.f32.mrb[141].mxu1 }
 0x55d   : > { %v10521_v50 = vpop.eup %10520  ;;  %7783 = vst [vmem:[%s13284_s25 + $0xc4] sm:$0xff] %v8778_v49  ;;  %10540 = vpow2.f32 %v8644_v39  ;;  %v13464_v48 = vadd.f32 %v8849_v51, %v8848_v15  ;;  %v8851_v24 = vpop.f32.mrb[142].mxu1 }
 0x55e   : > { %v10523_v32 = vpop.eup %10522  ;;  %7784 = vst [vmem:[%s13284_s25 + $0xcc] sm:$0xff] %v8779_v7  ;;  %10542 = vpow2.f32 %v8648_v29  ;;  %v8852_v38 = vpop.f32.mrb[143].mxu1 }
 0x55f   : > { %v10525_v14 = vpop.eup %10524  ;;  %v8782_v52 = vpack.c.bf16 %v10523_v32, %v10519_v46  ;;  %10544 = vpow2.f32 %v8650_v45  ;;  %v13471_v31 = vadd.f32 %v8852_v38, %v8851_v24 }
 0x560   : > { %v10527_v26 = vpop.eup %10526  ;;  %v8783_v33 = vpack.c.bf16 %v10525_v14, %v10521_v50  ;;  %10546 = vpow2.f32 %v8649_v25 }
 0x561   : > { %v13466_v6 = vpop.eup %10528  ;;  %7787 = vst [vmem:[%s13284_s25 + $0xe0] sm:$0xff] %v8782_v52  ;;  %10548 = vpow2.f32 %v8651_v62 }
 0x562   : > { %v10531_v36 = vpop.eup %10530  ;;  %7788 = vst [vmem:[%s13284_s25 + $0xe8] sm:$0xff] %v8783_v33  ;;  %10550 = vpow2.f32 %v8655_v19 }
 0x563   : > { %v10533_v17 = vpop.eup %10532  ;;  %v8786_v16 = vpack.c.bf16 %v10531_v36, %v10527_v26  ;;  %10552 = vpow2.f32 %v8657_v34  ;;  %v8854_v1 = vpop.f32.mrb[144].mxu1  ;;  %v8662_v34 = vmul.f32 -1.442695, %v13375_v18  ;;  %v8665_v18 = vmul.f32 -1.442695, %v13386_v41 }
 0x564   : > { %v10535_v20 = vpop.eup %10534  ;;  %v7133_v61 = vadd.f32 1.0, %v10533_v17  ;;  %10554 = vpow2.f32 %v8656_v2  ;;  %v8855_v43 = vpop.f32.mrb[145].mxu1  ;;  %v8664_v2 = vmul.f32 -1.442695, %v13378_v21  ;;  %v8663_v17 = vmul.f32 -1.442695, %v13381_v44 }
 0x565   : > { %v10537_v47 = vpop.eup %10536  ;;  %7791 = vst [vmem:[%s13284_s25 + $0xfc] sm:$0xff] %v8786_v16  ;;  %v7137_v27 = vadd.f32 1.0, %v10535_v20  ;;  %10556 = vpow2.f32 %v8658_v3  ;;  %v13474_v13 = vadd.f32 %v8855_v43, %v8854_v1  ;;  %v8857_v30 = vpop.f32.mrb[146].mxu1  ;;  %v8669_v21 = vmul.f32 -1.442695, %v13395_v5 }
 0x566   : > { %v10539_v37 = vpop.eup %10538  ;;  %10558 = vrcp.f32 %v7133_v61  ;;  %v7139_v0 = vadd.f32 1.0, %v10537_v47  ;;  %v8858_v10 = vpop.f32.mrb[147].mxu1  ;;  %v8671_v44 = vmul.f32 -1.442695, %v13400_v40  ;;  %v8670_v41 = vmul.f32 -1.442695, %v13403_v22 }
 0x567   : > { %v10541_v4 = vpop.eup %10540  ;;  %10560 = vrcp.f32 %v7137_v27  ;;  %v7138_v55 = vadd.f32 1.0, %v10539_v37  ;;  %v13476_v49 = vadd.f32 %v8858_v10, %v8857_v30  ;;  %v4698_v27 = vsub.s32 6, %v11758_v59  ;;  %v13499_v40 = vld [vmem:[%s13713_s9] sm:$0xff] }
 0x568   : > { %v10543_v57 = vpop.eup %10542  ;;  %10562 = vrcp.f32 %v7139_v0  ;;  %v7140_v53 = vadd.f32 1.0, %v10541_v4 }
 0x569   : > { %v10545_v39 = vpop.eup %10544  ;;  %10564 = vrcp.f32 %v7138_v55  ;;  %v7144_v35 = vadd.f32 1.0, %v10543_v57  ;;  %v8672_v55 = vmul.f32 -1.442695, %v13406_v28  ;;  %v8676_v57 = vmul.f32 -1.442695, %v13412_v23 }
 0x56a   : > { %v10547_v29 = vpop.eup %10546  ;;  %10566 = vrcp.f32 %v7140_v53  ;;  %v7146_v8 = vadd.f32 1.0, %v10545_v39  ;;  %v13502_v53 = vrot.slane %v13499_v40, %v4698_v27  ;;  %v8678_v28 = vmul.f32 -1.442695, %v13415_v42 }
 0x56b   : > { %v10549_v45 = vpop.eup %10548  ;;  %10568 = vrcp.f32 %v7144_v35  ;;  %v7145_v46 = vadd.f32 1.0, %v10547_v29  ;;  %v8860_v15 = vpop.f32.mrb[148].mxu1 }
 0x56c   : > { %v10551_v7 = vpop.eup %10550  ;;  %10570 = vrcp.f32 %v7146_v8  ;;  %v7147_v25 = vadd.f32 1.0, %v10549_v45  ;;  %v8861_v51 = vpop.f32.mrb[149].mxu1  ;;  %v8677_v8 = vmul.f32 -1.442695, %v13421_v56 }
 0x56d   : > { %v10553_v50 = vpop.eup %10552  ;;  %10572 = vrcp.f32 %v7145_v46  ;;  %v7151_v62 = vadd.f32 1.0, %v10551_v7  ;;  %v13480_v24 = vadd.f32 %v8861_v51, %v8860_v15  ;;  %v8863_v3 = vpop.f32.mrb[150].mxu1  ;;  %v8679_v7 = vmul.f32 -1.442695, %v13424_v12 }
 0x56e   : > { %v10555_v32 = vpop.eup %10554  ;;  %10574 = vrcp.f32 %v7147_v25  ;;  %v7153_v19 = vadd.f32 1.0, %v10553_v50  ;;  %v8864_v16 = vpop.f32.mrb[151].mxu1 }
 0x56f   : > { %v10557_v14 = vpop.eup %10556  ;;  %10576 = vrcp.f32 %v7151_v62  ;;  %v7152_v52 = vadd.f32 1.0, %v10555_v32  ;;  %v13485_v61 = vadd.f32 %v8864_v16, %v8863_v3 }
 0x570   : > { %v10559_v26 = vpop.eup %10558  ;;  %10578 = vrcp.f32 %v7153_v19  ;;  %v7154_v33 = vadd.f32 1.0, %v10557_v14 }
 0x571   : > { %v10561_v38 = vpop.eup %10560  ;;  %v8787_v36 = vpack.c.bf16 %v10559_v26, %v13466_v6  ;;  %10580 = vrcp.f32 %v7152_v52 }
 0x572   : > { %v10563_v20 = vpop.eup %10562  ;;  %10582 = vrcp.f32 %v7154_v33  ;;  %v4690_v33 = vsub.s32 4, %v11758_v59 }
 0x573   : > { %v10565_v47 = vpop.eup %10564  ;;  %7792 = vst [vmem:[%s13284_s25 + $0x104] sm:$0xff] %v8787_v36  ;;  %10584 = vpow2.f32 %v8662_v34  ;;  %v8866_v43 = vpop.f32.mrb[152].mxu1 }
 0x574   : > { %v10567_v6 = vpop.eup %10566  ;;  %v8790_v37 = vpack.c.bf16 %v10565_v47, %v10561_v38  ;;  %10586 = vpow2.f32 %v8664_v2  ;;  %v8867_v22 = vpop.f32.mrb[153].mxu1 }
 0x575   : > { %v10569_v0 = vpop.eup %10568  ;;  %v8791_v1 = vpack.c.bf16 %v10567_v6, %v10563_v20  ;;  %10588 = vpow2.f32 %v8663_v17  ;;  %v8868_v35 = vadd.f32 %v8867_v22, %v8866_v43  ;;  %v8869_v10 = vpop.f32.mrb[154].mxu1  ;;  %v4694_v17 = vsub.s32 5, %v11758_v59 }
 0x576   : > { %v10571_v4 = vpop.eup %10570  ;;  %7795 = vst [vmem:[%s13284_s25 + $0x118] sm:$0xff] %v8790_v37  ;;  %10590 = vpow2.f32 %v8665_v18  ;;  %v8870_v45 = vpop.f32.mrb[155].mxu1 }
 0x577   : > { %v10573_v5 = vpop.eup %10572  ;;  %7796 = vst [vmem:[%s13284_s25 + $0x120] sm:$0xff] %v8791_v1  ;;  %10592 = vpow2.f32 %v8669_v21  ;;  %v13509_v25 = vadd.f32 %v8868_v35, %v13502_v53  ;;  %v8871_v50 = vadd.f32 %v8870_v45, %v8869_v10  ;;  %v6572_v35 = vadd.f32 %v13433_v60, %v13502_v53 }
 0x578   : > { %v10575_v30 = vpop.eup %10574  ;;  %v8794_v39 = vpack.c.bf16 %v10573_v5, %v10569_v0  ;;  %10594 = vpow2.f32 %v8671_v44  ;;  %v13523_v0 = vrot.slane %v13499_v40, %v4690_v33 }
 0x579   : > { %v10577_v29 = vpop.eup %10576  ;;  %v8795_v23 = vpack.c.bf16 %v10575_v30, %v10571_v4  ;;  %10596 = vpow2.f32 %v8670_v41  ;;  %v13513_v56 = vadd.f32 %v8871_v50, %v13502_v53  ;;  %v13529_v4 = vrot.slane %v13499_v40, %v4694_v17 }
 0x57a   : > { %v10579_v46 = vpop.eup %10578  ;;  %7799 = vst [vmem:[%s13284_s25 + $0x134] sm:$0xff] %v8794_v39  ;;  %10598 = vpow2.f32 %v8672_v55 }
 0x57b   : > { %v10581_v62 = vpop.eup %10580  ;;  %7800 = vst [vmem:[%s13284_s25 + $0x13c] sm:$0xff] %v8795_v23  ;;  %10600 = vpow2.f32 %v8676_v57  ;;  %v8872_v52 = vpop.f32.mrb[156].mxu1 }
 0x57c   : > { %v10583_v42 = vpop.eup %10582  ;;  %v8798_v32 = vpack.c.bf16 %v10581_v62, %v10577_v29  ;;  %10602 = vpow2.f32 %v8678_v28  ;;  %v8873_v26 = vpop.f32.mrb[157].mxu1 }
 0x57d   : > { %v10585_v19 = vpop.eup %10584  ;;  %v8799_v15 = vpack.c.bf16 %v10583_v42, %v10579_v46  ;;  %10604 = vpow2.f32 %v8677_v8  ;;  %v8874_v38 = vadd.f32 %v8873_v26, %v8872_v52  ;;  %v8875_v36 = vpop.f32.mrb[158].mxu1 }
 0x57e   : > { %v10587_v14 = vpop.eup %10586  ;;  %7803 = vst [vmem:[%s13284_s25 + $0x150] sm:$0xff] %v8798_v32  ;;  %v7158_v12 = vadd.f32 1.0, %v10585_v19  ;;  %10606 = vpow2.f32 %v8679_v7  ;;  %v8876_v18 = vpop.f32.mrb[159].mxu1 }
 0x57f   : > { %v10589_v34 = vpop.eup %10588  ;;  %7804 = vst [vmem:[%s13284_s25 + $0x158] sm:$0xff] %v8799_v15  ;;  %v7160_v51 = vadd.f32 1.0, %v10587_v14  ;;  %v13520_v27 = vadd.f32 %v8874_v38, %v13502_v53  ;;  %v8877_v6 = vadd.f32 %v8876_v18, %v8875_v36 }
 0x580   : > { %v10591_v2 = vpop.eup %10590  ;;  %10608 = vrcp.f32 %v7158_v12  ;;  %v7159_v3 = vadd.f32 1.0, %v10589_v34 }
 0x581   : > { %v10593_v16 = vpop.eup %10592  ;;  %10610 = vrcp.f32 %v7160_v51  ;;  %v7161_v20 = vadd.f32 1.0, %v10591_v2  ;;  %v13526_v41 = vadd.f32 %v8877_v6, %v13502_v53  ;;  %v6575_v51 = vadd.f32 %v13436_v63, %v13502_v53 }
 0x582   : > { %v10595_v47 = vpop.eup %10594  ;;  %10612 = vrcp.f32 %v7159_v3  ;;  %v7165_v21 = vadd.f32 1.0, %v10593_v16 }
 0x583   : > { %v10597_v37 = vpop.eup %10596  ;;  %10614 = vrcp.f32 %v7161_v20  ;;  %v7167_v44 = vadd.f32 1.0, %v10595_v47  ;;  %v6458_v22 = vpop.f32.mrb[96].mxu0 }
 0x584   : > { %v10599_v1 = vpop.eup %10598  ;;  %10616 = vrcp.f32 %v7165_v21  ;;  %v7166_v59 = vadd.f32 1.0, %v10597_v37  ;;  %v8894_v30 = vpop.f32.mrb[160].mxu1  ;;  %v9102_v10 = vadd.f32 %v6458_v22, %v13523_v0 }
 0x585   : > { %v10601_v55 = vpop.eup %10600  ;;  %10618 = vrcp.f32 %v7167_v44  ;;  %v7168_v43 = vadd.f32 1.0, %v10599_v1  ;;  %v6460_v29 = vpop.f32.mrb[97].mxu0 }
 0x586   : > { %v10603_v5 = vpop.eup %10602  ;;  %10620 = vrcp.f32 %v7166_v59  ;;  %v7172_v57 = vadd.f32 1.0, %v10601_v55  ;;  %v8895_v23 = vpop.f32.mrb[161].mxu1  ;;  %v9103_v45 = vadd.f32 %v6460_v29, %v13529_v4  ;;  %v8575_v42 = vmul.f32 -1.442695, %v9102_v10 }
 0x587   : > { %v10605_v39 = vpop.eup %10604  ;;  %10622 = vrcp.f32 %v7168_v43  ;;  %v7174_v28 = vadd.f32 1.0, %v10603_v5  ;;  %v8896_v46 = vadd.f32 %v8895_v23, %v8894_v30  ;;  %v6462_v7 = vpop.f32.mrb[98].mxu0  ;;  %v6580_v55 = vadd.f32 %v13438_v11, %v13502_v53 }
 0x588   : > { %v10607_v40 = vpop.eup %10606  ;;  %10624 = vrcp.f32 %v7172_v57  ;;  %v7173_v8 = vadd.f32 1.0, %v10605_v39  ;;  %v8897_v50 = vpop.f32.mrb[162].mxu1  ;;  %v9104_v32 = vadd.f32 %v6462_v7, %v13523_v0  ;;  %v8576_v14 = vmul.f32 -1.442695, %v9103_v45 }
 0x589   : > { %10626 = vrcp.f32 %v7174_v28  ;;  %v7175_v62 = vadd.f32 1.0, %v10607_v40  ;;  %v6464_v19 = vpop.f32.mrb[99].mxu0  ;;  %v8898_v15 = vpop.f32.mrb[163].mxu1  ;;  %v6669_v12 = vadd.f32 %v8896_v46, %v6572_v35  ;;  %v6583_v7 = vadd.f32 %v13440_v58, %v13502_v53 }
 0x58a   : > { %v10609_v60 = vpop.eup %10608  ;;  %10628 = vrcp.f32 %v7173_v8  ;;  %v9105_v52 = vadd.f32 %v6464_v19, %v13529_v4  ;;  %v8582_v26 = vmul.f32 -1.442695, %v9104_v32  ;;  %v8899_v33 = vadd.f32 %v8898_v15, %v8897_v50 }
 0x58b   : > { %v10611_v34 = vpop.eup %10610  ;;  %10630 = vrcp.f32 %v7175_v62  ;;  %v8577_v3 = vmul.f32 -1.442695, %v6669_v12  ;;  %v6468_v47 = vpop.f32.mrb[100].mxu0 }
 0x58c   : > { %v10613_v2 = vpop.eup %10612  ;;  %10632 = vpow2.f32 %v8575_v42  ;;  %v8583_v38 = vmul.f32 -1.442695, %v9105_v52  ;;  %v6672_v16 = vadd.f32 %v8899_v33, %v6575_v51  ;;  %v8900_v21 = vpop.f32.mrb[164].mxu1  ;;  %v9106_v37 = vadd.f32 %v6468_v47, %v13523_v0 }
 0x58d   : > { %v10615_v36 = vpop.eup %10614  ;;  %v8802_v17 = vpack.c.bf16 %v10613_v2, %v10609_v60  ;;  %10634 = vpow2.f32 %v8576_v14  ;;  %v6470_v44 = vpop.f32.mrb[101].mxu0 }
 0x58e   : > { %v10617_v20 = vpop.eup %10616  ;;  %v8803_v18 = vpack.c.bf16 %v10615_v36, %v10611_v34  ;;  %10636 = vpow2.f32 %v8577_v3  ;;  %v8584_v63 = vmul.f32 -1.442695, %v6672_v16  ;;  %v8901_v1 = vpop.f32.mrb[165].mxu1  ;;  %v9107_v43 = vadd.f32 %v6470_v44, %v13529_v4 }
 0x58f   : > { %v10619_v6 = vpop.eup %10618  ;;  %7807 = vst [vmem:[%s13284_s25 + $0x16c] sm:$0xff] %v8802_v17  ;;  %10638 = vpow2.f32 %v8582_v26  ;;  %v8902_v5 = vadd.f32 %v8901_v1, %v8900_v21  ;;  %v6472_v57 = vpop.f32.mrb[102].mxu0  ;;  %v8589_v28 = vmul.f32 -1.442695, %v9106_v37 }
 0x590   : > { %v10621_v59 = vpop.eup %10620  ;;  %7808 = vst [vmem:[%s13284_s25 + $0x174] sm:$0xff] %v8803_v18  ;;  %10640 = vpow2.f32 %v8583_v38  ;;  %v8903_v22 = vpop.f32.mrb[166].mxu1  ;;  %v9108_v35 = vadd.f32 %v6472_v57, %v13523_v0  ;;  %v8590_v8 = vmul.f32 -1.442695, %v9107_v43  ;;  %v6588_v38 = vadd.f32 %v13448_v9, %v13502_v53 }
 0x591   : > { %v10623_v30 = vpop.eup %10622  ;;  %v8806_v39 = vpack.c.bf16 %v10621_v59, %v10617_v20  ;;  %10642 = vpow2.f32 %v8584_v63  ;;  %v6474_v10 = vpop.f32.mrb[103].mxu0  ;;  %v6677_v11 = vadd.f32 %v8902_v5, %v6580_v55  ;;  %v6591_v59 = vadd.f32 %v13454_v54, %v13502_v53 }
 0x592   : > { %v8904_v29 = vpop.f32.mrb[167].mxu1  ;;  %v10625_v23 = vpop.eup %10624  ;;  %v8807_v40 = vpack.c.bf16 %v10623_v30, %v10619_v6  ;;  %v9109_v45 = vadd.f32 %v6474_v10, %v13529_v4  ;;  %10644 = vpow2.f32 %v8589_v28  ;;  %v8596_v50 = vmul.f32 -1.442695, %v9108_v35 }
 0x593   : > { %v10627_v46 = vpop.eup %10626  ;;  %7811 = vst [vmem:[%s13284_s25 + $0x188] sm:$0xff] %v8806_v39  ;;  %v8905_v62 = vadd.f32 %v8904_v29, %v8903_v22  ;;  %10646 = vpow2.f32 %v8590_v8  ;;  %v8591_v32 = vmul.f32 -1.442695, %v6677_v11  ;;  %v6478_v34 = vpop.f32.mrb[104].mxu0  ;;  %v6596_v54 = vadd.f32 %v13464_v48, %v13502_v53 }
 0x594   : > { %v10629_v42 = vpop.eup %10628  ;;  %7812 = vst [vmem:[%s13284_s25 + $0x190] sm:$0xff] %v8807_v40  ;;  %v8597_v19 = vmul.f32 -1.442695, %v9109_v45  ;;  %10648 = vpow2.f32 %v8596_v50  ;;  %v8906_v51 = vpop.f32.mrb[168].mxu1  ;;  %v9110_v5 = vadd.f32 %v6478_v34, %v13523_v0 }
 0x595   : > { %v10631_v15 = vpop.eup %10630  ;;  %v8810_v60 = vpack.c.bf16 %v10629_v42, %v10625_v23  ;;  %v6680_v14 = vadd.f32 %v8905_v62, %v6583_v7  ;;  %10650 = vpow2.f32 %v8591_v32  ;;  %v6480_v33 = vpop.f32.mrb[105].mxu0 }
 0x596   : > { %v10633_v12 = vpop.eup %10632  ;;  %v8811_v52 = vpack.c.bf16 %v10631_v15, %v10627_v46  ;;  %10652 = vpow2.f32 %v8597_v19  ;;  %v8907_v2 = vpop.f32.mrb[169].mxu1  ;;  %v9111_v28 = vadd.f32 %v6480_v33, %v13529_v4  ;;  %v8603_v7 = vmul.f32 -1.442695, %v9110_v5 }
 0x597   : > { %v10635_v58 = vpop.eup %10634  ;;  %7815 = vst [vmem:[%s13284_s25 + $0x1a4] sm:$0xff] %v8810_v60  ;;  %v7071_v26 = vadd.f32 1.0, %v10633_v12  ;;  %v8908_v17 = vadd.f32 %v8907_v2, %v8906_v51  ;;  %v6482_v16 = vpop.f32.mrb[106].mxu0  ;;  %v8598_v9 = vmul.f32 -1.442695, %v6680_v14 }
 0x598   : > { %v10637_v3 = vpop.eup %10636  ;;  %7816 = vst [vmem:[%s13284_s25 + $0x1ac] sm:$0xff] %v8811_v52  ;;  %v7072_v36 = vadd.f32 1.0, %v10635_v58  ;;  %v8909_v20 = vpop.f32.mrb[170].mxu1  ;;  %v9112_v50 = vadd.f32 %v6482_v16, %v13523_v0  ;;  %v8604_v52 = vmul.f32 -1.442695, %v9111_v28 }
 0x599   : > { %v10639_v18 = vpop.eup %10638  ;;  %10654 = vrcp.f32 %v7071_v26  ;;  %v7073_v47 = vadd.f32 1.0, %v10637_v3  ;;  %v6484_v21 = vpop.f32.mrb[107].mxu0  ;;  %v6685_v44 = vadd.f32 %v8908_v17, %v6588_v38  ;;  %v6599_v3 = vadd.f32 %v13471_v31, %v13502_v53 }
 0x59a   : > { %v8910_v6 = vpop.f32.mrb[171].mxu1  ;;  %v10641_v63 = vpop.eup %10640  ;;  %10656 = vrcp.f32 %v7072_v36  ;;  %v7078_v37 = vadd.f32 1.0, %v10639_v18  ;;  %v9113_v15 = vadd.f32 %v6484_v21, %v13529_v4  ;;  %v8610_v38 = vmul.f32 -1.442695, %v9112_v50 }
 0x59b   : > { %v10643_v1 = vpop.eup %10642  ;;  %10658 = vrcp.f32 %v7073_v47  ;;  %v7079_v55 = vadd.f32 1.0, %v10641_v63  ;;  %v8911_v57 = vadd.f32 %v8910_v6, %v8909_v20  ;;  %v6488_v10 = vpop.f32.mrb[108].mxu0  ;;  %v8605_v34 = vmul.f32 -1.442695, %v6685_v44 }
 0x59c   : > { %10660 = vrcp.f32 %v7078_v37  ;;  %v7080_v43 = vadd.f32 1.0, %v10643_v1  ;;  %v10645_v22 = vpop.eup %10644  ;;  %v8912_v29 = vpop.f32.mrb[172].mxu1  ;;  %v9114_v58 = vadd.f32 %v6488_v10, %v13523_v0  ;;  %v8611_v16 = vmul.f32 -1.442695, %v9113_v15 }
 0x59d   : > { %10662 = vrcp.f32 %v7079_v55  ;;  %v10647_v30 = vpop.eup %10646  ;;  %v7085_v39 = vadd.f32 1.0, %v10645_v22  ;;  %v6688_v35 = vadd.f32 %v8911_v57, %v6591_v59  ;;  %v6490_v8 = vpop.f32.mrb[109].mxu0 }
 0x59e   : > { %10664 = vrcp.f32 %v7080_v43  ;;  %v10649_v23 = vpop.eup %10648  ;;  %v7086_v40 = vadd.f32 1.0, %v10647_v30  ;;  %v8913_v11 = vpop.f32.mrb[173].mxu1  ;;  %v9115_v20 = vadd.f32 %v6490_v8, %v13529_v4  ;;  %v8617_v31 = vmul.f32 -1.442695, %v9114_v58 }
 0x59f   : > { %10666 = vpow2.f32 %v8598_v9  ;;  %v10651_v45 = vpop.eup %10650  ;;  %v7092_v46 = vadd.f32 1.0, %v10649_v23  ;;  %v6492_v62 = vpop.f32.mrb[110].mxu0  ;;  %v8914_v60 = vadd.f32 %v8913_v11, %v8912_v29  ;;  %v8612_v21 = vmul.f32 -1.442695, %v6688_v35 }
 0x5a0   : > { %10668 = vrcp.f32 %v7085_v39  ;;  %v8915_v42 = vpop.f32.mrb[174].mxu1  ;;  %v10653_v32 = vpop.eup %10652  ;;  %v7087_v19 = vadd.f32 1.0, %v10651_v45  ;;  %v9116_v1 = vadd.f32 %v6492_v62, %v13523_v0  ;;  %v6604_v43 = vadd.f32 %v13474_v13, %v13502_v53 }
 0x5a1   : > { %10670 = vrcp.f32 %v7086_v40  ;;  %v6494_v14 = vpop.f32.mrb[111].mxu0  ;;  %v8916_v48 = vpop.f32.mrb[175].mxu1  ;;  %v7093_v12 = vadd.f32 1.0, %v10653_v32  ;;  %v6693_v26 = vadd.f32 %v8914_v60, %v6596_v54  ;;  %v8618_v35 = vmul.f32 -1.442695, %v9115_v20 }
 0x5a2   : > { %10672 = vrcp.f32 %v7092_v46  ;;  %v8917_v33 = vadd.f32 %v8916_v48, %v8915_v42  ;;  %v9117_v57 = vadd.f32 %v6494_v14, %v13529_v4  ;;  %v6607_v13 = vadd.f32 %v13476_v49, %v13502_v53 }
 0x5a3   : > { %v10655_v51 = vpop.eup %10654  ;;  %10674 = vrcp.f32 %v7087_v19  ;;  %v13567_v63 = vpop.f32.mrb[112].mxu0  ;;  %v8619_v8 = vmul.f32 -1.442695, %v6693_v26  ;;  %v8624_v45 = vmul.f32 -1.442695, %v9116_v1  ;;  %v6612_v26 = vadd.f32 %v13480_v24, %v13502_v53 }
 0x5a4   : > { %v10657_v2 = vpop.eup %10656  ;;  %10676 = vrcp.f32 %v7093_v12  ;;  %v6696_v6 = vadd.f32 %v8917_v33, %v6599_v3  ;;  %v8918_v37 = vpop.f32.mrb[176].mxu1  ;;  %v8625_v42 = vmul.f32 -1.442695, %v9117_v57  ;;  %v6615_v1 = vadd.f32 %v13485_v61, %v13502_v53 }
 0x5a5   : > { %v10659_v36 = vpop.eup %10658  ;;  %v8752_v17 = vpack.c.bf16 %v10657_v2, %v10655_v51  ;;  %10678 = vpow2.f32 %v8603_v7  ;;  %v13571_v59 = vpop.f32.mrb[113].mxu0 }
 0x5a6   : > { %v10661_v18 = vpop.eup %10660  ;;  %v8753_v47 = vpack.c.bf16 %v10659_v36, %v10659_v36  ;;  %10680 = vpow2.f32 %v8604_v52  ;;  %v8919_v55 = vpop.f32.mrb[177].mxu1  ;;  %v8626_v49 = vmul.f32 -1.442695, %v6696_v6 }
 0x5a7   : > { %v10663_v44 = vpop.eup %10662  ;;  %7757 = vst [vmem:[%s13284_s25 + $0x10] sm:$0xff] %v8752_v17  ;;  %10682 = vpow2.f32 %v8605_v34  ;;  %v13577_v22 = vpop.f32.mrb[114].mxu0  ;;  %v8920_v10 = vadd.f32 %v8919_v55, %v8918_v37 }
 0x5a8   : > { %v10665_v9 = vpop.eup %10664  ;;  %7758 = vst [vmem:[%s13284_s25 + $0x18] sm:$0xf] %v8753_v47  ;;  %v8756_v5 = vpack.c.bf16 %v10663_v44, %v10661_v18  ;;  %10684 = vpow2.f32 %v8610_v38  ;;  %v8921_v30 = vpop.f32.mrb[178].mxu1  ;;  %v9120_v61 = vadd.f32 %v13577_v22, %v13523_v0 }
 0x5a9   : > { %v10667_v39 = vpop.eup %10666  ;;  %v8757_v28 = vpack.c.bf16 %v10665_v9, %v10665_v9  ;;  %10686 = vpow2.f32 %v8611_v16  ;;  %v13579_v29 = vpop.f32.mrb[115].mxu0  ;;  %v13585_v46 = vadd.f32 %v8920_v10, %v6604_v43  ;;  %v9118_v16 = vadd.f32 %v13567_v63, %v13523_v0 }
 0x5aa   : > { %v8922_v23 = vpop.f32.mrb[179].mxu1  ;;  %v10669_v54 = vpop.eup %10668  ;;  %7761 = vst [vmem:[%s13284_s25 + $0x2c] sm:$0xff] %v8756_v5  ;;  %v7094_v40 = vadd.f32 1.0, %v10667_v39  ;;  %10688 = vpow2.f32 %v8612_v21  ;;  %v9119_v21 = vadd.f32 %v13571_v59, %v13529_v4 }
 0x5ab   : > { %v10671_v11 = vpop.eup %10670  ;;  %7762 = vst [vmem:[%s13284_s25 + $0x34] sm:$0xf] %v8757_v28  ;;  %10690 = vpow2.f32 %v8617_v31  ;;  %v8923_v7 = vadd.f32 %v8922_v23, %v8921_v30  ;;  %v13590_v14 = vpop.f32.mrb[116].mxu0  ;;  %v8631_v5 = vmul.f32 -1.442695, %v9118_v16 }
 0x5ac   : > { %v10673_v50 = vpop.eup %10672  ;;  %v8760_v62 = vpack.c.bf16 %v10671_v11, %v10669_v54  ;;  %10692 = vrcp.f32 %v7094_v40  ;;  %v8924_v48 = vpop.f32.mrb[180].mxu1  ;;  %v8632_v59 = vmul.f32 -1.442695, %v9119_v21  ;;  %v9121_v11 = vadd.f32 %v13579_v29, %v13529_v4 }
 0x5ad   : > { %v10675_v32 = vpop.eup %10674  ;;  %10694 = vpow2.f32 %v8618_v35  ;;  %v13587_v19 = vadd.f32 %v8923_v7, %v6607_v13  ;;  %v13592_v34 = vpop.f32.mrb[117].mxu0  ;;  %v8633_v22 = vmul.f32 -1.442695, %v13585_v46  ;;  %v9122_v29 = vadd.f32 %v13590_v14, %v13523_v0 }
 0x5ae   : > { %v10677_v15 = vpop.eup %10676  ;;  %7765 = vst [vmem:[%s13284_s25 + $0x48] sm:$0xff] %v8760_v62  ;;  %v8761_v60 = vpack.c.bf16 %v10675_v32, %v10675_v32  ;;  %10696 = vpow2.f32 %v8619_v8  ;;  %v8925_v51 = vpop.f32.mrb[181].mxu1 }
 0x5af   : > { %v10679_v12 = vpop.eup %10678  ;;  %v8764_v52 = vpack.c.bf16 %v10677_v15, %v10673_v50  ;;  %10698 = vpow2.f32 %v8624_v45  ;;  %v8926_v2 = vadd.f32 %v8925_v51, %v8924_v48  ;;  %v13597_v3 = vpop.f32.mrb[118].mxu0  ;;  %v8640_v16 = vmul.f32 -1.442695, %v13587_v19 }
 0x5b0   : > { %v10681_v58 = vpop.eup %10680  ;;  %7766 = vst [vmem:[%s13284_s25 + $0x50] sm:$0xf] %v8761_v60  ;;  %v7099_v33 = vadd.f32 1.0, %v10679_v12  ;;  %10700 = vpow2.f32 %v8625_v42  ;;  %v8927_v38 = vpop.f32.mrb[182].mxu1 }
 0x5b1   : > { %v10683_v36 = vpop.eup %10682  ;;  %7769 = vst [vmem:[%s13284_s25 + $0x64] sm:$0xff] %v8764_v52  ;;  %v7100_v17 = vadd.f32 1.0, %v10681_v58  ;;  %10702 = vpow2.f32 %v8626_v49  ;;  %v13602_v20 = vpop.f32.mrb[119].mxu0  ;;  %v13606_v6 = vadd.f32 %v8926_v2, %v6612_v26  ;;  %v9123_v2 = vadd.f32 %v13592_v34, %v13529_v4 }
 0x5b2   : > { %v8928_v18 = vpop.f32.mrb[183].mxu1  ;;  %v10685_v47 = vpop.eup %10684  ;;  %10704 = vrcp.f32 %v7099_v33  ;;  %v7101_v24 = vadd.f32 1.0, %v10683_v36  ;;  %v8638_v36 = vmul.f32 -1.442695, %v9120_v61 }
 0x5b3   : > { %v10687_v37 = vpop.eup %10686  ;;  %10706 = vrcp.f32 %v7100_v17  ;;  %v7106_v44 = vadd.f32 1.0, %v10685_v47  ;;  %v8929_v55 = vadd.f32 %v8928_v18, %v8927_v38  ;;  %v6518_v28 = vpop.f32.mrb[120].mxu0  ;;  %v8639_v17 = vmul.f32 -1.442695, %v9121_v11 }
 0x5b4   : > { %v10689_v31 = vpop.eup %10688  ;;  %10708 = vrcp.f32 %v7101_v24  ;;  %v7107_v63 = vadd.f32 1.0, %v10687_v37  ;;  %v8930_v35 = vpop.f32.mrb[184].mxu1  ;;  %v13615_v53 = vadd.f32 %v6518_v28, %v13523_v0  ;;  %v8645_v47 = vmul.f32 -1.442695, %v9122_v29 }
 0x5b5   : > { %v10691_v9 = vpop.eup %10690  ;;  %10710 = vrcp.f32 %v7106_v44  ;;  %v7108_v43 = vadd.f32 1.0, %v10689_v31  ;;  %v13610_v39 = vadd.f32 %v8929_v55, %v6615_v1  ;;  %v6520_v54 = vpop.f32.mrb[121].mxu0  ;;  %v9124_v31 = vadd.f32 %v13597_v3, %v13523_v0 }
 0x5b6   : > { %v10693_v57 = vpop.eup %10692  ;;  %10712 = vrcp.f32 %v7107_v63  ;;  %v7113_v30 = vadd.f32 1.0, %v10691_v9  ;;  %v8931_v13 = vpop.f32.mrb[185].mxu1  ;;  %v13620_v45 = vadd.f32 %v6520_v54, %v13529_v4  ;;  %v8646_v9 = vmul.f32 -1.442695, %v9123_v2 }
 0x5b7   : > { %v10695_v10 = vpop.eup %10694  ;;  %v8765_v23 = vpack.c.bf16 %v10693_v57, %v10693_v57  ;;  %10714 = vrcp.f32 %v7108_v43  ;;  %v6522_v7 = vpop.f32.mrb[122].mxu0  ;;  %v8932_v32 = vadd.f32 %v8931_v13, %v8930_v35  ;;  %v9125_v3 = vadd.f32 %v13602_v20, %v13529_v4 }
 0x5b8   : > { %v10697_v40 = vpop.eup %10696  ;;  %10716 = vrcp.f32 %v7113_v30  ;;  %v7114_v8 = vadd.f32 1.0, %v10695_v10  ;;  %v8933_v50 = vpop.f32.mrb[186].mxu1  ;;  %v13627_v12 = vadd.f32 %v6522_v7, %v13523_v0  ;;  %v8652_v7 = vmul.f32 -1.442695, %v9124_v31 }
 0x5b9   : > { %v10699_v62 = vpop.eup %10698  ;;  %7770 = vst [vmem:[%s13284_s25 + $0x6c] sm:$0xf] %v8765_v23  ;;  %v7115_v42 = vadd.f32 1.0, %v10697_v40  ;;  %10718 = vpow2.f32 %v8631_v5  ;;  %v6524_v49 = vpop.f32.mrb[123].mxu0  ;;  %v13630_v58 = vadd.f32 %v8932_v32, %v13509_v25  ;;  %v8647_v40 = vmul.f32 -1.442695, %v13606_v6 }
 0x5ba   : > { %v8934_v15 = vpop.f32.mrb[187].mxu1  ;;  %v10701_v60 = vpop.eup %10700  ;;  %10720 = vrcp.f32 %v7114_v8  ;;  %v7120_v48 = vadd.f32 1.0, %v10699_v62  ;;  %v13633_v46 = vadd.f32 %v6524_v49, %v13529_v4  ;;  %v8659_v49 = vmul.f32 -1.442695, %v13615_v53 }
 0x5bb   : > { %v10703_v52 = vpop.eup %10702  ;;  %10722 = vrcp.f32 %v7115_v42  ;;  %v7121_v51 = vadd.f32 1.0, %v10701_v60  ;;  %v8935_v38 = vadd.f32 %v8934_v15, %v8933_v50  ;;  %v6528_v21 = vpop.f32.mrb[124].mxu0 }
 0x5bc   : > { %v10705_v26 = vpop.eup %10704  ;;  %10724 = vrcp.f32 %v7120_v48  ;;  %v7122_v33 = vadd.f32 1.0, %v10703_v52  ;;  %v8936_v37 = vpop.f32.mrb[188].mxu1  ;;  %v13644_v1 = vadd.f32 %v6528_v21, %v13523_v0 }
 0x5bd   : > { %v10707_v14 = vpop.eup %10706  ;;  %10726 = vrcp.f32 %v7121_v51  ;;  %v13639_v24 = vadd.f32 %v8935_v38, %v13513_v56  ;;  %v6530_v19 = vpop.f32.mrb[125].mxu0 }
 0x5be   : > { %v10709_v18 = vpop.eup %10708  ;;  %v8768_v25 = vpack.c.bf16 %v10707_v14, %v10705_v26  ;;  %10728 = vrcp.f32 %v7122_v33  ;;  %v8937_v63 = vpop.f32.mrb[189].mxu1  ;;  %v13648_v56 = vadd.f32 %v6530_v19, %v13529_v4 }
 0x5bf   : > { %v10711_v44 = vpop.eup %10710  ;;  %v8769_v34 = vpack.c.bf16 %v10709_v18, %v10709_v18  ;;  %10730 = vpow2.f32 %v8632_v59  ;;  %v8938_v43 = vadd.f32 %v8937_v63, %v8936_v37  ;;  %v6532_v5 = vpop.f32.mrb[126].mxu0 }
 0x5c0   : > { %v10713_v55 = vpop.eup %10712  ;;  %7773 = vst [vmem:[%s13284_s25 + $0x80] sm:$0xff] %v8768_v25  ;;  %10732 = vpow2.f32 %v8633_v22  ;;  %v8939_v57 = vpop.f32.mrb[190].mxu1  ;;  %v13654_v28 = vadd.f32 %v6532_v5, %v13523_v0  ;;  %v8666_v5 = vmul.f32 -1.442695, %v13627_v12 }
 0x5c1   : > { %v10715_v30 = vpop.eup %10714  ;;  %7774 = vst [vmem:[%s13284_s25 + $0x88] sm:$0xf] %v8769_v34  ;;  %v8772_v59 = vpack.c.bf16 %v10713_v55, %v10711_v44  ;;  %10734 = vpow2.f32 %v8638_v36  ;;  %v6534_v35 = vpop.f32.mrb[127].mxu0  ;;  %v13657_v54 = vadd.f32 %v8938_v43, %v13520_v27  ;;  %v8653_v27 = vmul.f32 -1.442695, %v9125_v3 }
 0x5c2   : > { %v8940_v10 = vpop.f32.mrb[191].mxu1  ;;  %v10717_v23 = vpop.eup %10716  ;;  %v8773_v61 = vpack.c.bf16 %v10715_v30, %v10715_v30  ;;  %10736 = vpow2.f32 %v8639_v17  ;;  %v13662_v8 = vadd.f32 %v6534_v35, %v13529_v4  ;;  %v8654_v4 = vmul.f32 -1.442695, %v13610_v39 }
 0x5c3   : > { %v10719_v13 = vpop.eup %10718  ;;  %7777 = vst [vmem:[%s13284_s25 + $0x9c] sm:$0xff] %v8772_v59  ;;  %10738 = vpow2.f32 %v8640_v16  ;;  %v8941_v20 = vadd.f32 %v8940_v10, %v8939_v57  ;;  %v8660_v16 = vmul.f32 -1.442695, %v13620_v45  ;;  %v8661_v45 = vmul.f32 -1.442695, %v13630_v58 }
 0x5c4   : > { %v10721_v0 = vpop.eup %10720  ;;  %7778 = vst [vmem:[%s13284_s25 + $0xa4] sm:$0xf] %v8773_v61  ;;  %v7127_v11 = vadd.f32 1.0, %v10719_v13  ;;  %10740 = vpow2.f32 %v8645_v47  ;;  %v8667_v59 = vmul.f32 -1.442695, %v13633_v46 }
 0x5c5   : > { %v10723_v50 = vpop.eup %10722  ;;  %v8776_v62 = vpack.c.bf16 %v10721_v0, %v10717_v23  ;;  %10742 = vpow2.f32 %v8646_v9  ;;  %v13666_v42 = vadd.f32 %v8941_v20, %v13526_v41  ;;  %v8668_v10 = vmul.f32 -1.442695, %v13639_v24 }
 0x5c6   : > { %v10725_v22 = vpop.eup %10724  ;;  %v8777_v6 = vpack.c.bf16 %v10723_v50, %v10723_v50  ;;  %10744 = vrcp.f32 %v7127_v11  ;;  %v8673_v58 = vmul.f32 -1.442695, %v13644_v1  ;;  %v8674_v13 = vmul.f32 -1.442695, %v13648_v56 }
 0x5c7   : > { %v10727_v32 = vpop.eup %10726  ;;  %7781 = vst [vmem:[%s13284_s25 + $0xb8] sm:$0xff] %v8776_v62  ;;  %10746 = vpow2.f32 %v8647_v40  ;;  %v8675_v20 = vmul.f32 -1.442695, %v13657_v54  ;;  %v8680_v1 = vmul.f32 -1.442695, %v13654_v28 }
 0x5c8   : > { %v10729_v15 = vpop.eup %10728  ;;  %7782 = vst [vmem:[%s13284_s25 + $0xc0] sm:$0xf] %v8777_v6  ;;  %v8780_v60 = vpack.c.bf16 %v10727_v32, %v10725_v22  ;;  %10748 = vpow2.f32 %v8652_v7  ;;  %v8681_v56 = vmul.f32 -1.442695, %v13662_v8  ;;  %v8682_v54 = vmul.f32 -1.442695, %v13666_v42 }
 0x5c9   : > { %v10731_v48 = vpop.eup %10730  ;;  %v8781_v29 = vpack.c.bf16 %v10729_v15, %v10729_v15  ;;  %10750 = vpow2.f32 %v8653_v27 }
 0x5ca   : > { %v10733_v41 = vpop.eup %10732  ;;  %7785 = vst [vmem:[%s13284_s25 + $0xd4] sm:$0xff] %v8780_v60  ;;  %v7128_v52 = vadd.f32 1.0, %v10731_v48  ;;  %10752 = vpow2.f32 %v8654_v4 }
 0x5cb   : > { %v10735_v51 = vpop.eup %10734  ;;  %7786 = vst [vmem:[%s13284_s25 + $0xdc] sm:$0xf] %v8781_v29  ;;  %v7129_v39 = vadd.f32 1.0, %v10733_v41  ;;  %10754 = vpow2.f32 %v8659_v49 }
 0x5cc   : > { %v10737_v26 = vpop.eup %10736  ;;  %10756 = vrcp.f32 %v7128_v52  ;;  %v7134_v33 = vadd.f32 1.0, %v10735_v51 }
 0x5cd   : > { %v10739_v2 = vpop.eup %10738  ;;  %10758 = vrcp.f32 %v7129_v39  ;;  %v7135_v53 = vadd.f32 1.0, %v10737_v26 }
 0x5ce   : > { %v10741_v38 = vpop.eup %10740  ;;  %10760 = vrcp.f32 %v7134_v33  ;;  %v7136_v14 = vadd.f32 1.0, %v10739_v2 }
 0x5cf   : > { %v10743_v36 = vpop.eup %10742  ;;  %10762 = vrcp.f32 %v7135_v53  ;;  %v7141_v17 = vadd.f32 1.0, %v10741_v38 }
 0x5d0   : > { %v10745_v18 = vpop.eup %10744  ;;  %10764 = vrcp.f32 %v7136_v14  ;;  %v7142_v25 = vadd.f32 1.0, %v10743_v36 }
 0x5d1   : > { %v10747_v47 = vpop.eup %10746  ;;  %10766 = vrcp.f32 %v7141_v17 }
 0x5d2   : > { %v10749_v21 = vpop.eup %10748  ;;  %10768 = vrcp.f32 %v7142_v25  ;;  %v7143_v37 = vadd.f32 1.0, %v10747_v47 }
 0x5d3   : > { %v10751_v44 = vpop.eup %10750  ;;  %v7148_v34 = vadd.f32 1.0, %v10749_v21  ;;  %10770 = vpow2.f32 %v8660_v16 }
 0x5d4   : > { %v10753_v31 = vpop.eup %10752  ;;  %10772 = vrcp.f32 %v7143_v37  ;;  %v7149_v19 = vadd.f32 1.0, %v10751_v44 }
 0x5d5   : > { %v10755_v63 = vpop.eup %10754  ;;  %10774 = vrcp.f32 %v7148_v34  ;;  %v7150_v55 = vadd.f32 1.0, %v10753_v31 }
 0x5d6   : > { %v10757_v9 = vpop.eup %10756  ;;  %10776 = vrcp.f32 %v7149_v19  ;;  %v7155_v43 = vadd.f32 1.0, %v10755_v63 }
 0x5d7   : > { %v10759_v57 = vpop.eup %10758  ;;  %v8784_v30 = vpack.c.bf16 %v10757_v9, %v10745_v18  ;;  %10778 = vrcp.f32 %v7150_v55 }
 0x5d8   : > { %v10761_v3 = vpop.eup %10760  ;;  %v8785_v35 = vpack.c.bf16 %v10759_v57, %v10759_v57  ;;  %10780 = vrcp.f32 %v7155_v43 }
 0x5d9   : > { %v10763_v23 = vpop.eup %10762  ;;  %7789 = vst [vmem:[%s13284_s25 + $0xf0] sm:$0xff] %v8784_v30  ;;  %10782 = vpow2.f32 %v8661_v45 }
 0x5da   : > { %v10765_v61 = vpop.eup %10764  ;;  %7790 = vst [vmem:[%s13284_s25 + $0xf8] sm:$0xf] %v8785_v35  ;;  %v8788_v12 = vpack.c.bf16 %v10763_v23, %v10761_v3  ;;  %10784 = vpow2.f32 %v8666_v5 }
 0x5db   : > { %v10767_v40 = vpop.eup %10766  ;;  %v8789_v46 = vpack.c.bf16 %v10765_v61, %v10765_v61  ;;  %10786 = vpow2.f32 %v8667_v59 }
 0x5dc   : > { %v10769_v0 = vpop.eup %10768  ;;  %7793 = vst [vmem:[%s13284_s25 + $0x10c] sm:$0xff] %v8788_v12  ;;  %10788 = vpow2.f32 %v8668_v10 }
 0x5dd   : > { %v10771_v24 = vpop.eup %10770  ;;  %7794 = vst [vmem:[%s13284_s25 + $0x114] sm:$0xf] %v8789_v46  ;;  %v8792_v11 = vpack.c.bf16 %v10769_v0, %v10767_v40  ;;  %10790 = vpow2.f32 %v8673_v58 }
 0x5de   : > { %v10773_v7 = vpop.eup %10772  ;;  %v7156_v50 = vadd.f32 1.0, %v10771_v24  ;;  %10792 = vpow2.f32 %v8674_v13 }
 0x5df   : > { %v10775_v62 = vpop.eup %10774  ;;  %7797 = vst [vmem:[%s13284_s25 + $0x128] sm:$0xff] %v8792_v11  ;;  %v8793_v27 = vpack.c.bf16 %v10773_v7, %v10773_v7  ;;  %10794 = vpow2.f32 %v8675_v20 }
 0x5e0   : > { %v10777_v22 = vpop.eup %10776  ;;  %10796 = vrcp.f32 %v7156_v50 }
 0x5e1   : > { %v10779_v6 = vpop.eup %10778  ;;  %7798 = vst [vmem:[%s13284_s25 + $0x130] sm:$0xf] %v8793_v27  ;;  %v8796_v4 = vpack.c.bf16 %v10777_v22, %v10775_v62  ;;  %10798 = vpow2.f32 %v8680_v1 }
 0x5e2   : > { %v10781_v28 = vpop.eup %10780  ;;  %v8797_v32 = vpack.c.bf16 %v10779_v6, %v10779_v6  ;;  %10800 = vpow2.f32 %v8681_v56 }
 0x5e3   : > { %v10783_v49 = vpop.eup %10782  ;;  %7801 = vst [vmem:[%s13284_s25 + $0x144] sm:$0xff] %v8796_v4  ;;  %10802 = vpow2.f32 %v8682_v54 }
 0x5e4   : > { %v10785_v8 = vpop.eup %10784  ;;  %7802 = vst [vmem:[%s13284_s25 + $0x14c] sm:$0xf] %v8797_v32  ;;  %v7157_v15 = vadd.f32 1.0, %v10783_v49 }
 0x5e5   : > { %v10787_v60 = vpop.eup %10786  ;;  %v7162_v48 = vadd.f32 1.0, %v10785_v8 }
 0x5e6   : > { %v10789_v29 = vpop.eup %10788  ;;  %10804 = vrcp.f32 %v7157_v15  ;;  %v7163_v42 = vadd.f32 1.0, %v10787_v60 }
 0x5e7   : > { %v10791_v41 = vpop.eup %10790  ;;  %10806 = vrcp.f32 %v7162_v48  ;;  %v7164_v52 = vadd.f32 1.0, %v10789_v29 }
 0x5e8   : > { %v10793_v51 = vpop.eup %10792  ;;  %10808 = vrcp.f32 %v7163_v42  ;;  %v7169_v39 = vadd.f32 1.0, %v10791_v41 }
 0x5e9   : > { %v10795_v26 = vpop.eup %10794  ;;  %10810 = vrcp.f32 %v7164_v52  ;;  %v7170_v33 = vadd.f32 1.0, %v10793_v51 }
 0x5ea   : > { %v10797_v2 = vpop.eup %10796  ;;  %10812 = vrcp.f32 %v7169_v39  ;;  %v7171_v53 = vadd.f32 1.0, %v10795_v26 }
 0x5eb   : > { %v10799_v38 = vpop.eup %10798  ;;  %v8800_v14 = vpack.c.bf16 %v10797_v2, %v10781_v28  ;;  %10814 = vrcp.f32 %v7170_v33 }
 0x5ec   : > { %v10801_v36 = vpop.eup %10800  ;;  %10816 = vrcp.f32 %v7171_v53  ;;  %v7176_v17 = vadd.f32 1.0, %v10799_v38 }
 0x5ed   : > { %v10803_v16 = vpop.eup %10802  ;;  %7805 = vst [vmem:[%s13284_s25 + $0x160] sm:$0xff] %v8800_v14  ;;  %v7177_v18 = vadd.f32 1.0, %v10801_v36 }
 0x5ee   : > { %10818 = vrcp.f32 %v7176_v17  ;;  %v7178_v25 = vadd.f32 1.0, %v10803_v16 }
 0x5ef   : > { %10820 = vrcp.f32 %v7177_v18 }
 0x5f0   : > { %v10805_v47 = vpop.eup %10804  ;;  %10822 = vrcp.f32 %v7178_v25 }
 0x5f1   : > { %v10807_v21 = vpop.eup %10806  ;;  %v8801_v37 = vpack.c.bf16 %v10805_v47, %v10805_v47 }
 0x5f2   : > { %v10809_v44 = vpop.eup %10808 }
 0x5f3   : > { %v10811_v34 = vpop.eup %10810  ;;  %7806 = vst [vmem:[%s13284_s25 + $0x168] sm:$0xf] %v8801_v37  ;;  %v8804_v31 = vpack.c.bf16 %v10809_v44, %v10807_v21 }
 0x5f4   : > { %v10813_v19 = vpop.eup %10812  ;;  %v8805_v63 = vpack.c.bf16 %v10811_v34, %v10811_v34 }
 0x5f5   : > { %v10815_v55 = vpop.eup %10814  ;;  %7809 = vst [vmem:[%s13284_s25 + $0x17c] sm:$0xff] %v8804_v31 }
 0x5f6   : > { %v10817_v45 = vpop.eup %10816  ;;  %7810 = vst [vmem:[%s13284_s25 + $0x184] sm:$0xf] %v8805_v63  ;;  %v8808_v9 = vpack.c.bf16 %v10815_v55, %v10813_v19 }
 0x5f7   : > { %v8809_v43 = vpack.c.bf16 %v10817_v45, %v10817_v45 }
 0x5f8   : > { %v10819_v5 = vpop.eup %10818  ;;  %7813 = vst [vmem:[%s13284_s25 + $0x198] sm:$0xff] %v8808_v9 }
 0x5f9   : > { %v10821_v57 = vpop.eup %10820  ;;  %7814 = vst [vmem:[%s13284_s25 + $0x1a0] sm:$0xf] %v8809_v43 }
 0x5fa   : > { %v10823_v30 = vpop.eup %10822  ;;  %v8812_v59 = vpack.c.bf16 %v10821_v57, %v10819_v5 }
 0x5fb   : > { %v8813_v3 = vpack.c.bf16 %v10823_v30, %v10823_v30 }
 0x5fc   : > { %7817 = vst [vmem:[%s13284_s25 + $0x1b4] sm:$0xff] %v8812_v59 }
 0x5fd   : > { %7818 = vst [vmem:[%s13284_s25 + $0x1bc] sm:$0xf] %v8813_v3 }
 0x5fe PF: > { %s22_s17 = sadd.s32 1, %s10831_s17  }
 0x5ff   : > { %p19_p4 = scmp.ge.s32.totalorder %s22_s17, 4  }
 0x601   :  { %21 = sbr.rel (!%p19_p4) target bundleno = 1 (0x1), region = 105 }

</bundles_post_ra>
